<compile_context>
chip_gen: v7x
topology: tpu7x:2x2x1
jax: 0.10.0
libtpu: 0.0.40
codegen_flags: <defaults>
</compile_context>

<pallas_src>
import functools

import jax
import jax.numpy as jnp
from jax.experimental import pallas as pl
from jax.experimental.pallas import tpu as pltpu


def _round_up(x, m):
    return (x + m - 1) // m * m


def _row_tile(h, w, target_pixels):
    """Largest divisor of H whose row-tile covers <= target_pixels output pixels."""
    tr = max(1, min(h, max(1, target_pixels // max(w, 1))))
    while h % tr:
        tr -= 1
    return tr


# ----------------------------------------------------------------------------
# Pallas kernel: 3x3 conv (nine in-kernel shifted-tap matmuls) + bias + ReLU
#                + GAP accumulation + linear head.
# grid = (B, H_tiles); row-tile axis is the reduction ("arbitrary") axis.
# ----------------------------------------------------------------------------
def _timm_fwd_kernel(H, W, Cin, TR,
                     x_ref,    # (1, H+2, W+2, Cin) bf16  padded NHWC image (grid-invariant over t)
                     wc_ref,   # (9, Cin, Cp)       bf16  conv taps (kh*3+kw, Cin, Cout_pad)
                     cb_ref,   # (1, Cp)            f32   conv bias
                     wh_ref,   # (Cp, NCp)          f32   head weight
                     bh_ref,   # (1, NCp)           f32   head bias
                     out_ref,  # (1, 1, NCp)        f32   logits for this batch element
                     acc_ref): # (8, Cp)            f32   GAP partial-sum accumulator
    t = pl.program_id(1)

    @pl.when(t == 0)
    def _init():
        acc_ref[...] = jnp.zeros_like(acc_ref)

    r0 = pl.multiple_of(t * TR, TR)       # first output row of this tile
    m = TR * W                            # output pixels in this tile
    cp = wc_ref.shape[-1]

    # 3x3 conv over this row tile: nine shifted-window taps sliced straight out
    # of the resident padded image in VMEM, each feeding one MXU matmul with
    # f32 accumulation.  No im2col slab ever touches HBM.
    feat = jnp.zeros((m, cp), jnp.float32)
    for kh in range(3):
        for kw in range(3):
            tap = x_ref[0, pl.ds(r0 + kh, TR), pl.ds(kw, W), :]     # (TR, W, Cin)
            feat += jnp.dot(tap.reshape(m, Cin), wc_ref[kh * 3 + kw],
                            preferred_element_type=jnp.float32)

    feat = jnp.maximum(feat + cb_ref[...], 0.0)                     # bias + ReLU

    # GAP partial sums: m -> 8 with plain VPU vreg adds and an unmasked (8,128)
    # store.  (No padded-row mask needed: TR divides H by construction.)
    if m % 8 == 0:
        acc_ref[...] += feat.reshape(m // 8, 8, cp).sum(axis=0)
    else:  # rare ragged-width fallback (not hit in the test shapes)
        acc_ref[0:1, :] += jnp.sum(feat, axis=0, keepdims=True)

    @pl.when(t == pl.num_programs(1) - 1)
    def _finalize():
        pooled = jnp.sum(acc_ref[...], axis=0, keepdims=True) * (1.0 / (H * W))
        out_ref[0] = jnp.dot(pooled, wh_ref[...],
                             preferred_element_type=jnp.float32) + bh_ref[...]


@functools.partial(jax.jit, static_argnames=("num_classes", "target_pixels"))
def timm_forward(x_nchw, conv_w, conv_b, head_w, head_b, *,
                 num_classes, target_pixels=2048):
    """x_nchw: (B, Cin, H, W) — PyTorch NCHW convention. Returns (B, num_classes)."""
    B, Cin, H, W = x_nchw.shape
    Cout = conv_w.shape[0]

    TR = _row_tile(H, W, target_pixels)   # output rows per grid step (divides H)
    HT = H // TR

    Cp = _round_up(Cout, 128)             # lane-dense hidden width (weights only)
    NCp = _round_up(num_classes, 128)     # lane-dense logits

    # --- glue (fused under jit): NCHW -> NHWC, zero-pad spatial by 1, bf16.
    # This small padded slab is the ONLY activation that reaches HBM.
    x = jnp.transpose(x_nchw, (0, 2, 3, 1)).astype(jnp.float32)      # (B,H,W,Cin)
    xp = jnp.pad(x, ((0, 0), (1, 1), (1, 1), (0, 0))).astype(jnp.bfloat16)

    # Conv weight (Cout,Cin,3,3) -> (kh*3+kw, Cin, Cout), pad Cout -> Cp, bf16.
    wc = jnp.transpose(conv_w, (2, 3, 1, 0)).reshape(9, Cin, Cout)
    wc = jnp.pad(wc, ((0, 0), (0, 0), (0, Cp - Cout))).astype(jnp.bfloat16)
    cb = jnp.pad(conv_b.astype(jnp.float32).reshape(1, Cout),
                 ((0, 0), (0, Cp - Cout)))

    # Head stays f32 (tiny matmul; keeps final-logit precision).
    wh = jnp.pad(head_w.astype(jnp.float32),
                 ((0, Cp - Cout), (0, NCp - num_classes)))
    bh = jnp.pad(head_b.astype(jnp.float32).reshape(1, num_classes),
                 ((0, 0), (0, NCp - num_classes)))

    kernel = functools.partial(_timm_fwd_kernel, H, W, Cin, TR)

    out = pl.pallas_call(
        kernel,
        out_shape=jax.ShapeDtypeStruct((B, 1, NCp), jnp.float32),
        grid_spec=pltpu.PrefetchScalarGridSpec(
            num_scalar_prefetch=0,
            grid=(B, HT),
            in_specs=[
                # Padded image: full spatial extent per batch element, invariant
                # across the row-tile axis -> one DMA per batch element.
                pl.BlockSpec((1, H + 2, W + 2, Cin), lambda b, t: (b, 0, 0, 0)),
                # Grid-invariant weights (tiny; double-buffer overhead negligible).
                pl.BlockSpec((9, Cin, Cp), lambda b, t: (0, 0, 0)),
                pl.BlockSpec((1, Cp), lambda b, t: (0, 0)),
                pl.BlockSpec((Cp, NCp), lambda b, t: (0, 0)),
                pl.BlockSpec((1, NCp), lambda b, t: (0, 0)),
            ],
            out_specs=pl.BlockSpec((1, 1, NCp), lambda b, t: (b, 0, 0)),
            scratch_shapes=[pltpu.VMEM((8, Cp), jnp.float32)],
        ),
        compiler_params=pltpu.CompilerParams(
            dimension_semantics=("parallel", "arbitrary")),
    )(xp, wc, cb, wh, bh)

    return out[:, 0, :num_classes]


# ----------------------------------------------------------------------------
# Pure-JAX f32 reference (mirrors the PyTorch module semantics).
# ----------------------------------------------------------------------------
def _reference(x_nchw, conv_w, conv_b, head_w, head_b):
    y = jax.lax.conv_general_dilated(
        x_nchw, conv_w, window_strides=(1, 1), padding=((1, 1), (1, 1)),
        dimension_numbers=("NCHW", "OIHW", "NCHW"))
    y = jax.nn.relu(y + conv_b[None, :, None, None])
    pooled = jnp.mean(y, axis=(2, 3))                              # (B, Cout)
    return pooled @ head_w + head_b[None, :]


if __name__ == "__main__":
    # Module config: num_channels=4, num_classes=10, hidden width 32.
    B, Cin, H, W = 2, 4, 16, 16
    Cout, NC = 32, 10

    key = jax.random.PRNGKey(0)
    k_x, k_w, k_b, k_hw, k_hb = jax.random.split(key, 5)

    x = jax.random.normal(k_x, (B, Cin, H, W), dtype=jnp.float32)
    conv_w = jax.random.normal(k_w, (Cout, Cin, 3, 3), dtype=jnp.float32) * 0.1
    conv_b = jax.random.normal(k_b, (Cout,), dtype=jnp.float32) * 0.1
    head_w = jax.random.normal(k_hw, (Cout, NC), dtype=jnp.float32) * 0.1
    head_b = jax.random.normal(k_hb, (NC,), dtype=jnp.float32) * 0.1

    out = timm_forward(x, conv_w, conv_b, head_w, head_b, num_classes=NC)
    out = jax.block_until_ready(out)

    ref = _reference(x, conv_w, conv_b, head_w, head_b)
    assert out.shape == (B, NC), out.shape
    # bf16 activations / conv weights (f32 accumulation) vs. pure-f32 reference.
    assert jnp.allclose(out, ref, atol=1e-2, rtol=1e-2), \
        f"max abs err {jnp.max(jnp.abs(out - ref))}"

    print("KERNEL_OK")
</pallas_src>

<mosaic_0001>
module attributes {stable_mosaic.version = 11 : i64} {
  func.func @_timm_fwd_kernel(%arg0: i32, %arg1: i32, %arg2: memref<1x18x18x4xbf16, #tpu.memory_space<vmem>>, %arg3: memref<9x4x128xbf16, #tpu.memory_space<vmem>>, %arg4: memref<1x128xf32, #tpu.memory_space<vmem>>, %arg5: memref<128x128xf32, #tpu.memory_space<vmem>>, %arg6: memref<1x128xf32, #tpu.memory_space<vmem>>, %arg7: memref<1x1x128xf32, #tpu.memory_space<vmem>>, %arg8: memref<8x128xf32, #tpu.memory_space<vmem>>) attributes {dimension_semantics = [#tpu.dimension_semantics<parallel>, #tpu.dimension_semantics<arbitrary>], iteration_bounds = array<i64: 2, 1>, scalar_prefetch = 0 : i64, scratch_operands = 1 : i64, tpu.core_type = #tpu.core_type<tc>, window_params = [{transform_indices = @transform_0, window_bounds = array<i64: 1, 18, 18, 4>}, {pipeline_mode = #tpu.pipeline_mode<synchronous>, transform_indices = @transform_1, window_bounds = array<i64: 9, 4, 128>}, {pipeline_mode = #tpu.pipeline_mode<synchronous>, transform_indices = @transform_2, window_bounds = array<i64: 1, 128>}, {pipeline_mode = #tpu.pipeline_mode<synchronous>, transform_indices = @transform_3, window_bounds = array<i64: 128, 128>}, {pipeline_mode = #tpu.pipeline_mode<synchronous>, transform_indices = @transform_4, window_bounds = array<i64: 1, 128>}, {transform_indices = @transform_5, window_bounds = array<i64: 1, 1, 128>}]} {
    %c0_i32 = arith.constant 0 : i32
    %0 = arith.cmpi eq, %arg1, %c0_i32 : i32
    %1 = arith.extui %0 : i1 to i32
    %c0_i32_0 = arith.constant 0 : i32
    %2 = arith.cmpi ne, %1, %c0_i32_0 : i32
    scf.if %2 {
      %cst_72 = arith.constant 0.000000e+00 : f32
      %100 = vector.broadcast %cst_72 : f32 to vector<8x128xf32>
      %c0_73 = arith.constant 0 : index
      %c0_74 = arith.constant 0 : index
      %101 = vector.load %arg8[%c0_73, %c0_74] : memref<8x128xf32, #tpu.memory_space<vmem>>, vector<8x128xf32>
      tpu.vector_store %arg8[%c0_73, %c0_74], %100 {strides = array<i32>} : memref<8x128xf32, #tpu.memory_space<vmem>>, vector<8x128xf32>,
    } else {
    }
    %c16_i32 = arith.constant 16 : i32
    %3 = arith.muli %arg1, %c16_i32 : i32
    %4 = tpu.assume_multiple %3, 16 : i32
    %cst = arith.constant 0.000000e+00 : f32
    %5 = vector.broadcast %cst : f32 to vector<256x128xf32>
    %c0_i32_1 = arith.constant 0 : i32
    %6 = arith.addi %4, %c0_i32_1 : i32
    %c0 = arith.constant 0 : index
    %7 = arith.index_cast %6 : i32 to index
    %c0_2 = arith.constant 0 : index
    %c0_3 = arith.constant 0 : index
    %8 = vector.load %arg2[%c0, %7, %c0_2, %c0_3] : memref<1x18x18x4xbf16, #tpu.memory_space<vmem>>, vector<1x16x16x4xbf16>
    %9 = vector.shape_cast %8 : vector<1x16x16x4xbf16> to vector<16x16x4xbf16>
    %10 = vector.shape_cast %9 : vector<16x16x4xbf16> to vector<256x4xbf16>
    %c0_4 = arith.constant 0 : index
    %c0_5 = arith.constant 0 : index
    %c0_6 = arith.constant 0 : index
    %11 = vector.load %arg3[%c0_4, %c0_5, %c0_6] : memref<9x4x128xbf16, #tpu.memory_space<vmem>>, vector<1x4x128xbf16>
    %12 = vector.shape_cast %11 : vector<1x4x128xbf16> to vector<4x128xbf16>
    %cst_7 = arith.constant dense<0.000000e+00> : vector<256x128xf32>
    %13 = tpu.matmul %10, %12, %cst_7 {dimension_numbers = #tpu.dot_dimension_numbers<[1], [0], [0], [1], [0, 0, 1, 1], [], []>} : vector<256x4xbf16>, vector<4x128xbf16>, vector<256x128xf32> -> vector<256x128xf32>
    %14 = arith.addf %5, %13 : vector<256x128xf32>
    %c0_i32_8 = arith.constant 0 : i32
    %15 = arith.addi %4, %c0_i32_8 : i32
    %c0_9 = arith.constant 0 : index
    %16 = arith.index_cast %15 : i32 to index
    %c1 = arith.constant 1 : index
    %c0_10 = arith.constant 0 : index
    %17 = vector.load %arg2[%c0_9, %16, %c1, %c0_10] : memref<1x18x18x4xbf16, #tpu.memory_space<vmem>>, vector<1x16x16x4xbf16>
    %18 = vector.shape_cast %17 : vector<1x16x16x4xbf16> to vector<16x16x4xbf16>
    %19 = vector.shape_cast %18 : vector<16x16x4xbf16> to vector<256x4xbf16>
    %c1_11 = arith.constant 1 : index
    %c0_12 = arith.constant 0 : index
    %c0_13 = arith.constant 0 : index
    %20 = vector.load %arg3[%c1_11, %c0_12, %c0_13] : memref<9x4x128xbf16, #tpu.memory_space<vmem>>, vector<1x4x128xbf16>
    %21 = vector.shape_cast %20 : vector<1x4x128xbf16> to vector<4x128xbf16>
    %cst_14 = arith.constant dense<0.000000e+00> : vector<256x128xf32>
    %22 = tpu.matmul %19, %21, %cst_14 {dimension_numbers = #tpu.dot_dimension_numbers<[1], [0], [0], [1], [0, 0, 1, 1], [], []>} : vector<256x4xbf16>, vector<4x128xbf16>, vector<256x128xf32> -> vector<256x128xf32>
    %23 = arith.addf %14, %22 : vector<256x128xf32>
    %c0_i32_15 = arith.constant 0 : i32
    %24 = arith.addi %4, %c0_i32_15 : i32
    %c0_16 = arith.constant 0 : index
    %25 = arith.index_cast %24 : i32 to index
    %c2 = arith.constant 2 : index
    %c0_17 = arith.constant 0 : index
    %26 = vector.load %arg2[%c0_16, %25, %c2, %c0_17] : memref<1x18x18x4xbf16, #tpu.memory_space<vmem>>, vector<1x16x16x4xbf16>
    %27 = vector.shape_cast %26 : vector<1x16x16x4xbf16> to vector<16x16x4xbf16>
    %28 = vector.shape_cast %27 : vector<16x16x4xbf16> to vector<256x4xbf16>
    %c2_18 = arith.constant 2 : index
    %c0_19 = arith.constant 0 : index
    %c0_20 = arith.constant 0 : index
    %29 = vector.load %arg3[%c2_18, %c0_19, %c0_20] : memref<9x4x128xbf16, #tpu.memory_space<vmem>>, vector<1x4x128xbf16>
    %30 = vector.shape_cast %29 : vector<1x4x128xbf16> to vector<4x128xbf16>
    %cst_21 = arith.constant dense<0.000000e+00> : vector<256x128xf32>
    %31 = tpu.matmul %28, %30, %cst_21 {dimension_numbers = #tpu.dot_dimension_numbers<[1], [0], [0], [1], [0, 0, 1, 1], [], []>} : vector<256x4xbf16>, vector<4x128xbf16>, vector<256x128xf32> -> vector<256x128xf32>
    %32 = arith.addf %23, %31 : vector<256x128xf32>
    %c1_i32 = arith.constant 1 : i32
    %33 = arith.addi %4, %c1_i32 : i32
    %c0_22 = arith.constant 0 : index
    %34 = arith.index_cast %33 : i32 to index
    %c0_23 = arith.constant 0 : index
    %c0_24 = arith.constant 0 : index
    %35 = vector.load %arg2[%c0_22, %34, %c0_23, %c0_24] : memref<1x18x18x4xbf16, #tpu.memory_space<vmem>>, vector<1x16x16x4xbf16>
    %36 = vector.shape_cast %35 : vector<1x16x16x4xbf16> to vector<16x16x4xbf16>
    %37 = vector.shape_cast %36 : vector<16x16x4xbf16> to vector<256x4xbf16>
    %c3 = arith.constant 3 : index
    %c0_25 = arith.constant 0 : index
    %c0_26 = arith.constant 0 : index
    %38 = vector.load %arg3[%c3, %c0_25, %c0_26] : memref<9x4x128xbf16, #tpu.memory_space<vmem>>, vector<1x4x128xbf16>
    %39 = vector.shape_cast %38 : vector<1x4x128xbf16> to vector<4x128xbf16>
    %cst_27 = arith.constant dense<0.000000e+00> : vector<256x128xf32>
    %40 = tpu.matmul %37, %39, %cst_27 {dimension_numbers = #tpu.dot_dimension_numbers<[1], [0], [0], [1], [0, 0, 1, 1], [], []>} : vector<256x4xbf16>, vector<4x128xbf16>, vector<256x128xf32> -> vector<256x128xf32>
    %41 = arith.addf %32, %40 : vector<256x128xf32>
    %c1_i32_28 = arith.constant 1 : i32
    %42 = arith.addi %4, %c1_i32_28 : i32
    %c0_29 = arith.constant 0 : index
    %43 = arith.index_cast %42 : i32 to index
    %c1_30 = arith.constant 1 : index
    %c0_31 = arith.constant 0 : index
    %44 = vector.load %arg2[%c0_29, %43, %c1_30, %c0_31] : memref<1x18x18x4xbf16, #tpu.memory_space<vmem>>, vector<1x16x16x4xbf16>
    %45 = vector.shape_cast %44 : vector<1x16x16x4xbf16> to vector<16x16x4xbf16>
    %46 = vector.shape_cast %45 : vector<16x16x4xbf16> to vector<256x4xbf16>
    %c4 = arith.constant 4 : index
    %c0_32 = arith.constant 0 : index
    %c0_33 = arith.constant 0 : index
    %47 = vector.load %arg3[%c4, %c0_32, %c0_33] : memref<9x4x128xbf16, #tpu.memory_space<vmem>>, vector<1x4x128xbf16>
    %48 = vector.shape_cast %47 : vector<1x4x128xbf16> to vector<4x128xbf16>
    %cst_34 = arith.constant dense<0.000000e+00> : vector<256x128xf32>
    %49 = tpu.matmul %46, %48, %cst_34 {dimension_numbers = #tpu.dot_dimension_numbers<[1], [0], [0], [1], [0, 0, 1, 1], [], []>} : vector<256x4xbf16>, vector<4x128xbf16>, vector<256x128xf32> -> vector<256x128xf32>
    %50 = arith.addf %41, %49 : vector<256x128xf32>
    %c1_i32_35 = arith.constant 1 : i32
    %51 = arith.addi %4, %c1_i32_35 : i32
    %c0_36 = arith.constant 0 : index
    %52 = arith.index_cast %51 : i32 to index
    %c2_37 = arith.constant 2 : index
    %c0_38 = arith.constant 0 : index
    %53 = vector.load %arg2[%c0_36, %52, %c2_37, %c0_38] : memref<1x18x18x4xbf16, #tpu.memory_space<vmem>>, vector<1x16x16x4xbf16>
    %54 = vector.shape_cast %53 : vector<1x16x16x4xbf16> to vector<16x16x4xbf16>
    %55 = vector.shape_cast %54 : vector<16x16x4xbf16> to vector<256x4xbf16>
    %c5 = arith.constant 5 : index
    %c0_39 = arith.constant 0 : index
    %c0_40 = arith.constant 0 : index
    %56 = vector.load %arg3[%c5, %c0_39, %c0_40] : memref<9x4x128xbf16, #tpu.memory_space<vmem>>, vector<1x4x128xbf16>
    %57 = vector.shape_cast %56 : vector<1x4x128xbf16> to vector<4x128xbf16>
    %cst_41 = arith.constant dense<0.000000e+00> : vector<256x128xf32>
    %58 = tpu.matmul %55, %57, %cst_41 {dimension_numbers = #tpu.dot_dimension_numbers<[1], [0], [0], [1], [0, 0, 1, 1], [], []>} : vector<256x4xbf16>, vector<4x128xbf16>, vector<256x128xf32> -> vector<256x128xf32>
    %59 = arith.addf %50, %58 : vector<256x128xf32>
    %c2_i32 = arith.constant 2 : i32
    %60 = arith.addi %4, %c2_i32 : i32
    %c0_42 = arith.constant 0 : index
    %61 = arith.index_cast %60 : i32 to index
    %c0_43 = arith.constant 0 : index
    %c0_44 = arith.constant 0 : index
    %62 = vector.load %arg2[%c0_42, %61, %c0_43, %c0_44] : memref<1x18x18x4xbf16, #tpu.memory_space<vmem>>, vector<1x16x16x4xbf16>
    %63 = vector.shape_cast %62 : vector<1x16x16x4xbf16> to vector<16x16x4xbf16>
    %64 = vector.shape_cast %63 : vector<16x16x4xbf16> to vector<256x4xbf16>
    %c6 = arith.constant 6 : index
    %c0_45 = arith.constant 0 : index
    %c0_46 = arith.constant 0 : index
    %65 = vector.load %arg3[%c6, %c0_45, %c0_46] : memref<9x4x128xbf16, #tpu.memory_space<vmem>>, vector<1x4x128xbf16>
    %66 = vector.shape_cast %65 : vector<1x4x128xbf16> to vector<4x128xbf16>
    %cst_47 = arith.constant dense<0.000000e+00> : vector<256x128xf32>
    %67 = tpu.matmul %64, %66, %cst_47 {dimension_numbers = #tpu.dot_dimension_numbers<[1], [0], [0], [1], [0, 0, 1, 1], [], []>} : vector<256x4xbf16>, vector<4x128xbf16>, vector<256x128xf32> -> vector<256x128xf32>
    %68 = arith.addf %59, %67 : vector<256x128xf32>
    %c2_i32_48 = arith.constant 2 : i32
    %69 = arith.addi %4, %c2_i32_48 : i32
    %c0_49 = arith.constant 0 : index
    %70 = arith.index_cast %69 : i32 to index
    %c1_50 = arith.constant 1 : index
    %c0_51 = arith.constant 0 : index
    %71 = vector.load %arg2[%c0_49, %70, %c1_50, %c0_51] : memref<1x18x18x4xbf16, #tpu.memory_space<vmem>>, vector<1x16x16x4xbf16>
    %72 = vector.shape_cast %71 : vector<1x16x16x4xbf16> to vector<16x16x4xbf16>
    %73 = vector.shape_cast %72 : vector<16x16x4xbf16> to vector<256x4xbf16>
    %c7 = arith.constant 7 : index
    %c0_52 = arith.constant 0 : index
    %c0_53 = arith.constant 0 : index
    %74 = vector.load %arg3[%c7, %c0_52, %c0_53] : memref<9x4x128xbf16, #tpu.memory_space<vmem>>, vector<1x4x128xbf16>
    %75 = vector.shape_cast %74 : vector<1x4x128xbf16> to vector<4x128xbf16>
    %cst_54 = arith.constant dense<0.000000e+00> : vector<256x128xf32>
    %76 = tpu.matmul %73, %75, %cst_54 {dimension_numbers = #tpu.dot_dimension_numbers<[1], [0], [0], [1], [0, 0, 1, 1], [], []>} : vector<256x4xbf16>, vector<4x128xbf16>, vector<256x128xf32> -> vector<256x128xf32>
    %77 = arith.addf %68, %76 : vector<256x128xf32>
    %c2_i32_55 = arith.constant 2 : i32
    %78 = arith.addi %4, %c2_i32_55 : i32
    %c0_56 = arith.constant 0 : index
    %79 = arith.index_cast %78 : i32 to index
    %c2_57 = arith.constant 2 : index
    %c0_58 = arith.constant 0 : index
    %80 = vector.load %arg2[%c0_56, %79, %c2_57, %c0_58] : memref<1x18x18x4xbf16, #tpu.memory_space<vmem>>, vector<1x16x16x4xbf16>
    %81 = vector.shape_cast %80 : vector<1x16x16x4xbf16> to vector<16x16x4xbf16>
    %82 = vector.shape_cast %81 : vector<16x16x4xbf16> to vector<256x4xbf16>
    %c8 = arith.constant 8 : index
    %c0_59 = arith.constant 0 : index
    %c0_60 = arith.constant 0 : index
    %83 = vector.load %arg3[%c8, %c0_59, %c0_60] : memref<9x4x128xbf16, #tpu.memory_space<vmem>>, vector<1x4x128xbf16>
    %84 = vector.shape_cast %83 : vector<1x4x128xbf16> to vector<4x128xbf16>
    %cst_61 = arith.constant dense<0.000000e+00> : vector<256x128xf32>
    %85 = tpu.matmul %82, %84, %cst_61 {dimension_numbers = #tpu.dot_dimension_numbers<[1], [0], [0], [1], [0, 0, 1, 1], [], []>} : vector<256x4xbf16>, vector<4x128xbf16>, vector<256x128xf32> -> vector<256x128xf32>
    %86 = arith.addf %77, %85 : vector<256x128xf32>
    %c0_62 = arith.constant 0 : index
    %c0_63 = arith.constant 0 : index
    %87 = vector.load %arg4[%c0_62, %c0_63] : memref<1x128xf32, #tpu.memory_space<vmem>>, vector<1x128xf32>
    %88 = vector.broadcast %87 : vector<1x128xf32> to vector<256x128xf32>
    %89 = arith.addf %86, %88 : vector<256x128xf32>
    %cst_64 = arith.constant 0.000000e+00 : f32
    %90 = vector.broadcast %cst_64 : f32 to vector<256x128xf32>
    %91 = arith.maximumf %89, %90 : vector<256x128xf32>
    %c0_65 = arith.constant 0 : index
    %c0_66 = arith.constant 0 : index
    %92 = vector.load %arg8[%c0_65, %c0_66] : memref<8x128xf32, #tpu.memory_space<vmem>>, vector<8x128xf32>
    %93 = vector.shape_cast %91 : vector<256x128xf32> to vector<32x8x128xf32>
    %cst_67 = arith.constant dense<0.000000e+00> : vector<8x128xf32>
    %94 = vector.multi_reduction <add>, %93, %cst_67 [0] : vector<32x8x128xf32> to vector<8x128xf32>
    %95 = arith.addf %92, %94 : vector<8x128xf32>
    %c0_68 = arith.constant 0 : index
    %c0_69 = arith.constant 0 : index
    %96 = vector.load %arg8[%c0_68, %c0_69] : memref<8x128xf32, #tpu.memory_space<vmem>>, vector<8x128xf32>
    tpu.vector_store %arg8[%c0_68, %c0_69], %95 {strides = array<i32>} : memref<8x128xf32, #tpu.memory_space<vmem>>, vector<8x128xf32>,
    %c0_i32_70 = arith.constant 0 : i32
    %97 = arith.cmpi eq, %arg1, %c0_i32_70 : i32
    %98 = arith.extui %97 : i1 to i32
    %c0_i32_71 = arith.constant 0 : i32
    %99 = arith.cmpi ne, %98, %c0_i32_71 : i32
    scf.if %99 {
      %c0_72 = arith.constant 0 : index
      %c0_73 = arith.constant 0 : index
      %100 = vector.load %arg8[%c0_72, %c0_73] : memref<8x128xf32, #tpu.memory_space<vmem>>, vector<8x128xf32>
      %cst_74 = arith.constant dense<0.000000e+00> : vector<128xf32>
      %101 = vector.multi_reduction <add>, %100, %cst_74 [0] : vector<8x128xf32> to vector<128xf32>
      %102 = vector.shape_cast %101 : vector<128xf32> to vector<1x128xf32>
      %cst_75 = arith.constant 3.906250e-03 : f32
      %103 = vector.broadcast %cst_75 : f32 to vector<1x128xf32>
      %104 = arith.mulf %102, %103 : vector<1x128xf32>
      %c0_76 = arith.constant 0 : index
      %c0_77 = arith.constant 0 : index
      %105 = vector.load %arg5[%c0_76, %c0_77] : memref<128x128xf32, #tpu.memory_space<vmem>>, vector<128x128xf32>
      %cst_78 = arith.constant dense<0.000000e+00> : vector<1x128xf32>
      %106 = tpu.matmul %104, %105, %cst_78 {dimension_numbers = #tpu.dot_dimension_numbers<[1], [0], [0], [1], [0, 0, 1, 1], [], []>} : vector<1x128xf32>, vector<128x128xf32>, vector<1x128xf32> -> vector<1x128xf32>
      %c0_79 = arith.constant 0 : index
      %c0_80 = arith.constant 0 : index
      %107 = vector.load %arg6[%c0_79, %c0_80] : memref<1x128xf32, #tpu.memory_space<vmem>>, vector<1x128xf32>
      %108 = arith.addf %106, %107 : vector<1x128xf32>
      %c0_81 = arith.constant 0 : index
      %c0_82 = arith.constant 0 : index
      %c0_83 = arith.constant 0 : index
      %109 = vector.load %arg7[%c0_81, %c0_82, %c0_83] : memref<1x1x128xf32, #tpu.memory_space<vmem>>, vector<1x1x128xf32>
      %110 = vector.shape_cast %109 : vector<1x1x128xf32> to vector<1x128xf32>
      %111 = vector.shape_cast %108 : vector<1x128xf32> to vector<1x1x128xf32>
      tpu.vector_store %arg7[%c0_81, %c0_82, %c0_83], %111 {strides = array<i32>} : memref<1x1x128xf32, #tpu.memory_space<vmem>>, vector<1x1x128xf32>,
    } else {
    }
    return
  }
  func.func @transform_0(%arg0: i32, %arg1: i32) -> (i32, i32, i32, i32) {
    %c0_i32 = arith.constant 0 : i32
    %c0_i32_0 = arith.constant 0 : i32
    %c0_i32_1 = arith.constant 0 : i32
    %c0_i32_2 = arith.constant 0 : i32
    return %arg0, %c0_i32, %c0_i32_0, %c0_i32_1 : i32, i32, i32, i32
  }
  func.func @transform_1(%arg0: i32, %arg1: i32) -> (i32, i32, i32) {
    %c0_i32 = arith.constant 0 : i32
    %c0_i32_0 = arith.constant 0 : i32
    %c0_i32_1 = arith.constant 0 : i32
    %c0_i32_2 = arith.constant 0 : i32
    return %c0_i32, %c0_i32_0, %c0_i32_1 : i32, i32, i32
  }
  func.func @transform_2(%arg0: i32, %arg1: i32) -> (i32, i32) {
    %c0_i32 = arith.constant 0 : i32
    %c0_i32_0 = arith.constant 0 : i32
    %c0_i32_1 = arith.constant 0 : i32
    return %c0_i32, %c0_i32_0 : i32, i32
  }
  func.func @transform_3(%arg0: i32, %arg1: i32) -> (i32, i32) {
    %c0_i32 = arith.constant 0 : i32
    %c0_i32_0 = arith.constant 0 : i32
    %c0_i32_1 = arith.constant 0 : i32
    return %c0_i32, %c0_i32_0 : i32, i32
  }
  func.func @transform_4(%arg0: i32, %arg1: i32) -> (i32, i32) {
    %c0_i32 = arith.constant 0 : i32
    %c0_i32_0 = arith.constant 0 : i32
    %c0_i32_1 = arith.constant 0 : i32
    return %c0_i32, %c0_i32_0 : i32, i32
  }
  func.func @transform_5(%arg0: i32, %arg1: i32) -> (i32, i32, i32) {
    %c0_i32 = arith.constant 0 : i32
    %c0_i32_0 = arith.constant 0 : i32
    %c0_i32_1 = arith.constant 0 : i32
    return %arg0, %c0_i32, %c0_i32_0 : i32, i32, i32
  }
}

</mosaic_0001>

<bundles_post_ra>
// kernel: timm_forward.1
= control target key start
LH: loop header
LB: loop body
LE: loop exit
PB: predicated region body
PF: predicated region fallthrough
CT: control target
= control target key end

     0   :  { %10 = vsyncpa [#allocation4], 0  ;;  %s8710_s0 = inlined_call_operand.vmem [shape: bf16[2,18,18,4], index: 0, kind: input, shape index: {}]   ;;  %s8711_s1 = inlined_call_operand.vmem [shape: bf16[9,4,128], index: 1, kind: input, shape index: {}]   ;;  %s8712_s2 = inlined_call_operand.vmem [shape: f32[1,128], index: 2, kind: input, shape index: {}]   ;;  %s8713_s3 = inlined_call_operand.vmem [shape: f32[128,128], index: 3, kind: input, shape index: {}]   ;;  %s8714_s4 = inlined_call_operand.vmem [shape: f32[1,128], index: 4, kind: input, shape index: {}]   ;;  %s8715_s5 = inlined_call_operand.hbm [shape: f32[2,1,128], index: 5, kind: output, shape index: {}]  }
   0x1   :  { %12 = vsyncpa [#allocation4 + $0x1], 0  ;;  %s6729_s18 = smov 0   ;;  %s6731_s19 = smov 0  }
   0x2   :  { %s6733_s20 = smov 0   ;;  %s6735_s21 = smov 0  }
   0x3   :  { %s6737_s22 = smov 0   ;;  %s6739_s23 = smov 0  }
   0x4 LB: > { %s5099_s24 = sadd.s32 4294967295, %s6693_s23   ;;  %s5100_s25 = sadd.s32 4294967294, %s6693_s23   ;;  %s6693_s23 = sphi %s6739_s23, %s18_s23   ;;  %s6689_s22 = sphi %s6737_s22, %s8797_s22   ;;  %s6685_s21 = sphi %s6735_s21, %s8796_s21   ;;  %s6681_s20 = sphi %s6733_s20, %s8795_s20   ;;  %s6677_s19 = sphi %s6731_s19, %s8794_s19   ;;  %s6673_s18 = sphi %s6729_s18, %s8793_s18  }
   0x5   : > { %s30_s26 = sadd.s32 1, %s6689_s22  ;;  %s147_s27 = sadd.s32 1, %s6681_s20 }
   0x6   : > { %p32_p0 = scmp.ge.s32.totalorder %s30_s26, 2  ;;  %p157_p1 = scmp.ne.s32.totalorder %s6681_s20, %s6677_s19 }
   0x7   : > { %p158_p2 = scmp.eq.s32.totalorder %s5099_s24, 1  ;;  %p163_p3 = scmp.ne.s32.totalorder %s6677_s19, %s6673_s18 }
   0x8   : > { %s8799_s26 = smov (%p32_p0, %s30_s26), 0  ;;  %p164_p5 = scmp.eq.s32.totalorder %s5100_s25, 1 }
   0x9   : > { %p6769_p4 = por %p158_p2, %p157_p1  ;;  %s144_s29 = ssub.s32 %s6689_s22, %s8799_s26 }
   0xa   : > { %p5103_p6 = scmp.ge.s32.totalorder %s6693_s23, 1  ;;  %p145_p7 = scmp.eq.s32.totalorder %s144_s29, 0 }
   0xb   : > { %p6776_p8 = por %p164_p5, %p163_p3  ;;  %p202_p9 = scmp.lt.s32.totalorder %s6693_s23, 3 }
   0xc   : > { %s6782_s6 = scalar_select %p145_p7, %s6681_s20, %s147_s27  }
   0xd   : > { %p203_p10 = pnand %p5103_p6, %p202_p9 }
   0xf   : > { %206 = sbr.rel (%p203_p10) target bundleno = 833 (0x341), region = 40 }
  0x16   : > { %v5105_v0 = vld [vmem:[%s8711_s1 + $0x2] sm:$0x3]  ;;  %vm779_vm0 = vcmask 1041408   ;;  %p229_p11 = scmp.lt.s32.totalorder %s6685_s21, 1  ;;  %v5332_v2 = vld [vmem:[%s8711_s1 + $0x8] sm:$0x3] }
  0x17   : > { %6440 = vmatprep.subr.msk.bf16.mxu0 %vm779_vm0, %v5105_v0  ;;  %6441 = vmatprep.subr.msk.bf16.mxu1 %vm779_vm0, %v5105_v0  ;;  %v781_v1 = vsel %vm779_vm0, %v5105_v0, 0  ;;  %v6798_v3 = vld [vmem:[%s8711_s1] sm:$0x3]  ;;  %vm293_vm1 = vsmask.f32 3328  ;;  %vm730_vm3 = vcmask 31744  }
  0x18   : > { %5816 = vmatpush3.bf16.msra.mxu0 %v781_v1  ;;  %6181 = vmatpush3.bf16.msra.mxu1 %v781_v1  ;;  %s230_s11 = scalar_select %p229_p11, %s6685_s21, 1  ;;  %vm294_vm2 = vsmask.f32 7440  ;;  %v6835_v33 = vsel %vm779_vm0, %v5332_v2, 0  ;;  %v6849_v47 = vld [vmem:[%s8711_s1 + $0xa] sm:$0x3] }
  0x19   : > { %6445 = vmatprep.subr.msk.bf16.mxu0 %vm779_vm0, %v5332_v2  ;;  %6442 = vmatprep.subr.msk.bf16.mxu1 %vm779_vm0, %v6798_v3  ;;  %vm6830_vm4 = vmor %vm293_vm1, %vm294_vm2  ;;  %v6861_v61 = vsel %vm779_vm0, %v6798_v3, 0  ;;  %v6865_v62 = vsel %vm779_vm0, %v6849_v47, 0  ;;  %vm1284_vm5 = vcmask 1042432   ;;  %vm1285_vm6 = vcmask 1046532   ;;  %v4925_v29 = vld [vmem:[%s8713_s3] sm:$0xff]  ;;  %s227_s29 = sand.u32 1, %s6677_s19  }
  0x1a   : > { %s6451_s14 = smul.u32 216, %s230_s11  ;;  %vm7117_vm7 = vmor %vm1284_vm5, %vm1285_vm6  ;;  %vm6696_vm8 = vmmov 0   ;;  %s5642_s9 = sshll.u32 %s6685_s21, 4 }
  0x1b   : > { %s228_s10 = scalar_lea.vmem [#allocation3], %s227_s29  ;;  %s5014_s15 = scalar_lea.sflag [#allocation4], %s227_s29 }
  0x1c   : > { %s6806_s17 = scalar_lea.vmem %s8710_s0, %s6451_s14  ;;  %s5026_s11 = sshll.u32 %s228_s10, 4  ;;  %s8665_s11 = int_to_ptr.vmem [resolvable:$true] %s5026_s11 }
  0x1d   : > { %v6809_v4 = vld [vmem:[%s6806_s17] sm:$0xf]  ;;  %v6812_v5 = vld [vmem:[%s6806_s17 + $0x4] sm:$0xf]  ;;  %v277_v6 = vld [vmem:[%s6806_s17 + $0x8] sm:$0x1]  ;;  %s8663_s14 = scalar_lea.hbm %s8715_s5, %s5642_s9 }
  0x1e   : > { %v297_v7 = vshrl.u32 %v6809_v4, 16  ;;  %v300_v8 = vshll.u32 %v6809_v4, 16  ;;  %v306_v9 = vshll.u32 %v6812_v5, 16  ;;  %v310_v10 = vshrl.u32 %v6812_v5, 16  ;;  %v256_v11 = vld [vmem:[%s6806_s17 + $0x48] sm:$0xf] }
  0x1f   : > { %v316_v12 = vshll.u32 %v277_v6, 16  ;;  %v257_v13 = vld [vmem:[%s6806_s17 + $0x4c] sm:$0xf]  ;;  %v283_v14 = vld [vmem:[%s6806_s17 + $0x50] sm:$0x1]  ;;  %v441_v20 = vshrl.u32 %v256_v11, 16 }
  0x20   : > { %v299_v15 = vrot.slane %v297_v7, 4  ;;  %v302_v16 = vrot.slane %v300_v8, 5  ;;  %v308_v17 = vrot.slane %v306_v9, 5  ;;  %v312_v18 = vrot.slane %v310_v10, 4  ;;  %v6823_v27 = vld [vmem:[%s6806_s17 + $0xc] sm:$0xf] }
  0x21   : > { %v318_v19 = vrot.slane %v316_v12, 5  ;;  %v444_v21 = vshll.u32 %v256_v11, 16  ;;  %v450_v22 = vshll.u32 %v257_v13, 16  ;;  %v454_v25 = vshrl.u32 %v257_v13, 16  ;;  %v6826_v28 = vld [vmem:[%s6806_s17 + $0x10] sm:$0xf] }
  0x22   : > { %v303_v23 = vor.u32 %v302_v16, %v299_v15  ;;  %v313_v24 = vor.u32 %v312_v18, %v308_v17  ;;  %v460_v26 = vshll.u32 %v283_v14, 16  ;;  %v443_v30 = vrot.slane %v441_v20, 4  ;;  %v278_v39 = vld [vmem:[%s6806_s17 + $0x14] sm:$0x1]  ;;  %v6853_v57 = vld [vmem:[%s6806_s17 + $0x58] sm:$0xf] }
  0x23   : > { %v446_v31 = vrot.slane %v444_v21, 5  ;;  %v452_v32 = vrot.slane %v450_v22, 5  ;;  %v456_v36 = vrot.slane %v454_v25, 4  ;;  %v321_v40 = vshrl.u32 %v6823_v27, 16  ;;  %v258_v52 = vld [vmem:[%s6806_s17 + $0x54] sm:$0xf] }
  0x24   : > { %v304_v34 = vrot.slane %v303_v23, 4  ;;  %v314_v35 = vrot.slane %v313_v24, 4  ;;  %v462_v37 = vrot.slane %v460_v26, 5  ;;  %v324_v41 = vshll.u32 %v6823_v27, 16  ;;  %v284_v60 = vld [vmem:[%s6806_s17 + $0x5c] sm:$0x1] }
  0x25   : > { %v447_v38 = vor.u32 %v446_v31, %v443_v30  ;;  %v330_v42 = vshll.u32 %v6826_v28, 16  ;;  %v457_v45 = vor.u32 %v456_v36, %v452_v32  ;;  %v334_v46 = vshrl.u32 %v6826_v28, 16  ;;  %v6870_v6 = vld [vmem:[%s6806_s17 + $0x18] sm:$0xf]  ;;  %v6875_v14 = vld [vmem:[%s6806_s17 + $0x1c] sm:$0xf] }
  0x26   : > { %v309_v43 = vsel %vm6830_vm4, %v304_v34, %v308_v17  ;;  %v319_v44 = vsel %vm6830_vm4, %v314_v35, %v318_v19  ;;  %v323_v50 = vrot.slane %v321_v40, 4  ;;  %v326_v51 = vrot.slane %v324_v41, 5  ;;  %v279_v18 = vld [vmem:[%s6806_s17 + $0x20] sm:$0x1]  ;;  %s6615_s16 = scalar_lea.vmem %s8665_s11, 16  ;;  %s6698_s21 = smov [#allocation3]  }
  0x27   : > { %v5106_v48 = vcombine.low %v309_v43, %v319_v44  ;;  %v448_v49 = vrot.slane %v447_v38, 4  ;;  %v458_v53 = vrot.slane %v457_v45, 4  ;;  %v332_v54 = vrot.slane %v330_v42, 5  ;;  %v6886_v24 = vld [vmem:[%s6806_s17 + $0x60] sm:$0xf]  ;;  %p6616_p12 = scmp.ne.s32.totalorder %s8665_s11, %s6615_s16 }
  0x28   : > { %v336_v55 = vrot.slane %v334_v46, 4  ;;  %v340_v56 = vshll.u32 %v278_v39, 16  ;;  %v327_v59 = vor.u32 %v326_v51, %v323_v50  ;;  %v465_v2 = vshrl.u32 %v258_v52, 16  ;;  %v285_v46 = vld [vmem:[%s6806_s17 + $0x68] sm:$0x1] }
  0x29   : > { %5817 = vmatprep.mubr.msk.bf16.mxu0 %vm730_vm3, %v5106_v48  ;;  %v453_v58 = vsel %vm6830_vm4, %v448_v49, %v452_v32  ;;  %v463_v63 = vsel %vm6830_vm4, %v458_v53, %v462_v37  ;;  %v468_v9 = vshll.u32 %v258_v52, 16  ;;  %v474_v10 = vshll.u32 %v6853_v57, 16  ;;  %v6891_v37 = vld [vmem:[%s6806_s17 + $0x64] sm:$0xf]  ;;  %p6617_p13 = pnand %p6616_p12, %p6769_p4 }
  0x2a   : > { %v337_v0 = vor.u32 %v336_v55, %v332_v54  ;;  %v342_v1 = vrot.slane %v340_v56, 5  ;;  %v5112_v7 = vcombine.low %v453_v58, %v463_v63  ;;  %v328_v8 = vrot.slane %v327_v59, 4  ;;  %v6902_v52 = vld [vmem:[%s6806_s17 + $0x24] sm:$0xf]  ;;  %v6910_v58 = vld [vmem:[%s6806_s17 + $0x28] sm:$0xf] }
  0x2b   : > { %v467_v11 = vrot.slane %v465_v2, 4  ;;  %v478_v12 = vshrl.u32 %v6853_v57, 16  ;;  %v484_v13 = vshll.u32 %v284_v60, 16  ;;  %v470_v16 = vrot.slane %v468_v9, 5  ;;  %p6618_p0 = pneg %p6617_p13 }
  0x2c   : > { %v338_v3 = vrot.slane %v337_v0, 4  ;;  %5829 = vmatprep.mubr.msk.bf16.mxu1 %vm730_vm3, %v5112_v7  ;;  %v333_v15 = vsel %vm6830_vm4, %v328_v8, %v332_v54  ;;  %v476_v17 = vrot.slane %v474_v10, 5  ;;  %v345_v19 = vshrl.u32 %v6870_v6, 16  ;;  %v280_v8 = vld [vmem:[%s6806_s17 + $0x2c] sm:$0x1] }
  0x2d   : > { %v480_v21 = vrot.slane %v478_v12, 4  ;;  %v486_v22 = vrot.slane %v484_v13, 5  ;;  %v348_v23 = vshll.u32 %v6870_v6, 16  ;;  %v471_v26 = vor.u32 %v470_v16, %v467_v11  ;;  %v6925_v13 = vld [vmem:[%s6806_s17 + $0x6c] sm:$0xf] }
  0x2e   : > { %v343_v20 = vsel %vm6830_vm4, %v338_v3, %v342_v1  ;;  %v347_v30 = vrot.slane %v345_v19, 4  ;;  %v354_v31 = vshll.u32 %v6875_v14, 16  ;;  %v358_v35 = vshrl.u32 %v6875_v14, 16  ;;  %v6915_v1 = vld [vmem:[%s8711_s1 + $0x4] sm:$0x3] }
  0x2f   : > { %v5107_v25 = vcombine.low %v333_v15, %v343_v20  ;;  %v481_v32 = vor.u32 %v480_v21, %v476_v17  ;;  %v350_v34 = vrot.slane %v348_v23, 5  ;;  %v364_v36 = vshll.u32 %v279_v18, 16  ;;  %v6932_v19 = vld [vmem:[%s6806_s17 + $0x70] sm:$0xf] }
  0x30   : > { %v472_v38 = vrot.slane %v471_v26, 4  ;;  %v356_v39 = vrot.slane %v354_v31, 5  ;;  %v489_v40 = vshrl.u32 %v6886_v24, 16  ;;  %v492_v41 = vshll.u32 %v6886_v24, 16 }
  0x31   : > { %5818 = vmatmul.mubr.msk.bf16.vlgmr.msra.gmra.mrb[0].mxu0 %vm730_vm3, %v5107_v25  ;;  %v482_v42 = vrot.slane %v481_v32, 4  ;;  %v351_v43 = vor.u32 %v350_v34, %v347_v30  ;;  %v360_v44 = vrot.slane %v358_v35, 4  ;;  %v366_v45 = vrot.slane %v364_v36, 5  ;;  %v286_v30 = vld [vmem:[%s6806_s17 + $0x74] sm:$0x1] }
  0x32   : > { %5952 = vmatpush3.bf16.msra.mxu0 %v6835_v33  ;;  %v477_v48 = vsel %vm6830_vm4, %v472_v38, %v476_v17  ;;  %v491_v49 = vrot.slane %v489_v40, 4  ;;  %v494_v50 = vrot.slane %v492_v41, 5  ;;  %v498_v51 = vshll.u32 %v6891_v37, 16  ;;  %v6945_v38 = vld [vmem:[%s6806_s17 + $0x30] sm:$0xf] }
  0x33   : > { %6447 = vmatprep.subr.msk.bf16.mxu0 %vm779_vm0, %v6849_v47  ;;  %v487_v53 = vsel %vm6830_vm4, %v482_v42, %v486_v22  ;;  %v352_v54 = vrot.slane %v351_v43, 4  ;;  %v361_v55 = vor.u32 %v360_v44, %v356_v39  ;;  %v502_v56 = vshrl.u32 %v6891_v37, 16  ;;  %v6950_v43 = vld [vmem:[%s6806_s17 + $0x34] sm:$0xf] }
  0x34   : > { %v5113_v59 = vcombine.low %v477_v48, %v487_v53  ;;  %v495_v60 = vor.u32 %v494_v50, %v491_v49  ;;  %v500_v63 = vrot.slane %v498_v51, 5  ;;  %v508_v0 = vshll.u32 %v285_v46, 16 }
  0x35   : > { %v357_v47 = vsel %vm6830_vm4, %v352_v54, %v356_v39  ;;  %v362_v2 = vrot.slane %v361_v55, 4  ;;  %v504_v7 = vrot.slane %v502_v56, 4  ;;  %v369_v9 = vshrl.u32 %v6902_v52, 16  ;;  %v281_v56 = vld [vmem:[%s6806_s17 + $0x38] sm:$0x1] }
  0x36   : > { %5830 = vmatmul.mubr.msk.bf16.vlgmr.msra.gmra.mrb[0].mxu1 %vm730_vm3, %v5113_v59  ;;  %v496_v10 = vrot.slane %v495_v60, 4  ;;  %v510_v3 = vrot.slane %v508_v0, 5  ;;  %v372_v11 = vshll.u32 %v6902_v52, 16  ;;  %v378_v12 = vshll.u32 %v6910_v58, 16 }
  0x37   : > { %5850 = vmatpush3.bf16.msra.mxu1 %v6861_v61  ;;  %v367_v15 = vsel %vm6830_vm4, %v362_v2, %v366_v45  ;;  %v505_v16 = vor.u32 %v504_v7, %v500_v63  ;;  %v371_v17 = vrot.slane %v369_v9, 4  ;;  %v382_v18 = vshrl.u32 %v6910_v58, 16 }
  0x38   : > { %v5108_v20 = vcombine.low %v357_v47, %v367_v15  ;;  %v501_v21 = vsel %vm6830_vm4, %v496_v10, %v500_v63  ;;  %v374_v22 = vrot.slane %v372_v11, 5  ;;  %v380_v23 = vrot.slane %v378_v12, 5  ;;  %6443 = vmatprep.subr.msk.bf16.mxu1 %vm779_vm0, %v6915_v1  ;;  %v6960_v63 = vld [vmem:[%s6806_s17 + $0x78] sm:$0xf] }
  0x39   : > { %v506_v61 = vrot.slane %v505_v16, 4  ;;  %v384_v25 = vrot.slane %v382_v18, 4  ;;  %v388_v26 = vshll.u32 %v280_v8, 16  ;;  %v513_v31 = vshrl.u32 %v6925_v13, 16  ;;  %v6965_v8 = vld [vmem:[%s6806_s17 + $0x7c] sm:$0xf] }
  0x3a   : > { %5821 = vmatprep.mubr.msk.bf16.mxu0 %vm730_vm3, %v5108_v20  ;;  %v375_v32 = vor.u32 %v374_v22, %v371_v17  ;;  %v516_v34 = vshll.u32 %v6925_v13, 16  ;;  %v522_v35 = vshll.u32 %v6932_v19, 16  ;;  %v526_v36 = vshrl.u32 %v6932_v19, 16 }
  0x3b   : > { %v511_v39 = vsel %vm6830_vm4, %v506_v61, %v510_v3  ;;  %v385_v40 = vor.u32 %v384_v25, %v380_v23  ;;  %v390_v41 = vrot.slane %v388_v26, 5  ;;  %v515_v42 = vrot.slane %v513_v31, 4  ;;  %v6976_v61 = vld [vmem:[%s6806_s17 + $0x3c] sm:$0xf] }
  0x3c   : > { %v5114_v44 = vcombine.low %v501_v21, %v511_v39  ;;  %v376_v45 = vrot.slane %v375_v32, 4  ;;  %v518_v46 = vrot.slane %v516_v34, 5  ;;  %v524_v48 = vrot.slane %v522_v35, 5  ;;  %v287_v21 = vld [vmem:[%s6806_s17 + $0x80] sm:$0x1] }
  0x3d   : > { %v386_v49 = vrot.slane %v385_v40, 4  ;;  %v528_v50 = vrot.slane %v526_v36, 4  ;;  %v532_v51 = vshll.u32 %v286_v30, 16  ;;  %v393_v53 = vshrl.u32 %v6945_v38, 16  ;;  %v6981_v32 = vld [vmem:[%s6806_s17 + $0x40] sm:$0xf] }
  0x3e   : > { %5833 = vmatprep.mubr.msk.bf16.mxu1 %vm730_vm3, %v5114_v44  ;;  %v381_v54 = vsel %vm6830_vm4, %v376_v45, %v380_v23  ;;  %v519_v55 = vor.u32 %v518_v46, %v515_v42  ;;  %v396_v59 = vshll.u32 %v6945_v38, 16  ;;  %v402_v60 = vshll.u32 %v6950_v43, 16 }
  0x3f   : > { %v391_v0 = vsel %vm6830_vm4, %v386_v49, %v390_v41  ;;  %v529_v47 = vor.u32 %v528_v50, %v524_v48  ;;  %v534_v2 = vrot.slane %v532_v51, 5  ;;  %v395_v7 = vrot.slane %v393_v53, 4  ;;  %v6992_v51 = vld [vmem:[%s6806_s17 + $0x84] sm:$0xf] }
  0x40   : > { %v5109_v9 = vcombine.low %v381_v54, %v391_v0  ;;  %v520_v10 = vrot.slane %v519_v55, 4  ;;  %v398_v3 = vrot.slane %v396_v59, 5  ;;  %v404_v11 = vrot.slane %v402_v60, 5 }
  0x41   : > { %v530_v12 = vrot.slane %v529_v47, 4  ;;  %v406_v15 = vshrl.u32 %v6950_v43, 16  ;;  %v412_v16 = vshll.u32 %v281_v56, 16  ;;  %v537_v17 = vshrl.u32 %v6960_v63, 16 }
  0x42   : > { %5822 = vmatmul.mubr.msk.bf16.gmra.mrb[4].mxu0 %vm730_vm3, %v5109_v9  ;;  %v525_v18 = vsel %vm6830_vm4, %v520_v10, %v524_v48  ;;  %v399_v20 = vor.u32 %v398_v3, %v395_v7  ;;  %v540_v22 = vshll.u32 %v6960_v63, 16  ;;  %v546_v23 = vshll.u32 %v6965_v8, 16  ;;  %v282_v48 = vld [vmem:[%s6806_s17 + $0x44] sm:$0x1]  ;;  %v6998_v10 = vld [vmem:[%s6806_s17 + $0x88] sm:$0xf] }
  0x43   : > { %v535_v25 = vsel %vm6830_vm4, %v530_v12, %v534_v2  ;;  %v408_v26 = vrot.slane %v406_v15, 4  ;;  %v414_v30 = vrot.slane %v412_v16, 5  ;;  %v539_v31 = vrot.slane %v537_v17, 4  ;;  %v288_v17 = vld [vmem:[%s6806_s17 + $0x8c] sm:$0x1] }
  0x44   : > { %v5115_v34 = vcombine.low %v525_v18, %v535_v25  ;;  %v400_v35 = vrot.slane %v399_v20, 4  ;;  %v542_v36 = vrot.slane %v540_v22, 5  ;;  %v548_v39 = vrot.slane %v546_v23, 5  ;;  %v7005_v18 = vld [vmem:[%s6806_s17 + $0x90] sm:$0xf] }
  0x45   : > { %v409_v40 = vor.u32 %v408_v26, %v404_v11  ;;  %v550_v41 = vshrl.u32 %v6965_v8, 16  ;;  %v556_v42 = vshll.u32 %v287_v21, 16  ;;  %v417_v44 = vshrl.u32 %v6976_v61, 16 }
  0x46   : > { %5834 = vmatmul.mubr.msk.bf16.gmra.mrb[4].mxu1 %vm730_vm3, %v5115_v34  ;;  %v405_v45 = vsel %vm6830_vm4, %v400_v35, %v404_v11  ;;  %v543_v46 = vor.u32 %v542_v36, %v539_v31  ;;  %v420_v49 = vshll.u32 %v6976_v61, 16  ;;  %v426_v50 = vshll.u32 %v6981_v32, 16 }
  0x47   : > { %v410_v53 = vrot.slane %v409_v40, 4  ;;  %v552_v54 = vrot.slane %v550_v41, 4  ;;  %v558_v55 = vrot.slane %v556_v42, 5  ;;  %v419_v56 = vrot.slane %v417_v44, 4 }
  0x48   : > { %v544_v59 = vrot.slane %v543_v46, 4  ;;  %v422_v60 = vrot.slane %v420_v49, 5  ;;  %v428_v0 = vrot.slane %v426_v50, 5  ;;  %v430_v47 = vshrl.u32 %v6981_v32, 16  ;;  %v289_v46 = vld [vmem:[%s6806_s17 + $0x98] sm:$0x1] }
  0x49   : > { %v415_v2 = vsel %vm6830_vm4, %v410_v53, %v414_v30  ;;  %v553_v7 = vor.u32 %v552_v54, %v548_v39  ;;  %v436_v9 = vshll.u32 %v282_v48, 16  ;;  %v561_v3 = vshrl.u32 %v6992_v51, 16  ;;  %v5284_v54 = vld [vmem:[%s6806_s17 + $0xc] sm:$0xf] }
  0x4a   : > { %v5110_v11 = vcombine.low %v405_v45, %v415_v2  ;;  %v549_v12 = vsel %vm6830_vm4, %v544_v59, %v548_v39  ;;  %v423_v15 = vor.u32 %v422_v60, %v419_v56  ;;  %v432_v16 = vrot.slane %v430_v47, 4  ;;  %v7014_v39 = vld [vmem:[%s6806_s17 + $0x94] sm:$0xf] }
  0x4b   : > { %v554_v20 = vrot.slane %v553_v7, 4  ;;  %v438_v21 = vrot.slane %v436_v9, 5  ;;  %v563_v22 = vrot.slane %v561_v3, 4  ;;  %v564_v23 = vshll.u32 %v6992_v51, 16  ;;  %v7028_v9 = vld [vmem:[%s6806_s17 + $0x10] sm:$0xf] }
  0x4c   : > { %5825 = vmatprep.mubr.msk.bf16.mxu0 %vm730_vm3, %v5110_v11  ;;  %v424_v25 = vrot.slane %v423_v15, 4  ;;  %v433_v26 = vor.u32 %v432_v16, %v428_v0  ;;  %v570_v30 = vshll.u32 %v6998_v10, 16  ;;  %v574_v31 = vshrl.u32 %v6998_v10, 16  ;;  %v7031_v15 = vld [vmem:[%s6806_s17 + $0x14] sm:$0x1] }
  0x4d   : > { %v559_v34 = vsel %vm6830_vm4, %v554_v20, %v558_v55  ;;  %v566_v35 = vrot.slane %v564_v23, 5  ;;  %v580_v36 = vshll.u32 %v288_v17, 16  ;;  %v585_v40 = vshrl.u32 %v7005_v18, 16 }
  0x4e   : > { %v5116_v41 = vcombine.low %v549_v12, %v559_v34  ;;  %v429_v42 = vsel %vm6830_vm4, %v424_v25, %v428_v0  ;;  %v434_v44 = vrot.slane %v433_v26, 4  ;;  %v572_v45 = vrot.slane %v570_v30, 5 }
  0x4f   : > { %v567_v48 = vor.u32 %v566_v35, %v563_v22  ;;  %v576_v49 = vrot.slane %v574_v31, 4  ;;  %v582_v50 = vrot.slane %v580_v36, 5  ;;  %v587_v53 = vrot.slane %v585_v40, 4  ;;  %v7038_v31 = vld [vmem:[%s6806_s17 + $0x9c] sm:$0xf] }
  0x50   : > { %5837 = vmatprep.mubr.msk.bf16.mxu1 %vm730_vm3, %v5116_v41  ;;  %v439_v55 = vsel %vm6830_vm4, %v434_v44, %v438_v21  ;;  %v588_v56 = vshll.u32 %v7005_v18, 16  ;;  %v594_v59 = vshll.u32 %v7014_v39, 16  ;;  %v598_v60 = vshrl.u32 %v7014_v39, 16  ;;  %v7045_v41 = vld [vmem:[%s6806_s17 + $0xa0] sm:$0xf] }
  0x51   : > { %v5111_v0 = vcombine.low %v429_v42, %v439_v55  ;;  %v568_v47 = vrot.slane %v567_v48, 4  ;;  %v577_v2 = vor.u32 %v576_v49, %v572_v45  ;;  %v604_v7 = vshll.u32 %v289_v46, 16 }
  0x52   : > { %v590_v3 = vrot.slane %v588_v56, 5  ;;  %v596_v11 = vrot.slane %v594_v59, 5  ;;  %v600_v12 = vrot.slane %v598_v60, 4  ;;  %v2104_v16 = vshrl.u32 %v5284_v54, 16 }
  0x53   : > { %5826 = vmatmul.mubr.msk.bf16.gmra.mrb[8].mxu0 %vm730_vm3, %v5111_v0  ;;  %v573_v17 = vsel %vm6830_vm4, %v568_v47, %v572_v45  ;;  %v578_v20 = vrot.slane %v577_v2, 4  ;;  %v606_v21 = vrot.slane %v604_v7, 5  ;;  %v2107_v22 = vshll.u32 %v5284_v54, 16  ;;  %v290_v54 = vld [vmem:[%s6806_s17 + $0xa4] sm:$0x1] }
  0x54   : > { %v591_v23 = vor.u32 %v590_v3, %v587_v53  ;;  %v601_v25 = vor.u32 %v600_v12, %v596_v11  ;;  %v2106_v26 = vrot.slane %v2104_v16, 4  ;;  %v2113_v30 = vshll.u32 %v7028_v9, 16  ;;  %v5287_v0 = vld [vmem:[%s6806_s17 + $0x18] sm:$0xf]  ;;  %v7058_v12 = vld [vmem:[%s6806_s17 + $0x1c] sm:$0xf] }
  0x55   : > { %v583_v34 = vsel %vm6830_vm4, %v578_v20, %v582_v50  ;;  %v2109_v35 = vrot.slane %v2107_v22, 5  ;;  %v2117_v36 = vshrl.u32 %v7028_v9, 16  ;;  %v2123_v40 = vshll.u32 %v7031_v15, 16 }
  0x56   : > { %v5117_v42 = vcombine.low %v573_v17, %v583_v34  ;;  %v592_v44 = vrot.slane %v591_v23, 4  ;;  %v602_v45 = vrot.slane %v601_v25, 4  ;;  %v2115_v46 = vrot.slane %v2113_v30, 5  ;;  %v7065_v23 = vld [vmem:[%s6806_s17 + $0x20] sm:$0x1] }
  0x57   : > { %v2110_v48 = vor.u32 %v2109_v35, %v2106_v26  ;;  %v2119_v49 = vrot.slane %v2117_v36, 4  ;;  %v2125_v53 = vrot.slane %v2123_v40, 5  ;;  %v609_v55 = vshrl.u32 %v7038_v31, 16  ;;  %v7069_v40 = vld [vmem:[%s6806_s17 + $0xa8] sm:$0xf] }
  0x58   : > { %5838 = vmatmul.mubr.msk.bf16.gmra.mrb[8].mxu1 %vm730_vm3, %v5117_v42  ;;  %v597_v50 = vsel %vm6830_vm4, %v592_v44, %v596_v11  ;;  %v607_v56 = vsel %vm6830_vm4, %v602_v45, %v606_v21  ;;  %v612_v59 = vshll.u32 %v7038_v31, 16  ;;  %v618_v60 = vshll.u32 %v7045_v41, 16 }
  0x59   : > { %v5118_v47 = vcombine.low %v597_v50, %v607_v56  ;;  %v2111_v2 = vrot.slane %v2110_v48, 4  ;;  %v2120_v7 = vor.u32 %v2119_v49, %v2115_v46  ;;  %v611_v3 = vrot.slane %v609_v55, 4  ;;  %v7075_v48 = vld [vmem:[%s6806_s17 + $0xac] sm:$0xf] }
  0x5a   : > { %v614_v16 = vrot.slane %v612_v59, 5  ;;  %v620_v17 = vrot.slane %v618_v60, 5  ;;  %v622_v11 = vshrl.u32 %v7045_v41, 16  ;;  %v628_v20 = vshll.u32 %v290_v54, 16 }
  0x5b   : > { %5841 = vmatprep.mubr.msk.bf16.mxu1 %vm730_vm3, %v5118_v47  ;;  %v2116_v21 = vsel %vm6830_vm4, %v2111_v2, %v2115_v46  ;;  %v2121_v22 = vrot.slane %v2120_v7, 4  ;;  %v2128_v25 = vshrl.u32 %v5287_v0, 16  ;;  %v2131_v26 = vshll.u32 %v5287_v0, 16  ;;  %v7083_v2 = vld [vmem:[%s6806_s17 + $0xb0] sm:$0x1] }
  0x5c   : > { %v615_v30 = vor.u32 %v614_v16, %v611_v3  ;;  %v624_v34 = vrot.slane %v622_v11, 4  ;;  %v630_v35 = vrot.slane %v628_v20, 5  ;;  %v2137_v36 = vshll.u32 %v7058_v12, 16 }
  0x5d   : > { %v2126_v42 = vsel %vm6830_vm4, %v2121_v22, %v2125_v53  ;;  %v2130_v44 = vrot.slane %v2128_v25, 4  ;;  %v2133_v45 = vrot.slane %v2131_v26, 5  ;;  %v2141_v46 = vshrl.u32 %v7058_v12, 16  ;;  %v7088_v22 = vld [vmem:[%s6806_s17 + $0xb4] sm:$0xf] }
  0x5e   : > { %v5333_v49 = vcombine.low %v2116_v21, %v2126_v42  ;;  %v616_v54 = vrot.slane %v615_v30, 4  ;;  %v625_v55 = vor.u32 %v624_v34, %v620_v17  ;;  %v2139_v50 = vrot.slane %v2137_v36, 5  ;;  %v7094_v34 = vld [vmem:[%s6806_s17 + $0xb8] sm:$0xf] }
  0x5f   : > { %v2134_v56 = vor.u32 %v2133_v45, %v2130_v44  ;;  %v2143_v59 = vrot.slane %v2141_v46, 4  ;;  %v2147_v60 = vshll.u32 %v7065_v23, 16  ;;  %v633_v0 = vshrl.u32 %v7069_v40, 16  ;;  %v7100_v46 = vld [vmem:[%s6806_s17 + $0xbc] sm:$0x1] }
  0x60   : > { %5953 = vmatprep.mubr.msk.bf16.mxu0 %vm730_vm3, %v5333_v49  ;;  %v621_v53 = vsel %vm6830_vm4, %v616_v54, %v620_v17  ;;  %v626_v47 = vrot.slane %v625_v55, 4  ;;  %v636_v7 = vshll.u32 %v7069_v40, 16  ;;  %v642_v3 = vshll.u32 %v7075_v48, 16  ;;  %v5365_v49 = vld [vmem:[%s6806_s17 + $0xc] sm:$0xe] }
  0x61   : > { %v2135_v16 = vrot.slane %v2134_v56, 4  ;;  %v2144_v11 = vor.u32 %v2143_v59, %v2139_v50  ;;  %v2149_v20 = vrot.slane %v2147_v60, 5  ;;  %v635_v21 = vrot.slane %v633_v0, 4 }
  0x62   : > { %v631_v25 = vsel %vm6830_vm4, %v626_v47, %v630_v35  ;;  %v638_v26 = vrot.slane %v636_v7, 5  ;;  %v644_v17 = vrot.slane %v642_v3, 5  ;;  %v646_v30 = vshrl.u32 %v7075_v48, 16 }
  0x63   : > { %v5119_v36 = vcombine.low %v621_v53, %v631_v25  ;;  %v2140_v42 = vsel %vm6830_vm4, %v2135_v16, %v2139_v50  ;;  %v2145_v44 = vrot.slane %v2144_v11, 4  ;;  %v652_v45 = vshll.u32 %v7083_v2, 16  ;;  %v5462_v53 = vld [vmem:[%s8711_s1 + $0xc] sm:$0x3]  ;;  %v5366_v11 = vld [vmem:[%s6806_s17 + $0x18] sm:$0xe] }
  0x64   : > { %v639_v54 = vor.u32 %v638_v26, %v635_v21  ;;  %v648_v55 = vrot.slane %v646_v30, 4  ;;  %v657_v35 = vshrl.u32 %v7088_v22, 16  ;;  %v660_v56 = vshll.u32 %v7088_v22, 16  ;;  %v4927_v30 = vld [vmem:[%s8713_s3 + $0x10] sm:$0xff] }
  0x65   : > { %5842 = vmatmul.mubr.msk.bf16.gmra.mrb[12].mxu1 %vm730_vm3, %v5119_v36  ;;  %v2150_v59 = vsel %vm6830_vm4, %v2145_v44, %v2149_v20  ;;  %v654_v60 = vrot.slane %v652_v45, 5  ;;  %v666_v50 = vshll.u32 %v7094_v34, 16  ;;  %v670_v0 = vshrl.u32 %v7094_v34, 16 }
  0x66   : > { %v5334_v47 = vcombine.low %v2140_v42, %v2150_v59  ;;  %v640_v7 = vrot.slane %v639_v54, 4  ;;  %v649_v3 = vor.u32 %v648_v55, %v644_v17  ;;  %v659_v16 = vrot.slane %v657_v35, 4  ;;  %v5291_v59 = vld [vmem:[%s6806_s17 + $0x28] sm:$0xf] }
  0x67   : > { %v662_v21 = vrot.slane %v660_v56, 5  ;;  %v668_v25 = vrot.slane %v666_v50, 5  ;;  %v672_v20 = vrot.slane %v670_v0, 4  ;;  %v676_v26 = vshll.u32 %v7100_v46, 16  ;;  %v5292_v50 = vld [vmem:[%s6806_s17 + $0x2c] sm:$0x1] }
  0x68   : > { %5954 = vmatmul.mubr.msk.bf16.vlgmr.msra.gmra.mrb[12].mxu0 %vm730_vm3, %v5334_v47  ;;  %v645_v36 = vsel %vm6830_vm4, %v640_v7, %v644_v17  ;;  %v650_v42 = vrot.slane %v649_v3, 4  ;;  %v5381_v44 = vrot.slane %v5365_v49, 9  ;;  %v2847_v45 = vrot.slane %v7028_v9, 5  ;;  %v5367_v0 = vld [vmem:[%s6806_s17 + $0x24] sm:$0xe] }
  0x69   : > { %5986 = vmatpush3.bf16.msra.mxu0 %v6865_v62  ;;  %v663_v54 = vor.u32 %v662_v21, %v659_v16  ;;  %v673_v55 = vor.u32 %v672_v20, %v668_v25  ;;  %v678_v35 = vrot.slane %v676_v26, 5  ;;  %v2850_v56 = vrot.slane %v7031_v15, 5  ;;  %v7142_v26 = vld [vmem:[%s6806_s17 + $0x34] sm:$0xf] }
  0x6a   : > { %v655_v47 = vsel %vm6830_vm4, %v650_v42, %v654_v60  ;;  %v2848_v17 = vsel %vm7117_vm7, %v5381_v44, %v2847_v45  ;;  %v2849_v49 = vrot.slane %v2847_v45, 4  ;;  %6448 = vmatprep.subr.msk.bf16.mxu0 %vm779_vm0, %v5462_v53  ;;  %v5382_v62 = vrot.slane %v5366_v11, 9  ;;  %v5368_v42 = vld [vmem:[%s6806_s17 + $0x30] sm:$0xe] }
  0x6b   : > { %v5120_v9 = vcombine.low %v645_v36, %v655_v47  ;;  %v664_v7 = vrot.slane %v663_v54, 4  ;;  %v674_v3 = vrot.slane %v673_v55, 4  ;;  %v2854_v15 = vrot.slane %v7058_v12, 5  ;;  %v7154_v54 = vld [vmem:[%s6806_s17 + $0x38] sm:$0x1] }
  0x6c   : > { %v2851_v16 = vsel %vm7117_vm7, %v2849_v49, %v2850_v56  ;;  %v2857_v21 = vrot.slane %v7065_v23, 5  ;;  %v5138_v60 = vcombine.low %v6809_v4, %v6812_v5  ;;  %v5383_v20 = vrot.slane %v5367_v0, 9  ;;  %v5369_v47 = vld [vmem:[%s6806_s17 + $0x3c] sm:$0xe] }
  0x6d   : > { %5845 = vmatprep.mubr.msk.bf16.mxu1 %vm730_vm3, %v5120_v9  ;;  %v669_v11 = vsel %vm6830_vm4, %v664_v7, %v668_v25  ;;  %v679_v12 = vsel %vm6830_vm4, %v674_v3, %v678_v35  ;;  %v5398_v36 = vcombine.low %v2848_v17, %v2851_v16  ;;  %v2855_v23 = vsel %vm7117_vm7, %v5382_v62, %v2854_v15  ;;  %v5297_v25 = vld [vmem:[%s6806_s17 + $0x40] sm:$0xf]  ;;  %v5300_v62 = vld [vmem:[%s6806_s17 + $0x4c] sm:$0xf]  ;;  %v5370_v16 = vld [vmem:[%s6806_s17 + $0x48] sm:$0xe] }
  0x6e   : > { %v5121_v44 = vcombine.low %v669_v11, %v679_v12  ;;  %v2856_v4 = vrot.slane %v2854_v15, 4  ;;  %v2861_v5 = vrot.slane %v5291_v59, 5  ;;  %v2864_v45 = vrot.slane %v5292_v50, 5  ;;  %v5298_v59 = vld [vmem:[%s6806_s17 + $0x44] sm:$0x1] }
  0x6f   : > { %5987 = vmatprep.mubr.msk.bf16.mxu0 %vm730_vm3, %v5398_v36  ;;  %v2868_v0 = vrot.slane %v7142_v26, 5  ;;  %v3418_v17 = vsel %vm779_vm0, %v5462_v53, 0  ;;  %v5384_v49 = vrot.slane %v5368_v42, 9  ;;  %v2871_v3 = vrot.slane %v7154_v54, 5  ;;  %v5301_v12 = vld [vmem:[%s6806_s17 + $0x50] sm:$0x1] }
  0x70   : > { %5846 = vmatmul.mubr.msk.bf16.gmra.mrb[16].mxu1 %vm730_vm3, %v5121_v44  ;;  %v2858_v55 = vsel %vm7117_vm7, %v2856_v4, %v2857_v21  ;;  %v2862_v35 = vsel %vm7117_vm7, %v5383_v20, %v2861_v5  ;;  %v2863_v56 = vrot.slane %v2861_v5, 4  ;;  %v7175_v21 = vld [vmem:[%s8711_s1 + $0xe] sm:$0x3]  ;;  %v5139_v53 = vcombine.low %v6823_v27, %v6826_v28  ;;  %v5303_v28 = vld [vmem:[%s6806_s17 + $0x58] sm:$0xf] }
  0x71   : > { %v5399_v50 = vcombine.low %v2855_v23, %v2858_v55  ;;  %5851 = vmatprep.mubr.msk.bf16.mxu1 %vm730_vm3, %v5138_v60  ;;  %v2870_v7 = vrot.slane %v2868_v0, 4  ;;  %v5385_v60 = vrot.slane %v5369_v47, 9  ;;  %v2875_v20 = vrot.slane %v5297_v25, 5  ;;  %v5371_v25 = vld [vmem:[%s6806_s17 + $0x54] sm:$0xe] }
  0x72   : > { %v2865_v9 = vsel %vm7117_vm7, %v2863_v56, %v2864_v45  ;;  %v2878_v11 = vrot.slane %v5298_v59, 5  ;;  %v2869_v36 = vsel %vm7117_vm7, %v5384_v49, %v2868_v0  ;;  %v5140_v42 = vcombine.low %v6870_v6, %v6875_v14  ;;  %v5304_v45 = vld [vmem:[%s6806_s17 + $0x5c] sm:$0x1]  ;;  %v7200_v55 = vld [vmem:[%s8711_s1 + $0x6] sm:$0x3] }
  0x73   : > { %v5400_v15 = vcombine.low %v2862_v35, %v2865_v9  ;;  %v2872_v23 = vsel %vm7117_vm7, %v2870_v7, %v2871_v3  ;;  %v2882_v27 = vrot.slane %v5300_v62, 5  ;;  %v1498_v44 = vsel %vm779_vm0, %v6915_v1, 0  ;;  %v5306_v56 = vld [vmem:[%s6806_s17 + $0x64] sm:$0xf]  ;;  %v5309_v62 = vld [vmem:[%s6806_s17 + $0x70] sm:$0xf] }
  0x74   : > { %5988 = vmatmul.mubr.msk.bf16.vlgmr.msra.gmra.mrb[12].mxu0 %vm730_vm3, %v5399_v50  ;;  %v2876_v4 = vsel %vm7117_vm7, %v5385_v60, %v2875_v20  ;;  %v2877_v5 = vrot.slane %v2875_v20, 4  ;;  %v5401_v6 = vcombine.low %v2869_v36, %v2872_v23  ;;  %v5386_v1 = vrot.slane %v5370_v16, 9  ;;  %v5307_v7 = vld [vmem:[%s6806_s17 + $0x68] sm:$0x1]  ;;  %v5310_v20 = vld [vmem:[%s6806_s17 + $0x74] sm:$0x1] }
  0x75   : > { %6020 = vmatpush3.bf16.msra.mxu0 %v3418_v17  ;;  %5991 = vmatprep.mubr.msk.bf16.mxu0 %vm730_vm3, %v5400_v15  ;;  %v2889_v35 = vrot.slane %v5303_v28, 5  ;;  %v2884_v59 = vrot.slane %v2882_v27, 4  ;;  %v2885_v47 = vrot.slane %v5301_v12, 5  ;;  %v5387_v50 = vrot.slane %v5371_v25, 9  ;;  %v5373_v12 = vld [vmem:[%s6806_s17 + $0x6c] sm:$0xe] }
  0x76   : > { %6449 = vmatprep.subr.msk.bf16.mxu0 %vm779_vm0, %v7175_v21  ;;  %v2879_v14 = vsel %vm7117_vm7, %v2877_v5, %v2878_v11  ;;  %v2892_v49 = vrot.slane %v5304_v45, 5  ;;  %v5141_v9 = vcombine.low %v6902_v52, %v6910_v58  ;;  %v2883_v3 = vsel %vm7117_vm7, %v5386_v1, %v2882_v27  ;;  %v5372_v58 = vld [vmem:[%s6806_s17 + $0x60] sm:$0xe]  ;;  %v5315_v5 = vld [vmem:[%s6806_s17 + $0x88] sm:$0xf] }
  0x77   : > { %v5402_v0 = vcombine.low %v2876_v4, %v2879_v14  ;;  %v2891_v17 = vrot.slane %v2889_v35, 4  ;;  %v2886_v15 = vsel %vm7117_vm7, %v2884_v59, %v2885_v47  ;;  %v5142_v16 = vcombine.low %v6945_v38, %v6950_v43  ;;  %v5312_v4 = vld [vmem:[%s6806_s17 + $0x7c] sm:$0xf]  ;;  %v6558_v14 = vld [vmem:[%s6806_s17 + $0x48] sm:$0xf] }
  0x78   : > { %5852 = vmatmul.mubr.msk.bf16.vlgmr.msra.gmra.mrb[20].mxu1 %vm730_vm3, %v5139_v53  ;;  %v2896_v53 = vrot.slane %v5306_v56, 5  ;;  %v2890_v60 = vsel %vm7117_vm7, %v5387_v50, %v2889_v35  ;;  %v2903_v11 = vrot.slane %v5309_v62, 5  ;;  %v5403_v36 = vcombine.low %v2883_v3, %v2886_v15  ;;  %v7242_v1 = vld [vmem:[%s6806_s17 + $0x4c] sm:$0xf]  ;;  %v5313_v56 = vld [vmem:[%s6806_s17 + $0x80] sm:$0x1] }
  0x79   : > { %5884 = vmatpush3.bf16.msra.mxu1 %v1498_v44  ;;  %5855 = vmatprep.mubr.msk.bf16.mxu1 %vm730_vm3, %v5140_v42  ;;  %v2893_v52 = vsel %vm7117_vm7, %v2891_v17, %v2892_v49  ;;  %v5388_v43 = vrot.slane %v5372_v58, 9  ;;  %v2899_v42 = vrot.slane %v5307_v7, 5  ;;  %v5389_v27 = vrot.slane %v5373_v12, 9  ;;  %v5316_v47 = vld [vmem:[%s6806_s17 + $0x8c] sm:$0x1] }
  0x7a   : > { %6444 = vmatprep.subr.msk.bf16.mxu1 %vm779_vm0, %v7200_v55  ;;  %v5404_v38 = vcombine.low %v2890_v60, %v2893_v52  ;;  %v2898_v23 = vrot.slane %v2896_v53, 4  ;;  %v2905_v28 = vrot.slane %v2903_v11, 4  ;;  %v2906_v44 = vrot.slane %v5310_v20, 5  ;;  %v5375_v17 = vld [vmem:[%s6806_s17 + $0x84] sm:$0xe] }
  0x7b   : > { %v5143_v45 = vcombine.low %v6976_v61, %v6981_v32  ;;  %v2897_v25 = vsel %vm7117_vm7, %v5388_v43, %v2896_v53  ;;  %v5144_v35 = vcombine.low %v6558_v14, %v7242_v1  ;;  %v2910_v59 = vrot.slane %v5312_v4, 5  ;;  %v5318_v60 = vld [vmem:[%s6806_s17 + $0x94] sm:$0xf]  ;;  %v5321_v52 = vld [vmem:[%s6806_s17 + $0xa0] sm:$0xf] }
  0x7c   : > { %5992 = vmatmul.mubr.msk.bf16.gmra.mrb[16].mxu0 %vm730_vm3, %v5401_v6  ;;  %v2900_v6 = vsel %vm7117_vm7, %v2898_v23, %v2899_v42  ;;  %v2904_v61 = vsel %vm7117_vm7, %v5389_v27, %v2903_v11  ;;  %v2907_v32 = vsel %vm7117_vm7, %v2905_v28, %v2906_v44  ;;  %v2917_v50 = vrot.slane %v5315_v5, 5  ;;  %v6560_v20 = vld [vmem:[%s6806_s17 + $0x54] sm:$0xf]  ;;  %v5319_v12 = vld [vmem:[%s6806_s17 + $0x98] sm:$0x1] }
  0x7d   : > { %5995 = vmatprep.mubr.msk.bf16.mxu0 %vm730_vm3, %v5402_v0  ;;  %v5374_v0 = vld [vmem:[%s6806_s17 + $0x78] sm:$0xe]  ;;  %v5405_v49 = vcombine.low %v2897_v25, %v2900_v6  ;;  %v5406_v62 = vcombine.low %v2904_v61, %v2907_v32  ;;  %v2912_v7 = vrot.slane %v2910_v59, 4  ;;  %v2913_v3 = vrot.slane %v5313_v56, 5  ;;  %v5376_v27 = vld [vmem:[%s6806_s17 + $0x90] sm:$0xe] }
  0x7e   : > { %v5391_v15 = vrot.slane %v5375_v17, 9  ;;  %v2920_v53 = vrot.slane %v5316_v47, 5  ;;  %v5153_v58 = vcombine.low %v7088_v22, %v7094_v34  ;;  %v5145_v11 = vcombine.low %v6560_v20, %v6853_v57  ;;  %v5322_v44 = vld [vmem:[%s6806_s17 + $0xa4] sm:$0x1]  ;;  %v5377_v4 = vld [vmem:[%s6806_s17 + $0x9c] sm:$0xe] }
  0x7f   : > { %v5146_v43 = vcombine.low %v6886_v24, %v6891_v37  ;;  %v2924_v23 = vrot.slane %v5318_v60, 5  ;;  %v2931_v28 = vrot.slane %v5321_v52, 5  ;;  %v5392_v25 = vrot.slane %v5376_v27, 9  ;;  %v5324_v6 = vld [vmem:[%s6806_s17 + $0xac] sm:$0xf] }
  0x80   : > { %5856 = vmatmul.mubr.msk.bf16.gmra.mrb[24].mxu1 %vm730_vm3, %v5141_v9  ;;  %v5390_v9 = vrot.slane %v5374_v0, 9  ;;  %v2918_v42 = vsel %vm7117_vm7, %v5391_v15, %v2917_v50  ;;  %v2927_v37 = vrot.slane %v5319_v12, 5  ;;  %v5393_v14 = vrot.slane %v5377_v4, 9  ;;  %v5327_v0 = vld [vmem:[%s6806_s17 + $0xb8] sm:$0xf] }
  0x81   : > { %5859 = vmatprep.mubr.msk.bf16.mxu1 %vm730_vm3, %v5142_v16  ;;  %v2919_v16 = vrot.slane %v2917_v50, 4  ;;  %v2926_v24 = vrot.slane %v2924_v23, 4  ;;  %v2934_v56 = vrot.slane %v5322_v44, 5  ;;  %v2925_v61 = vsel %vm7117_vm7, %v5392_v25, %v2924_v23  ;;  %v5330_v15 = vld [vmem:[%s6806_s17 + $0xc4] sm:$0xf] }
  0x82   : > { %v5148_v47 = vcombine.low %v6960_v63, %v6965_v8  ;;  %v2938_v50 = vrot.slane %v5324_v6, 5  ;;  %v2932_v17 = vsel %vm7117_vm7, %v5393_v14, %v2931_v28  ;;  %v1251_v27 = vld [vmem:[%s6806_s17 + $0xb4] sm:$0xe]  ;;  %v6561_v4 = vld [vmem:[%s6806_s17 + $0x4] sm:$0xf]  ;;  %v5151_v14 = vcombine.low %v7038_v31, %v7045_v41 }
  0x83   : > { %v2921_v57 = vsel %vm7117_vm7, %v2919_v16, %v2920_v53  ;;  %v2928_v32 = vsel %vm7117_vm7, %v2926_v24, %v2927_v37  ;;  %v1236_v24 = vld [vmem:[%s6806_s17] sm:$0xe]  ;;  %v6563_v37 = vld [vmem:[%s6806_s17 + $0x10] sm:$0xf]  ;;  %v1397_v31 = vrot.slane %v7100_v46, 5  ;;  %v6526_v46 = vld [vmem:[%s6806_s17 + $0x18] sm:$0xff]  }
  0x84   : > { %5996 = vmatmul.mubr.msk.bf16.gmra.mrb[20].mxu0 %vm730_vm3, %v5403_v36  ;;  %v2911_v36 = vsel %vm7117_vm7, %v5390_v9, %v2910_v59  ;;  %v5147_v59 = vcombine.low %v6925_v13, %v6932_v19  ;;  %v5378_v13 = vld [vmem:[%s6806_s17 + $0xa8] sm:$0xe]  ;;  %v2945_v19 = vrot.slane %v5327_v0, 5  ;;  %v5328_v9 = vld [vmem:[%s6806_s17 + $0xbc] sm:$0x1]  ;;  %v2940_v8 = vrot.slane %v2938_v50, 4 }
  0x85   : > { %5999 = vmatprep.mubr.msk.bf16.mxu0 %vm730_vm3, %v5404_v38  ;;  %v2914_v38 = vsel %vm7117_vm7, %v2912_v7, %v2913_v3  ;;  %v5379_v7 = vld [vmem:[%s6806_s17 + $0xb4] sm:$0xe]  ;;  %v5409_v3 = vcombine.low %v2925_v61, %v2928_v32  ;;  %v5394_v63 = vrot.slane %v5378_v13, 9  ;;  %v2948_v20 = vrot.slane %v5328_v9, 5  ;;  %v1237_v61 = vld [vmem:[%s6806_s17 + $0xc] sm:$0xe] }
  0x86   : > { %v5407_v5 = vcombine.low %v2911_v36, %v2914_v38  ;;  %v5395_v60 = vrot.slane %v5379_v7, 9  ;;  %v2947_v52 = vrot.slane %v2945_v19, 4  ;;  %v5150_v38 = vcombine.low %v7005_v18, %v7014_v39  ;;  %v6564_v13 = vld [vmem:[%s6806_s17 + $0x14] sm:$0x1]  ;;  %v6565_v7 = vld [vmem:[%s6806_s17 + $0x1c] sm:$0xf] }
  0x87   : > { %v2939_v12 = vsel %vm7117_vm7, %v5394_v63, %v2938_v50  ;;  %v1296_v6 = vrot.slane %v6563_v37, 5  ;;  %v1394_v32 = vrot.slane %v7094_v34, 5  ;;  %v5170_v41 = vrot.slane %v1236_v24, 9  ;;  %v6569_v24 = vld [vmem:[%s6806_s17 + $0x34] sm:$0xf] }
  0x88   : > { %5860 = vmatmul.mubr.msk.bf16.gmra.mrb[28].mxu1 %vm730_vm3, %v5143_v45  ;;  %v5408_v45 = vcombine.low %v2918_v42, %v2921_v57  ;;  %v2946_v23 = vsel %vm7117_vm7, %v5395_v60, %v2945_v19  ;;  %v5380_v42 = vld [vmem:[%s6806_s17 + $0xc0] sm:$0xe]  ;;  %v2189_v50 = vshrl.u32 %v7142_v26, 16  ;;  %v1299_v19 = vrot.slane %v6564_v13, 5  ;;  %v6528_v34 = vld [vmem:[%s6806_s17 + $0x30] sm:$0xff]  }
  0x89   : > { %5863 = vmatprep.mubr.msk.bf16.mxu1 %vm730_vm3, %v5144_v35  ;;  %v2933_v35 = vrot.slane %v2931_v28, 4  ;;  %v5396_v18 = vrot.slane %v5380_v42, 9  ;;  %v5171_v9 = vrot.slane %v1237_v61, 9  ;;  %v1298_v63 = vrot.slane %v1296_v6, 4  ;;  %v6574_v13 = vld [vmem:[%s6806_s17 + $0x64] sm:$0xf] }
  0x8a   : > { %v1317_v37 = vrot.slane %v6569_v24, 5 }
  0x8b   : > { %v7379_v42 = vsel %vm7117_vm7, %v1298_v63, %v1299_v19  ;;  %v1345_v19 = vrot.slane %v6574_v13, 5  ;;  %v6576_v63 = vld [vmem:[%s6806_s17 + $0x44] sm:$0x1]  ;;  %v7515_v13 = vld [vmem:[%s6806_s17 + $0x1c] sm:$0xf] }
  0x8c   : > { %6000 = vmatmul.mubr.msk.bf16.gmra.mrb[24].mxu0 %vm730_vm3, %v5405_v49  ;;  %v2935_v49 = vsel %vm7117_vm7, %v2933_v35, %v2934_v56  ;;  %v5152_v35 = vcombine.low %v7069_v40, %v7075_v48  ;;  %v5185_v56 = vrot.slane %v1251_v27, 9  ;;  %v2185_v40 = vshll.u32 %v7142_v26, 16  ;;  %v6568_v27 = vld [vmem:[%s6806_s17 + $0x28] sm:$0xf] }
  0x8d   : > { %6003 = vmatprep.mubr.msk.bf16.mxu0 %vm730_vm3, %v5406_v62  ;;  %v5325_v62 = vld [vmem:[%s6806_s17 + $0xb0] sm:$0x1]  ;;  %v5410_v16 = vcombine.low %v2932_v17, %v2935_v49  ;;  %v1396_v49 = vrot.slane %v1394_v32, 4 }
  0x8e   : > { %v2941_v53 = vrot.slane %v5325_v62, 5  ;;  %v7342_v17 = vsel %vm7117_vm7, %v5185_v56, %v1394_v32  ;;  %v7360_v60 = vrot.slane %v2185_v40, 5  ;;  %v1243_v56 = vld [vmem:[%s6806_s17 + $0x54] sm:$0xe]  ;;  %v6571_v32 = vld [vmem:[%s6806_s17 + $0x2c] sm:$0x1] }
  0x8f   : > { %v7351_v26 = vsel %vm7117_vm7, %v1396_v49, %v1397_v31  ;;  %v1313_v31 = vrot.slane %v6571_v32, 5  ;;  %v1245_v40 = vld [vmem:[%s6806_s17 + $0x6c] sm:$0xe]  ;;  %v6573_v49 = vld [vmem:[%s6806_s17 + $0x38] sm:$0x1] }
  0x90   : > { %5864 = vmatmul.mubr.msk.bf16.gmra.mrb[0].mxu1 %vm730_vm3, %v5145_v11  ;;  %v5149_v11 = vcombine.low %v6992_v51, %v6998_v10  ;;  %v2942_v36 = vsel %vm7117_vm7, %v2940_v8, %v2941_v53  ;;  %v2949_v51 = vsel %vm7117_vm7, %v2947_v52, %v2948_v20  ;;  %v5331_v10 = vld [vmem:[%s6806_s17 + $0xc8] sm:$0x1]  ;;  %v1238_v8 = vld [vmem:[%s6806_s17 + $0x18] sm:$0xe]  ;;  %v7362_v52 = vrot.slane %v2189_v50, 4 }
  0x91   : > { %5867 = vmatprep.mubr.msk.bf16.mxu1 %vm730_vm3, %v5146_v43  ;;  %v2952_v43 = vrot.slane %v5330_v15, 5  ;;  %v5411_v57 = vcombine.low %v2939_v12, %v2942_v36  ;;  %v5412_v28 = vcombine.low %v2946_v23, %v2949_v51  ;;  %v2955_v44 = vrot.slane %v5331_v10, 5  ;;  %v7367_v12 = vld [vmem:[%s6806_s17 + $0x50] sm:$0x1]  ;;  %v6567_v51 = vld [vmem:[%s6806_s17 + $0x20] sm:$0x1] }
  0x92   : > { %v2195_v20 = vshll.u32 %v7154_v54, 16  ;;  %v1334_v36 = vrot.slane %v7367_v12, 5  ;;  %v1306_v10 = vrot.slane %v6567_v51, 5  ;;  %v7375_v54 = vsel %vm7117_vm7, %v5171_v9, %v1296_v6  ;;  %v6570_v6 = vld [vmem:[%s6806_s17 + $0x40] sm:$0xf] }
  0x93   : > { %v2954_v39 = vrot.slane %v2952_v43, 4  ;;  %v2953_v0 = vsel %vm7117_vm7, %v5396_v18, %v2952_v43  ;;  %v5172_v43 = vrot.slane %v1238_v8, 9  ;;  %v7383_v18 = vld [vmem:[%s6806_s17 + $0x30] sm:$0xe]  ;;  %v5188_v22 = vcombine.low %v7375_v54, %v7379_v42  ;;  %v6578_v54 = vld [vmem:[%s6806_s17 + $0x68] sm:$0x1] }
  0x94   : > { %6004 = vmatmul.mubr.msk.bf16.gmra.mrb[28].mxu0 %vm730_vm3, %v5407_v5  ;;  %v1289_v5 = vrot.slane %v6561_v4, 5  ;;  %v6527_v4 = vld [vmem:[%s6806_s17 + $0x24] sm:$0xff]   ;;  %v5174_v50 = vrot.slane %v7383_v18, 9  ;;  %v7429_v9 = vld [vmem:[%s8711_s1 + $0x10] sm:$0x3]  ;;  %v1327_v8 = vrot.slane %v6576_v63, 5 }
  0x95   : > { %6007 = vmatprep.mubr.msk.bf16.mxu0 %vm730_vm3, %v5408_v45  ;;  %v6562_v45 = vld [vmem:[%s6806_s17 + $0x8] sm:$0x1]  ;;  %v1348_v42 = vrot.slane %v6578_v54, 5  ;;  %v6579_v18 = vld [vmem:[%s6806_s17 + $0x74] sm:$0x1] }
  0x96   : > { %v1292_v25 = vrot.slane %v6562_v45, 5  ;;  %v1290_v15 = vsel %vm7117_vm7, %v5170_v41, %v1289_v5  ;;  %v4144_v45 = vsel %vm779_vm0, %v7175_v21, 0  ;;  %v6572_v41 = vld [vmem:[%s6806_s17 + $0x58] sm:$0xf]  ;;  %v1318_v24 = vsel %vm7117_vm7, %v5174_v50, %v1317_v37 }
  0x98   : > { %5868 = vmatmul.mubr.msk.bf16.gmra.mrb[4].mxu1 %vm730_vm3, %v5147_v59  ;;  %v2956_v59 = vsel %vm7117_vm7, %v2954_v39, %v2955_v44  ;;  %v2192_v39 = vor.u32 %v7362_v52, %v7360_v60  ;;  %v7387_v44 = vrot.slane %v2195_v20, 5 }
  0x99   : > { %5871 = vmatprep.mubr.msk.bf16.mxu1 %vm730_vm3, %v5148_v47  ;;  %v1291_v47 = vrot.slane %v1289_v5, 4  ;;  %v5413_v62 = vcombine.low %v2953_v0, %v2956_v59  ;;  %v7391_v5 = vld [vmem:[%s6806_s17 + $0x3c] sm:$0xe]  ;;  %v1244_v0 = vld [vmem:[%s6806_s17 + $0x60] sm:$0xe] }
  0x9c   : > { %6008 = vmatmul.mubr.msk.bf16.gmra.mrb[32].mxu0 %vm730_vm3, %v5409_v3  ;;  %v1303_v3 = vrot.slane %v6565_v7, 5 }
  0x9d   : > { %6011 = vmatprep.mubr.msk.bf16.mxu0 %vm730_vm3, %v5410_v16  ;;  %v1293_v16 = vsel %vm7117_vm7, %v1291_v47, %v1292_v25  ;;  %v1860_v25 = vsel %vm779_vm0, %v7200_v55, 0  ;;  %v1338_v47 = vrot.slane %v6572_v41, 5 }
  0x9e   : > { %v1305_v23 = vrot.slane %v1303_v3, 4  ;;  %v1304_v21 = vsel %vm7117_vm7, %v5172_v43, %v1303_v3  ;;  %v1319_v3 = vrot.slane %v1317_v37, 4 }
  0x9f   : > { %v1340_v43 = vrot.slane %v1338_v47, 4 }
  0xa0   : > { %5872 = vmatmul.mubr.msk.bf16.gmra.mrb[8].mxu1 %vm730_vm3, %v5149_v11  ;;  %v1239_v11 = vld [vmem:[%s6806_s17 + $0x24] sm:$0xe]  ;;  %v1307_v55 = vsel %vm7117_vm7, %v1305_v23, %v1306_v10  ;;  %v6577_v23 = vld [vmem:[%s6806_s17 + $0x5c] sm:$0x1]  ;;  %v5178_v10 = vrot.slane %v1244_v0, 9 }
  0xa1   : > { %5875 = vmatprep.mubr.msk.bf16.mxu1 %vm730_vm3, %v5150_v38  ;;  %v5187_v38 = vcombine.low %v1290_v15, %v1293_v16  ;;  %v5189_v7 = vcombine.low %v1304_v21, %v1307_v55  ;;  %v5175_v15 = vrot.slane %v7391_v5, 9  ;;  %v1341_v51 = vrot.slane %v6577_v23, 5  ;;  %v6529_v5 = vld [vmem:[%s6806_s17 + $0x3c] sm:$0xff]   ;;  %v6530_v21 = vld [vmem:[%s6806_s17 + $0x48] sm:$0xff]  }
  0xa4   : > { %6012 = vmatmul.mubr.msk.bf16.gmra.mrb[36].mxu0 %vm730_vm3, %v5411_v57  ;;  %v5173_v57 = vrot.slane %v1239_v11, 9 }
  0xa5   : > { %6015 = vmatprep.mubr.msk.bf16.mxu0 %vm730_vm3, %v5412_v28  ;;  %v1310_v28 = vrot.slane %v6568_v27, 5  ;;  %v5179_v27 = vrot.slane %v1245_v40, 9 }
  0xa7   : > { %v7417_v59 = vsel %vm7117_vm7, %v5173_v57, %v1310_v28  ;;  %v1312_v61 = vrot.slane %v1310_v28, 4  ;;  %v1347_v57 = vrot.slane %v1345_v19, 4 }
  0xa8   : > { %5876 = vmatmul.mubr.msk.bf16.gmra.mrb[12].mxu1 %vm730_vm3, %v5151_v14  ;;  %v1324_v14 = vrot.slane %v6570_v6, 5 }
  0xa9   : > { %5879 = vmatprep.mubr.msk.bf16.mxu1 %vm730_vm3, %v5152_v35  ;;  %v1242_v35 = vld [vmem:[%s6806_s17 + $0x48] sm:$0xe]  ;;  %v7494_v0 = vsel %vm7117_vm7, %v1347_v57, %v1348_v42  ;;  %v7542_v42 = vld [vmem:[%s6806_s17 + $0x9c] sm:$0xe]  ;;  %v3671_v57 = vshll.u32 %v7515_v13, 16 }
  0xaa   : > { %v1326_v16 = vrot.slane %v1324_v14, 4  ;;  %v5176_v20 = vrot.slane %v1242_v35, 9  ;;  %v7450_v35 = vsel %vm7117_vm7, %v5175_v15, %v1324_v14  ;;  %v5498_v15 = vld [vmem:[%s6806_s17 + $0x24] sm:$0xf] }
  0xac   : > { %6016 = vmatmul.mubr.msk.bf16.gmra.mrb[40].mxu0 %vm730_vm3, %v5413_v62  ;;  %v1320_v62 = vrot.slane %v6573_v49, 5  ;;  %v7462_v37 = vsel %vm7117_vm7, %v1326_v16, %v1327_v8  ;;  %v7511_v49 = vld [vmem:[%s6806_s17 + $0x90] sm:$0xe] }
  0xad   : > { %6021 = vmatprep.mubr.msk.bf16.mxu0 %vm730_vm3, %v6526_v46  ;;  %v5192_v40 = vcombine.low %v7450_v35, %v7462_v37 }
  0xae   : > { %v1321_v6 = vsel %vm7117_vm7, %v1319_v3, %v1320_v62  ;;  %v5495_v62 = vld [vmem:[%s6806_s17 + $0x18] sm:$0xf] }
  0xaf   : > { %v3665_v54 = vshll.u32 %v5495_v62, 16 }
  0xb0   : > { %5880 = vmatmul.mubr.msk.bf16.gmra.mrb[16].mxu1 %vm730_vm3, %v5153_v58  ;;  %v1331_v58 = vrot.slane %v7242_v1, 5  ;;  %v6575_v1 = vld [vmem:[%s6806_s17 + $0x70] sm:$0xf] }
  0xb1   : > { %5885 = vmatprep.mubr.msk.bf16.mxu1 %vm730_vm3, %v5187_v38  ;;  %v1352_v46 = vrot.slane %v6575_v1, 5  ;;  %v5177_v38 = vrot.slane %v1243_v56, 9  ;;  %v1247_v56 = vld [vmem:[%s6806_s17 + $0x84] sm:$0xe] }
  0xb2   : > { %v1333_v11 = vrot.slane %v1331_v58, 4  ;;  %v7466_v55 = vsel %vm7117_vm7, %v5176_v20, %v1331_v58  ;;  %v6580_v58 = vld [vmem:[%s6806_s17 + $0x7c] sm:$0xf]  ;;  %v7528_v20 = vld [vmem:[%s6806_s17 + $0x8c] sm:$0x1] }
  0xb3   : > { %v1354_v28 = vrot.slane %v1352_v46, 4  ;;  %v7476_v52 = vsel %vm7117_vm7, %v5177_v38, %v1338_v47  ;;  %v1359_v12 = vrot.slane %v6580_v58, 5  ;;  %v5191_v47 = vcombine.low %v1318_v24, %v1321_v6  ;;  %v7532_v38 = vld [vmem:[%s6806_s17 + $0x28] sm:$0xf]  ;;  %v6585_v58 = vld [vmem:[%s6806_s17 + $0x94] sm:$0xf] }
  0xb4   : > { %6022 = vmatmul.mubr.msk.bf16.vlgmr.msra.gmra.mrb[12].mxu0 %vm730_vm3, %v6527_v4  ;;  %v1355_v4 = vrot.slane %v6579_v18, 5  ;;  %v7472_v14 = vsel %vm7117_vm7, %v1333_v11, %v1334_v36  ;;  %v6581_v36 = vld [vmem:[%s8711_s1 + $0x8] sm:$0x3]  ;;  %v1369_v11 = vrot.slane %v7528_v20, 5  ;;  %v3689_v18 = vshll.u32 %v5498_v15, 16 }
  0xb5   : > { %6054 = vmatpush3.bf16.msra.mxu0 %v4144_v45  ;;  %6025 = vmatprep.mubr.msk.bf16.mxu0 %vm730_vm3, %v6528_v34  ;;  %v1314_v45 = vsel %vm7117_vm7, %v1312_v61, %v1313_v31  ;;  %v1246_v34 = vld [vmem:[%s6806_s17 + $0x78] sm:$0xe]  ;;  %v7498_v61 = vsel %vm7117_vm7, %v5179_v27, %v1352_v46  ;;  %v5193_v50 = vcombine.low %v7466_v55, %v7472_v14  ;;  %v5181_v46 = vrot.slane %v1247_v56, 9  ;;  %v1250_v24 = vld [vmem:[%s6806_s17 + $0xa8] sm:$0xe] }
  0xb6   : > { %6450 = vmatprep.subr.msk.bf16.mxu0 %vm779_vm0, %v7429_v9  ;;  %v7502_v32 = vsel %vm7117_vm7, %v1354_v28, %v1355_v4  ;;  %v5180_v31 = vrot.slane %v1246_v34, 9  ;;  %v5190_v41 = vcombine.low %v7417_v59, %v1314_v45  ;;  %v1361_v8 = vrot.slane %v1359_v12, 4  ;;  %v6532_v4 = vld [vmem:[%s6806_s17 + $0x60] sm:$0xff]   ;;  %v6586_v56 = vld [vmem:[%s6806_s17 + $0x98] sm:$0x1] }
  0xb7   : > { %v3675_v27 = vshrl.u32 %v7515_v13, 16  ;;  %v3686_v28 = vshrl.u32 %v5498_v15, 16  ;;  %v3695_v6 = vshll.u32 %v7532_v38, 16  ;;  %v3699_v34 = vshrl.u32 %v7532_v38, 16 }
  0xb8   : > { %5886 = vmatmul.mubr.msk.bf16.vlgmr.msra.gmra.mrb[20].mxu1 %vm730_vm3, %v5188_v22  ;;  %v7456_v22 = vrot.slane %v2192_v39, 4  ;;  %v7480_v39 = vsel %vm7117_vm7, %v1340_v43, %v1341_v51  ;;  %v6531_v43 = vld [vmem:[%s6806_s17 + $0x54] sm:$0xff]   ;;  %v7537_v23 = vsel %vm7117_vm7, %v5180_v31, %v1359_v12  ;;  %v5182_v51 = vrot.slane %v7511_v49, 9  ;;  %v6587_v31 = vld [vmem:[%s6806_s17 + $0xa0] sm:$0xf] }
  0xb9   : > { %5918 = vmatpush3.bf16.msra.mxu1 %v1860_v25  ;;  %5889 = vmatprep.mubr.msk.bf16.mxu1 %vm730_vm3, %v5189_v7  ;;  %v7484_v25 = vsel %vm7117_vm7, %v5178_v10, %v1345_v19  ;;  %v6582_v19 = vld [vmem:[%s6806_s17 + $0x80] sm:$0x1]  ;;  %v6583_v7 = vld [vmem:[%s6806_s17 + $0x88] sm:$0xf]  ;;  %v3662_v10 = vshrl.u32 %v5495_v62, 16  ;;  %v1373_v12 = vrot.slane %v6585_v58, 5 }
  0xba   : > { %6446 = vmatprep.subr.msk.bf16.mxu1 %vm779_vm0, %v6581_v36  ;;  %v1362_v1 = vrot.slane %v6582_v19, 5  ;;  %v1366_v3 = vrot.slane %v6583_v7, 5  ;;  %v1376_v36 = vrot.slane %v6586_v56, 5  ;;  %v5183_v62 = vrot.slane %v7542_v42, 9  ;;  %v7572_v56 = vld [vmem:[%s6806_s17 + $0x34] sm:$0xf] }
  0xbb   : > { %v1387_v19 = vrot.slane %v7075_v48, 5  ;;  %v3664_v7 = vrot.slane %v3662_v10, 4  ;;  %v3677_v15 = vrot.slane %v3675_v27, 4  ;;  %v3691_v58 = vrot.slane %v3689_v18, 5  ;;  %v7576_v42 = vld [vmem:[%s6806_s17 + $0x2c] sm:$0x1] }
  0xbc   : > { %6026 = vmatmul.mubr.msk.bf16.gmra.mrb[16].mxu0 %vm730_vm3, %v6529_v5  ;;  %v7550_v5 = vsel %vm7117_vm7, %v5181_v46, %v1366_v3  ;;  %v1368_v45 = vrot.slane %v1366_v3, 4  ;;  %v7566_v46 = vld [vmem:[%s6806_s17 + $0x20] sm:$0x1]  ;;  %v3667_v3 = vrot.slane %v3665_v54, 5  ;;  %v7578_v48 = vrot.slane %v3695_v6, 5  ;;  %v6533_v6 = vld [vmem:[%s6806_s17 + $0x6c] sm:$0xff]  }
  0xbd   : > { %6029 = vmatprep.mubr.msk.bf16.mxu0 %vm730_vm3, %v6530_v21  ;;  %v7557_v21 = vsel %vm7117_vm7, %v1361_v8, %v1362_v1  ;;  %v7569_v1 = vrot.slane %v3671_v57, 5  ;;  %v3688_v8 = vrot.slane %v3686_v28, 4  ;;  %v1375_v54 = vrot.slane %v1373_v12, 4  ;;  %v6588_v57 = vld [vmem:[%s6806_s17 + $0xa4] sm:$0x1] }
  0xbe   : > { %v1383_v63 = vrot.slane %v6588_v57, 5  ;;  %v5184_v27 = vrot.slane %v1250_v24, 9  ;;  %v1389_v28 = vrot.slane %v1387_v19, 4  ;;  %v1390_v18 = vrot.slane %v7083_v2, 5  ;;  %v6534_v2 = vld [vmem:[%s6806_s17 + $0x78] sm:$0xff]  }
  0xbf   : > { %v3719_v16 = vshll.u32 %v7572_v56, 16  ;;  %v3681_v57 = vshll.u32 %v7566_v46, 16  ;;  %v3705_v24 = vshll.u32 %v7576_v42, 16  ;;  %v3692_v59 = vor.u32 %v3691_v58, %v3688_v8  ;;  %v7627_v49 = vld [vmem:[%s6806_s17 + $0x38] sm:$0x1] }
  0xc0   : > { %5890 = vmatmul.mubr.msk.bf16.gmra.mrb[24].mxu1 %vm730_vm3, %v5190_v41  ;;  %v1380_v41 = vrot.slane %v6587_v31, 5  ;;  %v3701_v31 = vrot.slane %v3699_v34, 4  ;;  %v3668_v34 = vor.u32 %v3667_v3, %v3664_v7  ;;  %v7602_v7 = vsel %vm7117_vm7, %v1368_v45, %v1369_v11  ;;  %v5504_v45 = vld [vmem:[%s6806_s17 + $0x3c] sm:$0xf]  ;;  %v7642_v58 = vld [vmem:[%s6806_s17 + $0x40] sm:$0xf] }
  0xc1   : > { %5893 = vmatprep.mubr.msk.bf16.mxu1 %vm730_vm3, %v5191_v47  ;;  %v5501_v47 = vld [vmem:[%s6806_s17 + $0x30] sm:$0xf]  ;;  %v7608_v55 = vsel %vm7117_vm7, %v5182_v51, %v1373_v12  ;;  %v7612_v14 = vsel %vm7117_vm7, %v1375_v54, %v1376_v36  ;;  %v7624_v20 = vsel %vm7117_vm7, %v5184_v27, %v1387_v19  ;;  %v7629_v11 = vrot.slane %v3719_v16, 5  ;;  %v6535_v54 = vld [vmem:[%s6806_s17 + $0x84] sm:$0xff]  }
  0xc2   : > { %v3710_v10 = vshrl.u32 %v5501_v47, 16  ;;  %v3713_v53 = vshll.u32 %v5501_v47, 16  ;;  %v3678_v47 = vor.u32 %v3677_v15, %v7569_v1  ;;  %v3702_v35 = vor.u32 %v3701_v31, %v7578_v48  ;;  %v7723_v27 = vld [vmem:[%s6806_s17 + $0x50] sm:$0x1] }
  0xc3   : > { %v7635_v12 = vsel %vm7117_vm7, %v1389_v28, %v1390_v18  ;;  %v3707_v3 = vrot.slane %v3705_v24, 5  ;;  %v3729_v8 = vshll.u32 %v7627_v49, 16  ;;  %v3734_v31 = vshrl.u32 %v5504_v45, 16  ;;  %v7669_v24 = vld [vmem:[%s6806_s17 + $0x44] sm:$0x1]  ;;  %8739 = vst [vmem:[#allocation9_spill] sm:$0xff] %v7723_v27 }
  0xc4   : > { %6030 = vmatmul.mubr.msk.bf16.gmra.mrb[20].mxu0 %vm730_vm3, %v6531_v43  ;;  %v1382_v43 = vrot.slane %v1380_v41, 4  ;;  %v3712_v37 = vrot.slane %v3710_v10, 4  ;;  %v3679_v36 = vrot.slane %v3678_v47, 4  ;;  %v3703_v19 = vrot.slane %v3702_v35, 4  ;;  %v7733_v15 = vld [vmem:[%s6806_s17 + $0x70] sm:$0xf] }
  0xc5   : > { %6033 = vmatprep.mubr.msk.bf16.mxu0 %vm730_vm3, %v6532_v4  ;;  %v3723_v4 = vshrl.u32 %v7572_v56, 16  ;;  %v3737_v10 = vshll.u32 %v5504_v45, 16  ;;  %v8734_v18 = vcombine.low %v7476_v52, %v7480_v39  ;;  %v5507_v52 = vld [vmem:[%s6806_s17 + $0x48] sm:$0xf]  ;;  %v8735_v39 = vcombine.low %v7484_v25, %v7494_v0  ;;  %v7692_v0 = vld [vmem:[%s6806_s17 + $0x58] sm:$0xf] }
  0xc6   : > { %v7686_v45 = vrot.slane %v3734_v31, 4  ;;  %v3747_v25 = vshrl.u32 %v7642_v58, 16  ;;  %8737 = vst [vmem:[#allocation7_spill] sm:$0xff] %v7692_v0  ;;  %8741 = vst [vmem:[#allocation10_spill] sm:$0xff] %v7733_v15 }
  0xc7   : > { %v3725_v51 = vrot.slane %v3723_v4, 4  ;;  %v6536_v4 = vld [vmem:[%s6806_s17 + $0x90] sm:$0xff]  }
  0xc8   : > { %5894 = vmatmul.mubr.msk.bf16.gmra.mrb[28].mxu1 %vm730_vm3, %v5192_v40  ;;  %v3715_v40 = vrot.slane %v3713_v53, 5  ;;  %v7620_v53 = vsel %vm7117_vm7, %v1382_v43, %v1383_v63  ;;  %v3669_v63 = vrot.slane %v3668_v34, 4 }
  0xc9   : > { %5897 = vmatprep.mubr.msk.bf16.mxu1 %vm730_vm3, %v5193_v50  ;;  %v7616_v50 = vsel %vm7117_vm7, %v5183_v62, %v1380_v41  ;;  %v3683_v41 = vrot.slane %v3681_v57, 5  ;;  %v3693_v62 = vrot.slane %v3692_v59, 4  ;;  %v3726_v28 = vor.u32 %v3725_v51, %v7629_v11  ;;  %v5516_v59 = vld [vmem:[%s6806_s17 + $0x6c] sm:$0xf] }
  0xca   : > { %v3716_v16 = vor.u32 %v3715_v40, %v3712_v37  ;;  %v3674_v34 = vsel %vm6830_vm4, %v3669_v63, %v7569_v1  ;;  %v7666_v57 = vsel %vm779_vm0, %v7429_v9, 0  ;;  %v3743_v37 = vshll.u32 %v7642_v58, 16  ;;  %v7683_v9 = vld [vmem:[%s6806_s17 + $0x4c] sm:$0xf]  ;;  %v5510_v40 = vld [vmem:[%s6806_s17 + $0x54] sm:$0xf] }
  0xcb   : > { %v3684_v47 = vsel %vm6830_vm4, %v3679_v36, %v3683_v41  ;;  %v3698_v1 = vsel %vm6830_vm4, %v3693_v62, %v7578_v48  ;;  %8736 = vst [vmem:[#allocation6_spill] sm:$0xff] %v7683_v9  ;;  %v3731_v51 = vrot.slane %v3729_v8, 5  ;;  %v7688_v63 = vrot.slane %v3737_v10, 5 }
  0xcc   : > { %6034 = vmatmul.mubr.msk.bf16.gmra.mrb[24].mxu0 %vm730_vm3, %v6533_v6  ;;  %v3717_v35 = vrot.slane %v3716_v16, 4  ;;  %v3727_v48 = vrot.slane %v3726_v28, 4  ;;  %v3753_v36 = vshll.u32 %v7669_v24, 16  ;;  %v3758_v41 = vshrl.u32 %v5507_v52, 16 }
  0xcd   : > { %6037 = vmatprep.mubr.msk.bf16.mxu0 %vm730_vm3, %v6534_v2  ;;  %v3708_v2 = vsel %vm6830_vm4, %v3703_v19, %v3707_v3  ;;  %v3761_v62 = vshll.u32 %v5507_v52, 16  ;;  %v3767_v19 = vshll.u32 %v7683_v9, 16  ;;  %v3771_v3 = vshrl.u32 %v7683_v9, 16  ;;  %v7774_v9 = vld [vmem:[%s6806_s17 + $0x7c] sm:$0xf] }
  0xce   : > { %v3782_v16 = vshrl.u32 %v5510_v40, 16  ;;  %v3785_v8 = vshll.u32 %v5510_v40, 16  ;;  %v7699_v31 = vcombine.low %v3674_v34, %v3684_v47  ;;  %v7701_v10 = vcombine.low %v3698_v1, %v3708_v2  ;;  %v5513_v34 = vld [vmem:[%s6806_s17 + $0x60] sm:$0xf]  ;;  %v7715_v47 = vld [vmem:[%s6806_s17 + $0x64] sm:$0xf] }
  0xcf   : > { %v3791_v28 = vshll.u32 %v7692_v0, 16  ;;  %v3722_v52 = vsel %vm6830_vm4, %v3717_v35, %v7629_v11  ;;  %v7711_v40 = vrot.slane %v3743_v37, 5  ;;  %8738 = vst [vmem:[#allocation8_spill] sm:$0xff] %v7715_v47  ;;  %v6538_v1 = vld [vmem:[%s6806_s17 + $0xa8] sm:$0xff]   ;;  %v3732_v2 = vsel %vm6830_vm4, %v3727_v48, %v3731_v51  ;;  %v7740_v48 = vld [vmem:[%s6806_s17 + $0x5c] sm:$0x1] }
  0xd0   : > { %5898 = vmatmul.mubr.msk.bf16.gmra.mrb[0].mxu1 %vm730_vm3, %v8734_v18  ;;  %v6537_v18 = vld [vmem:[%s6806_s17 + $0x9c] sm:$0xff]   ;;  %v7720_v6 = vrot.slane %v3753_v36, 5  ;;  %v3760_v11 = vrot.slane %v3758_v41, 4  ;;  %v3763_v35 = vrot.slane %v3761_v62, 5  ;;  %v8740_v37 = vcombine.low %v7498_v61, %v7502_v32  ;;  %8743 = vst [vmem:[#allocation11_spill] sm:$0xff] %v7740_v48 }
  0xd1   : > { %5901 = vmatprep.mubr.msk.bf16.mxu1 %vm730_vm3, %v8735_v39  ;;  %v3740_v39 = vor.u32 %v7688_v63, %v7686_v45  ;;  %v7730_v45 = vrot.slane %v3767_v19, 5  ;;  %v3773_v63 = vrot.slane %v3771_v3, 4  ;;  %v3787_v43 = vrot.slane %v3785_v8, 5 }
  0xd2   : > { %v8742_v51 = vcombine.low %v7537_v23, %v7557_v21  ;;  %v7742_v36 = vrot.slane %v3791_v28, 5  ;;  %v3806_v61 = vshrl.u32 %v5513_v34, 16  ;;  %v3809_v32 = vshll.u32 %v5513_v34, 16 }
  0xd3   : > { %v3815_v62 = vshll.u32 %v7715_v47, 16  ;;  %v3819_v19 = vshrl.u32 %v7715_v47, 16  ;;  %v3830_v3 = vshrl.u32 %v5516_v59, 16  ;;  %v7746_v8 = vcombine.low %v3722_v52, %v3732_v2 }
  0xd4   : > { %6038 = vmatmul.mubr.msk.bf16.gmra.mrb[28].mxu0 %vm730_vm3, %v6535_v54  ;;  %v3795_v54 = vshrl.u32 %v7692_v0, 16  ;;  %v3839_v21 = vshll.u32 %v7733_v15, 16  ;;  %v3843_v28 = vshrl.u32 %v7733_v15, 16  ;;  %v3774_v34 = vor.u32 %v3773_v63, %v7730_v45  ;;  %v6539_v15 = vld [vmem:[%s6806_s17 + $0xb4] sm:$0xff]  }
  0xd5   : > { %6041 = vmatprep.mubr.msk.bf16.mxu0 %vm730_vm3, %v6536_v4  ;;  %v3749_v4 = vrot.slane %v3747_v25, 4  ;;  %v3784_v25 = vrot.slane %v3782_v16, 4  ;;  %v3833_v16 = vshll.u32 %v5516_v59, 16  ;;  %v3808_v2 = vrot.slane %v3806_v61, 4 }
  0xd6   : > { %v3797_v41 = vrot.slane %v3795_v54, 4  ;;  %v3764_v54 = vor.u32 %v3763_v35, %v3760_v11  ;;  %v3811_v47 = vrot.slane %v3809_v32, 5  ;;  %v3821_v11 = vrot.slane %v3819_v19, 4  ;;  %v7764_v35 = vld [vmem:[%s6806_s17 + $0x74] sm:$0x1] }
  0xd7   : > { %v3750_v23 = vor.u32 %v3749_v4, %v7711_v40  ;;  %v3788_v59 = vor.u32 %v3787_v43, %v3784_v25  ;;  %v7758_v4 = vld [vmem:[%s6806_s17 + $0x68] sm:$0x1]  ;;  %v3832_v63 = vrot.slane %v3830_v3, 4  ;;  %v7766_v0 = vrot.slane %v3839_v21, 5  ;;  %v5519_v25 = vld [vmem:[%s6806_s17 + $0x78] sm:$0xf] }
  0xd8   : > { %5902 = vmatmul.mubr.msk.bf16.gmra.mrb[4].mxu1 %vm730_vm3, %v8740_v37  ;;  %v3777_v37 = vshll.u32 %v7723_v27, 16  ;;  %v3798_v52 = vor.u32 %v3797_v41, %v7742_v36  ;;  %v3741_v27 = vrot.slane %v3740_v39, 4  ;;  %v3845_v43 = vrot.slane %v3843_v28, 4  ;;  %v6540_v39 = vld [vmem:[%s6806_s17 + $0xc0] sm:$0xff]  }
  0xd9   : > { %5905 = vmatprep.mubr.msk.bf16.mxu1 %vm730_vm3, %v8742_v51  ;;  %v3801_v51 = vshll.u32 %v7740_v48, 16  ;;  %v3835_v48 = vrot.slane %v3833_v16, 5  ;;  %v8744_v41 = vcombine.low %v7550_v5, %v7602_v7  ;;  %v3765_v61 = vrot.slane %v3764_v54, 4 }
  0xda   : > { %v3775_v32 = vrot.slane %v3774_v34, 4  ;;  %v8745_v3 = vcombine.low %v7608_v55, %v7612_v14  ;;  %v3789_v16 = vrot.slane %v3788_v59, 4  ;;  %v3812_v21 = vor.u32 %v3811_v47, %v3808_v2  ;;  %v5522_v2 = vld [vmem:[%s6806_s17 + $0x84] sm:$0xf] }
  0xdb   : > { %v3803_v19 = vrot.slane %v3801_v51, 5  ;;  %v3825_v28 = vshll.u32 %v7758_v4, 16  ;;  %v3836_v7 = vor.u32 %v3835_v48, %v3832_v63  ;;  %v3849_v54 = vshll.u32 %v7764_v35, 16 }
  0xdc   : > { %6042 = vmatmul.mubr.msk.bf16.gmra.mrb[32].mxu0 %vm730_vm3, %v6537_v18  ;;  %v7761_v18 = vrot.slane %v3815_v62, 5  ;;  %v3779_v62 = vrot.slane %v3777_v37, 5  ;;  %v3854_v34 = vshrl.u32 %v5519_v25, 16  ;;  %v3846_v37 = vor.u32 %v3845_v43, %v7766_v0  ;;  %v7810_v43 = vld [vmem:[%s6806_s17 + $0x80] sm:$0x1] }
  0xdd   : > { %6045 = vmatprep.mubr.msk.bf16.mxu0 %vm730_vm3, %v6538_v1  ;;  %v3751_v1 = vrot.slane %v3750_v23, 4  ;;  %v3799_v23 = vrot.slane %v3798_v52, 4  ;;  %v3857_v51 = vshll.u32 %v5519_v25, 16  ;;  %v3863_v55 = vshll.u32 %v7774_v9, 16 }
  0xde   : > { %v3822_v5 = vor.u32 %v3821_v11, %v7761_v18  ;;  %v3867_v14 = vshrl.u32 %v7774_v9, 16  ;;  %v3746_v47 = vsel %vm6830_vm4, %v3741_v27, %v7711_v40  ;;  %v3770_v59 = vsel %vm6830_vm4, %v3765_v61, %v7730_v45  ;;  %v7807_v11 = vld [vmem:[%s6806_s17 + $0x88] sm:$0xf] }
  0xdf   : > { %v3756_v48 = vsel %vm6830_vm4, %v3751_v1, %v7720_v6  ;;  %v3780_v52 = vsel %vm6830_vm4, %v3775_v32, %v3779_v62  ;;  %v3804_v27 = vsel %vm6830_vm4, %v3799_v23, %v3803_v19  ;;  %v3813_v40 = vrot.slane %v3812_v21, 4  ;;  %v5525_v62 = vld [vmem:[%s6806_s17 + $0x90] sm:$0xf] }
  0xe0   : > { %5906 = vmatmul.mubr.msk.bf16.gmra.mrb[8].mxu1 %vm730_vm3, %v8744_v41  ;;  %v3827_v6 = vrot.slane %v3825_v28, 5  ;;  %v3823_v45 = vrot.slane %v3822_v5, 4  ;;  %v3837_v63 = vrot.slane %v3836_v7, 4  ;;  %v3851_v1 = vrot.slane %v3849_v54, 5  ;;  %v7836_v54 = vld [vmem:[%s6806_s17 + $0x94] sm:$0xf] }
  0xe1   : > { %5909 = vmatprep.mubr.msk.bf16.mxu1 %vm730_vm3, %v8745_v3  ;;  %v3856_v25 = vrot.slane %v3854_v34, 4  ;;  %v3847_v41 = vrot.slane %v3846_v37, 4  ;;  %v3859_v61 = vrot.slane %v3857_v51, 5  ;;  %v7812_v32 = vrot.slane %v3863_v55, 5  ;;  %v6541_v3 = vld [vmem:[%s6806_s17 + $0xcc] sm:$0xff]  }
  0xe2   : > { %v8746_v19 = vcombine.low %v7616_v50, %v7620_v53  ;;  %v3887_v23 = vshll.u32 %v7807_v11, 16  ;;  %v3891_v21 = vshrl.u32 %v7807_v11, 16  ;;  %v8747_v28 = vcombine.low %v7624_v20, %v7635_v12  ;;  %v5528_v51 = vld [vmem:[%s6806_s17 + $0x9c] sm:$0xf]  ;;  %v6542_v55 = vld [vmem:[%s6806_s17 + $0xc] sm:$0xff]  }
  0xe3   : > { %v7826_v5 = vcombine.low %v3746_v47, %v3756_v48  ;;  %v7828_v7 = vcombine.low %v3770_v59, %v3780_v52  ;;  %v3818_v53 = vsel %vm6830_vm4, %v3813_v40, %v7761_v18  ;;  %v3828_v34 = vsel %vm6830_vm4, %v3823_v45, %v3827_v6  ;;  %v7853_v40 = vld [vmem:[%s6806_s17 + $0xa0] sm:$0xf] }
  0xe4   : > { %6046 = vmatmul.mubr.msk.bf16.gmra.mrb[36].mxu0 %vm730_vm3, %v6539_v15  ;;  %v3794_v15 = vsel %vm6830_vm4, %v3789_v16, %v7742_v36  ;;  %v3869_v36 = vrot.slane %v3867_v14, 4  ;;  %v3881_v16 = vshll.u32 %v5522_v2, 16  ;;  %v3873_v20 = vshll.u32 %v7810_v43, 16 }
  0xe5   : > { %6049 = vmatprep.mubr.msk.bf16.mxu0 %vm730_vm3, %v6540_v39  ;;  %v3878_v39 = vshrl.u32 %v5522_v2, 16  ;;  %v7830_v50 = vcombine.low %v3794_v15, %v3804_v27  ;;  %v3902_v12 = vshrl.u32 %v5525_v62, 16  ;;  %v3905_v37 = vshll.u32 %v5525_v62, 16 }
  0xe6   : > { %v3842_v14 = vsel %vm6830_vm4, %v3837_v63, %v7766_v0  ;;  %v3852_v18 = vsel %vm6830_vm4, %v3847_v41, %v3851_v1  ;;  %v3860_v47 = vor.u32 %v3859_v61, %v3856_v25  ;;  %v3870_v48 = vor.u32 %v3869_v36, %v7812_v32  ;;  %v7858_v0 = vld [vmem:[%s6806_s17 + $0x8c] sm:$0x1] }
  0xe7   : > { %v3880_v59 = vrot.slane %v3878_v39, 4  ;;  %v3883_v52 = vrot.slane %v3881_v16, 5  ;;  %v7850_v15 = vrot.slane %v3887_v23, 5  ;;  %v3893_v27 = vrot.slane %v3891_v21, 4 }
  0xe8   : > { %5910 = vmatmul.mubr.msk.bf16.gmra.mrb[12].mxu1 %vm730_vm3, %v8746_v19  ;;  %v3911_v6 = vshll.u32 %v7836_v54, 16  ;;  %v3915_v2 = vshrl.u32 %v7836_v54, 16  ;;  %v3926_v45 = vshrl.u32 %v5528_v51, 16  ;;  %v3929_v63 = vshll.u32 %v5528_v51, 16 }
  0xe9   : > { %5913 = vmatprep.mubr.msk.bf16.mxu1 %vm730_vm3, %v8747_v28  ;;  %v7862_v1 = vcombine.low %v3818_v53, %v3828_v34  ;;  %v7864_v25 = vrot.slane %v3873_v20, 5  ;;  %v3904_v41 = vrot.slane %v3902_v12, 4  ;;  %v3907_v61 = vrot.slane %v3905_v37, 5  ;;  %v5531_v53 = vld [vmem:[%s6806_s17 + $0xa8] sm:$0xf] }
  0xea   : > { %v7866_v36 = vcombine.low %v3842_v14, %v3852_v18  ;;  %v7868_v62 = vrot.slane %v3860_v47, 4  ;;  %v3939_v19 = vshrl.u32 %v7853_v40, 16  ;;  %v8748_v39 = vcombine.low %v7342_v17, %v7351_v26  ;;  %v7886_v17 = vld [vmem:[%s6806_s17 + $0xac] sm:$0xf]  ;;  %v7889_v26 = vld [vmem:[%s6806_s17 + $0x98] sm:$0x1] }
  0xeb   : > { %v7877_v16 = vrot.slane %v3870_v48, 4  ;;  %v3884_v23 = vor.u32 %v3883_v52, %v3880_v59  ;;  %v3894_v21 = vor.u32 %v3893_v27, %v7850_v15  ;;  %v3897_v28 = vshll.u32 %v7858_v0, 16 }
  0xec   : > { %6050 = vmatmul.mubr.msk.bf16.gmra.mrb[40].mxu0 %vm730_vm3, %v6541_v3  ;;  %v5293_v3 = vld [vmem:[%s6806_s17 + $0x30] sm:$0xf]  ;;  %v7883_v34 = vrot.slane %v3911_v6, 5  ;;  %v3917_v20 = vrot.slane %v3915_v2, 4  ;;  %v3928_v12 = vrot.slane %v3926_v45, 4  ;;  %v3931_v37 = vrot.slane %v3929_v63, 5 }
  0xed   : > { %6055 = vmatprep.mubr.msk.bf16.mxu0 %vm730_vm3, %v7699_v31  ;;  %v3935_v31 = vshll.u32 %v7853_v40, 16  ;;  %v3908_v51 = vor.u32 %v3907_v61, %v3904_v41  ;;  %v2176_v14 = vshrl.u32 %v5293_v3, 16  ;;  %v2179_v18 = vshll.u32 %v5293_v3, 16  ;;  %v7901_v6 = vld [vmem:[%s6806_s17 + $0xa4] sm:$0x1] }
  0xee   : > { %v2198_v47 = vsel %vm6830_vm4, %v7456_v22, %v7387_v44  ;;  %v3941_v59 = vrot.slane %v3939_v19, 4  ;;  %v3950_v52 = vshrl.u32 %v5531_v53, 16  ;;  %v3953_v27 = vshll.u32 %v5531_v53, 16  ;;  %v6544_v44 = vld [vmem:[%s6806_s17 + $0x24] sm:$0xff]  }
  0xef   : > { %v7896_v48 = vrot.slane %v3935_v31, 5  ;;  %v3959_v2 = vshll.u32 %v7886_v17, 16  ;;  %v3963_v45 = vshrl.u32 %v7886_v17, 16  ;;  %v2178_v63 = vrot.slane %v2176_v14, 4 }
  0xf0   : > { %5914 = vmatmul.mubr.msk.bf16.gmra.mrb[16].mxu1 %vm730_vm3, %v8748_v39  ;;  %v2181_v41 = vrot.slane %v2179_v18, 5  ;;  %v7909_v22 = vrot.slane %v3897_v28, 5  ;;  %v3918_v61 = vor.u32 %v3917_v20, %v7883_v34  ;;  %v3932_v31 = vor.u32 %v3931_v37, %v3928_v12  ;;  %v7926_v20 = vld [vmem:[%s6806_s17 + $0xb0] sm:$0x1]  ;;  %v5534_v37 = vld [vmem:[%s6806_s17 + $0xb4] sm:$0xf] }
  0xf1   : > { %5919 = vmatprep.mubr.msk.bf16.mxu1 %vm730_vm3, %v6542_v55  ;;  %v6543_v55 = vld [vmem:[%s6806_s17 + $0x18] sm:$0xff]   ;;  %v7913_v19 = vrot.slane %v3884_v23, 4  ;;  %v7915_v3 = vrot.slane %v3894_v21, 4  ;;  %v7917_v39 = vrot.slane %v3908_v51, 4  ;;  %v3945_v28 = vshll.u32 %v7901_v6, 16 }
  0xf2   : > { %v2182_v53 = vor.u32 %v2181_v41, %v2178_v63  ;;  %v3952_v14 = vrot.slane %v3950_v52, 4  ;;  %v3955_v23 = vrot.slane %v3953_v27, 5  ;;  %v7929_v21 = vrot.slane %v3959_v2, 5  ;;  %v5537_v2 = vld [vmem:[%s6806_s17 + $0xc0] sm:$0xf] }
  0xf3   : > { %v3965_v12 = vrot.slane %v3963_v45, 4  ;;  %v3876_v18 = vsel %vm6830_vm4, %v7877_v16, %v7864_v25  ;;  %v3933_v52 = vrot.slane %v3932_v31, 4  ;;  %v3890_v27 = vsel %vm6830_vm4, %v7913_v19, %v7850_v15  ;;  %v7951_v16 = vld [vmem:[%s6806_s17 + $0xb8] sm:$0xf] }
  0xf4   : > { %6056 = vmatmul.mubr.msk.bf16.vlgmr.msra.gmra.mrb[12].mxu0 %vm730_vm3, %v7701_v10  ;;  %v3921_v10 = vshll.u32 %v7889_v26, 16  ;;  %v2183_v51 = vrot.slane %v2182_v53, 4  ;;  %v3914_v25 = vsel %vm6830_vm4, %v7917_v39, %v7883_v34  ;;  %8749 = vst [vmem:[#allocation12_spill] sm:$0xff] %v7951_v16  ;;  %v3947_v15 = vrot.slane %v3945_v28, 5  ;;  %v6545_v34 = vld [vmem:[%s6806_s17 + $0x30] sm:$0xff]  }
  0xf5   : > { %6088 = vmatpush3.bf16.msra.mxu0 %v7666_v57  ;;  %6059 = vmatprep.mubr.msk.bf16.mxu0 %vm730_vm3, %v7746_v8  ;;  %v3942_v8 = vor.u32 %v3941_v59, %v7896_v48  ;;  %v3919_v59 = vrot.slane %v3918_v61, 4  ;;  %v3969_v63 = vshll.u32 %v7926_v20, 16  ;;  %v3974_v41 = vshrl.u32 %v5534_v37, 16 }
  0xf6   : > { %v2188_v45 = vsel %vm6830_vm4, %v2183_v51, %v7360_v60  ;;  %v3966_v31 = vor.u32 %v3965_v12, %v7929_v21  ;;  %v3977_v19 = vshll.u32 %v5534_v37, 16  ;;  %v6546_v60 = vld [vmem:[%s6806_s17 + $0x3c] sm:$0xff]   ;;  %v3987_v53 = vshrl.u32 %v7951_v16, 16 }
  0xf7   : > { %v3943_v61 = vrot.slane %v3942_v8, 4  ;;  %v3998_v8 = vshrl.u32 %v5537_v2, 16  ;;  %v4001_v28 = vshll.u32 %v5537_v2, 16  ;;  %v3971_v12 = vrot.slane %v3969_v63, 5 }
  0xf8   : > { %5920 = vmatmul.mubr.msk.bf16.vlgmr.msra.gmra.mrb[20].mxu1 %vm730_vm3, %v6543_v55  ;;  %v3923_v55 = vrot.slane %v3921_v10, 5  ;;  %v3956_v10 = vor.u32 %v3955_v23, %v3952_v14  ;;  %v3976_v37 = vrot.slane %v3974_v41, 4  ;;  %v3979_v2 = vrot.slane %v3977_v19, 5 }
  0xf9   : > { %6183 = vmatpush3.bf16.msra.mxu1 %v6835_v33  ;;  %5923 = vmatprep.mubr.msk.bf16.mxu1 %vm730_vm3, %v6544_v44  ;;  %v3900_v33 = vsel %vm6830_vm4, %v7915_v3, %v7909_v22  ;;  %v7959_v44 = vld [vmem:[%s6806_s17 + $0xc4] sm:$0xf]  ;;  %v7961_v22 = vcombine.low %v2188_v45, %v2198_v47  ;;  %v5540_v3 = vld [vmem:[%s6806_s17 + $0xcc] sm:$0xf]  ;;  %v3938_v47 = vsel %vm6830_vm4, %v3933_v52, %v7896_v48  ;;  %v3967_v52 = vrot.slane %v3966_v31, 4 }
  0xfa   : > { %8750 = vst [vmem:[#allocation13_spill] sm:$0xff] %v7959_v44  ;;  %v3924_v39 = vsel %vm6830_vm4, %v3919_v59, %v3923_v55  ;;  %v4007_v14 = vshll.u32 %v7959_v44, 16  ;;  %v4011_v23 = vshrl.u32 %v7959_v44, 16  ;;  %v4022_v51 = vshrl.u32 %v5540_v3, 16  ;;  %v7987_v45 = vld [vmem:[%s6806_s17 + $0xbc] sm:$0x1] }
  0xfb   : > { %v4025_v59 = vshll.u32 %v5540_v3, 16  ;;  %v3948_v48 = vsel %vm6830_vm4, %v3943_v61, %v3947_v15  ;;  %v3957_v55 = vrot.slane %v3956_v10, 4  ;;  %8752 = vst [vmem:[#allocation15_spill] sm:$0xff] %v7987_v45  ;;  %v3989_v63 = vrot.slane %v3987_v53, 4 }
  0xfc   : > { %6060 = vmatmul.mubr.msk.bf16.gmra.mrb[16].mxu0 %vm730_vm3, %v7826_v5  ;;  %v3983_v5 = vshll.u32 %v7951_v16, 16  ;;  %v4003_v44 = vrot.slane %v4001_v28, 5  ;;  %v7994_v15 = vrot.slane %v4007_v14, 5  ;;  %v4013_v61 = vrot.slane %v4011_v23, 4  ;;  %v6547_v28 = vld [vmem:[%s6806_s17 + $0x48] sm:$0xff]  }
  0xfd   : > { %6063 = vmatprep.mubr.msk.bf16.mxu0 %vm730_vm3, %v7828_v7  ;;  %v7981_v7 = vld [vmem:[%s6806_s17 + $0xd0] sm:$0xf]  ;;  %v8753_v10 = vsel %vm6830_vm4, %v7868_v62, %v7812_v32  ;;  %v4024_v53 = vrot.slane %v4022_v51, 4  ;;  %v8010_v14 = vcombine.low %v3890_v27, %v3900_v33  ;;  %v8012_v23 = vcombine.low %v3914_v25, %v3924_v39  ;;  %v6548_v51 = vld [vmem:[%s6806_s17 + $0x54] sm:$0xff]  }
  0xfe   : > { %8751 = vst [vmem:[#allocation14_spill] sm:$0xff] %v7981_v7  ;;  %v7990_v57 = vrot.slane %v3983_v5, 5  ;;  %v4031_v41 = vshll.u32 %v7981_v7, 16  ;;  %v4035_v3 = vshrl.u32 %v7981_v7, 16  ;;  %v5552_v31 = vcombine.low %v8753_v10, %v3876_v18  ;;  %v8005_v5 = vld [vmem:[%s6806_s17 + $0xc8] sm:$0x1] }
  0xff   : > { %8755 = vst [vmem:[#allocation17_spill] sm:$0xff] %v8005_v5  ;;  %v8014_v32 = vcombine.low %v3938_v47, %v3948_v48  ;;  %v3962_v62 = vsel %vm6830_vm4, %v3957_v55, %v7929_v21  ;;  %v5290_v10 = vld [vmem:[%s6806_s17 + $0x24] sm:$0xf]  ;;  %v8029_v25 = vld [vmem:[%s6806_s17 + $0xd4] sm:$0x1]  ;;  %v3972_v21 = vsel %vm6830_vm4, %v3967_v52, %v3971_v12  ;;  %v4405_v12 = vrot.slane %v7515_v13, 5 }
 0x100   : > { %5924 = vmatmul.mubr.msk.bf16.gmra.mrb[24].mxu1 %vm730_vm3, %v6545_v34  ;;  %v4000_v34 = vrot.slane %v3998_v8, 4  ;;  %v4027_v8 = vrot.slane %v4025_v59, 5  ;;  %v3990_v27 = vor.u32 %v3989_v63, %v7990_v57  ;;  %8758 = vst [vmem:[#allocation20_spill] sm:$0xff] %v8029_v25  ;;  %v8031_v39 = vrot.slane %v4031_v41, 5  ;;  %v5576_v63 = vld [vmem:[%s6806_s17 + $0x18] sm:$0xe] }
 0x101   : > { %5927 = vmatprep.mubr.msk.bf16.mxu1 %vm730_vm3, %v6546_v60  ;;  %v3993_v60 = vshll.u32 %v7987_v45, 16  ;;  %v4037_v47 = vrot.slane %v4035_v3, 4  ;;  %v4041_v41 = vshll.u32 %v8029_v25, 16  ;;  %v6589_v52 = vld [vmem:[%s6806_s17 + $0x28] sm:$0xf] }
 0x102   : > { %v4004_v48 = vor.u32 %v4003_v44, %v4000_v34  ;;  %v2161_v3 = vshll.u32 %v6589_v52, 16  ;;  %v2165_v44 = vshrl.u32 %v6589_v52, 16  ;;  %v8047_v34 = vcombine.low %v3962_v62, %v3972_v21  ;;  %v5577_v52 = vld [vmem:[%s6806_s17 + $0x24] sm:$0xe] }
 0x103   : > { %v8039_v55 = vrot.slane %v3993_v60, 5  ;;  %v8051_v60 = vrot.slane %v3990_v27, 4  ;;  %v4408_v62 = vrot.slane %v7566_v46, 5  ;;  %v6549_v27 = vld [vmem:[%s6806_s17 + $0x60] sm:$0xff]   ;;  %v4407_v21 = vrot.slane %v4405_v12, 4 }
 0x104   : > { %v8001_v19 = vpop.f32.mrb[0].mxu0  ;;  %6064 = vmatmul.mubr.msk.bf16.gmra.mrb[20].mxu0 %vm730_vm3, %v7830_v50  ;;  %v3980_v50 = vor.u32 %v3979_v2, %v3976_v37  ;;  %v4017_v37 = vshll.u32 %v8005_v5, 16  ;;  %v4028_v2 = vor.u32 %v4027_v8, %v4024_v53  ;;  %v4038_v53 = vor.u32 %v4037_v47, %v8031_v39  ;;  %v6592_v5 = vld [vmem:[%s6806_s17 + $0x4c] sm:$0xf] }
 0x105   : > { %8754 = vst [vmem:[#allocation16_spill] sm:$0xff] %v8001_v19  ;;  %v8019_v18 = vpop.f32.mrb[1].mxu0  ;;  %6067 = vmatprep.mubr.msk.bf16.mxu0 %vm730_vm3, %v7862_v1  ;;  %v4014_v1 = vor.u32 %v4013_v61, %v7994_v15  ;;  %v8054_v8 = vrot.slane %v4004_v48, 4  ;;  %v8067_v47 = vrot.slane %v4041_v41, 5  ;;  %v8069_v48 = vrot.slane %v2161_v3, 5 }
 0x106   : > { %8756 = vst [vmem:[#allocation18_spill] sm:$0xff] %v8019_v18  ;;  %v8026_v33 = vpop.f32.mrb[2].mxu0  ;;  %v2155_v18 = vshll.u32 %v5290_v10, 16  ;;  %v8049_v61 = vrot.slane %v3980_v50, 4  ;;  %v8058_v13 = vrot.slane %v4017_v37, 5  ;;  %v6550_v37 = vld [vmem:[%s6806_s17 + $0x6c] sm:$0xff]  }
 0x107   : > { %8757 = vst [vmem:[#allocation19_spill] sm:$0xff] %v8026_v33  ;;  %v8035_v59 = vpop.f32.mrb[3].mxu0  ;;  %v2152_v33 = vshrl.u32 %v5290_v10, 16  ;;  %v5592_v10 = vrot.slane %v5576_v63, 9  ;;  %v5593_v46 = vrot.slane %v5577_v52, 9  ;;  %v2233_v45 = vshll.u32 %v6592_v5, 16 }
 0x108   : > { %8759 = vst [vmem:[#allocation21_spill] sm:$0xff] %v8035_v59  ;;  %5928 = vmatmul.mubr.msk.bf16.gmra.mrb[28].mxu1 %vm730_vm3, %v6547_v28  ;;  %v8056_v28 = vrot.slane %v4014_v1, 4  ;;  %v8061_v59 = vrot.slane %v4028_v2, 4  ;;  %v2157_v50 = vrot.slane %v2155_v18, 5  ;;  %v2167_v1 = vrot.slane %v2165_v44, 4 }
 0x109   : > { %5931 = vmatprep.mubr.msk.bf16.mxu1 %vm730_vm3, %v6548_v51  ;;  %v2154_v51 = vrot.slane %v2152_v33, 4  ;;  %v8073_v2 = vrot.slane %v4038_v53, 4  ;;  %v4412_v18 = vrot.slane %v7532_v38, 5  ;;  %v6590_v33 = vld [vmem:[%s6806_s17 + $0x2c] sm:$0x1]  ;;  %v8099_v44 = vsel %vm7117_vm7, %v5592_v10, %v4405_v12 }
 0x10a   : > { %v2171_v63 = vshll.u32 %v6590_v33, 16  ;;  %v5578_v52 = vld [vmem:[%s6806_s17 + $0x30] sm:$0xe]  ;;  %v4419_v33 = vrot.slane %v7572_v56, 5  ;;  %v8107_v38 = vsel %vm7117_vm7, %v4407_v21, %v4408_v62  ;;  %v2168_v3 = vor.u32 %v2167_v1, %v8069_v48  ;;  %v5299_v1 = vld [vmem:[%s6806_s17 + $0x48] sm:$0xf] }
 0x10b   : > { %v2158_v53 = vor.u32 %v2157_v50, %v2154_v51  ;;  %v4426_v12 = vrot.slane %v7642_v58, 5  ;;  %v4044_v56 = vsel %vm6830_vm4, %v8073_v2, %v8067_v47  ;;  %v8119_v10 = vsel %vm7117_vm7, %v5593_v46, %v4412_v18  ;;  %v6591_v19 = vld [vmem:[%s6806_s17 + $0x40] sm:$0xf]  ;;  %v6551_v46 = vld [vmem:[%s6806_s17 + $0x78] sm:$0xff]  }
 0x10c   : > { %6068 = vmatmul.mubr.msk.bf16.gmra.mrb[24].mxu0 %vm730_vm3, %v7866_v36  ;;  %v4415_v36 = vrot.slane %v7576_v42, 5  ;;  %v4414_v62 = vrot.slane %v4412_v18, 4  ;;  %v2173_v51 = vrot.slane %v2171_v63, 5  ;;  %v5579_v42 = vld [vmem:[%s6806_s17 + $0x3c] sm:$0xe]  ;;  %v5594_v50 = vrot.slane %v5578_v52, 9 }
 0x10d   : > { %6071 = vmatprep.mubr.msk.bf16.mxu0 %vm730_vm3, %v5552_v31  ;;  %v5296_v31 = vld [vmem:[%s6806_s17 + $0x3c] sm:$0xf]  ;;  %v4421_v41 = vrot.slane %v4419_v33, 4  ;;  %v2209_v47 = vshll.u32 %v6591_v19, 16  ;;  %v2213_v2 = vshrl.u32 %v6591_v19, 16  ;;  %v2169_v18 = vrot.slane %v2168_v3, 4 }
 0x10e   : > { %v2200_v58 = vshrl.u32 %v5296_v31, 16  ;;  %v2203_v21 = vshll.u32 %v5296_v31, 16  ;;  %v5595_v63 = vrot.slane %v5579_v42, 9  ;;  %v4428_v25 = vrot.slane %v4426_v12, 4 }
 0x10f   : > { %v4429_v52 = vrot.slane %v7669_v24, 5  ;;  %v2227_v7 = vshll.u32 %v5299_v1, 16  ;;  %v2237_v19 = vshrl.u32 %v6592_v5, 16  ;;  %v8143_v24 = vsel %vm7117_vm7, %v5594_v50, %v4419_v33 }
 0x110   : > { %5932 = vmatmul.mubr.msk.bf16.gmra.mrb[0].mxu1 %vm730_vm3, %v6549_v27  ;;  %v4422_v27 = vrot.slane %v7627_v49, 5  ;;  %v6552_v49 = vld [vmem:[%s6806_s17 + $0x84] sm:$0xff]   ;;  %v2205_v3 = vrot.slane %v2203_v21, 5  ;;  %v2174_v33 = vsel %vm6830_vm4, %v2169_v18, %v2173_v51  ;;  %v8163_v50 = vsel %vm7117_vm7, %v5595_v63, %v4426_v12 }
 0x111   : > { %5935 = vmatprep.mubr.msk.bf16.mxu1 %vm730_vm3, %v6550_v37  ;;  %v2159_v37 = vrot.slane %v2158_v53, 4  ;;  %v2224_v53 = vshrl.u32 %v5299_v1, 16  ;;  %v2229_v21 = vrot.slane %v2227_v7, 5  ;;  %v2239_v51 = vrot.slane %v2237_v19, 4  ;;  %v8766_v19 = vld [vmem:[#allocation6_spill] sm:$0xff] }
 0x112   : > { %v8152_v5 = vsel %vm7117_vm7, %v4421_v41, %v4422_v27  ;;  %v6593_v41 = vld [vmem:[%s6806_s17 + $0x44] sm:$0x1]  ;;  %v8761_v12 = vsel %vm6830_vm4, %v8051_v60, %v8039_v55  ;;  %v8763_v7 = vsel %vm6830_vm4, %v8056_v28, %v8058_v13  ;;  %v8765_v55 = vsel %vm6830_vm4, %v8061_v59, %v8031_v39  ;;  %v6553_v13 = vld [vmem:[%s6806_s17 + $0x90] sm:$0xff]  }
 0x113   : > { %v2164_v1 = vsel %vm6830_vm4, %v2159_v37, %v8069_v48  ;;  %v8167_v48 = vsel %vm7117_vm7, %v4428_v25, %v4429_v52  ;;  %v2219_v27 = vshll.u32 %v6593_v41, 16  ;;  %v8171_v37 = vrot.slane %v2233_v45, 5  ;;  %v6554_v52 = vld [vmem:[%s6806_s17 + $0x9c] sm:$0xff]   ;;  %v6596_v39 = vld [vmem:[%s6806_s17 + $0x64] sm:$0xf] }
 0x114   : > { %6072 = vmatmul.mubr.msk.bf16.gmra.mrb[28].mxu0 %vm730_vm3, %v8010_v14  ;;  %v8139_v14 = vsel %vm7117_vm7, %v4414_v62, %v4415_v36  ;;  %v2215_v36 = vrot.slane %v2213_v2, 4  ;;  %v8762_v25 = vsel %vm6830_vm4, %v8049_v61, %v7990_v57  ;;  %v8764_v45 = vsel %vm6830_vm4, %v8054_v8, %v7994_v15  ;;  %v5580_v15 = vld [vmem:[%s6806_s17 + $0x48] sm:$0xe]  ;;  %v5302_v8 = vld [vmem:[%s6806_s17 + $0x54] sm:$0xf] }
 0x115   : > { %6075 = vmatprep.mubr.msk.bf16.mxu0 %vm730_vm3, %v8012_v23  ;;  %v8132_v31 = vpop.f32.mrb[4].mxu0  ;;  %v2202_v23 = vrot.slane %v2200_v58, 4  ;;  %v2226_v58 = vrot.slane %v2224_v53, 4  ;;  %v5558_v2 = vcombine.low %v8764_v45, %v8763_v7  ;;  %v8198_v57 = vcombine.low %v8765_v55, %v4044_v56  ;;  %v6594_v56 = vld [vmem:[%s6806_s17 + $0x50] sm:$0x1] }
 0x116   : > { %v8135_v16 = vpop.f32.mrb[5].mxu0  ;;  %v8210_v18 = vcombine.low %v2164_v1, %v2174_v33  ;;  %v2243_v63 = vshll.u32 %v6594_v56, 16  ;;  %v5581_v33 = vld [vmem:[%s6806_s17 + $0x54] sm:$0xe]  ;;  %v2248_v41 = vshrl.u32 %v5302_v8, 16  ;;  %v8767_v7 = vld [vmem:[#allocation7_spill] sm:$0xff] }
 0x117   : > { %8760 = vst [vmem:[#allocation22_spill] sm:$0xff] %v8135_v16  ;;  %v8145_v42 = vpop.f32.mrb[6].mxu0  ;;  %v8154_v16 = vrot.slane %v2209_v47, 5  ;;  %v5557_v47 = vcombine.low %v8762_v25, %v8761_v12  ;;  %v2230_v53 = vor.u32 %v2229_v21, %v2226_v58  ;;  %v2251_v12 = vshll.u32 %v5302_v8, 16  ;;  %v6595_v55 = vld [vmem:[%s6806_s17 + $0x58] sm:$0xf] }
 0x118   : > { %5936 = vmatmul.mubr.msk.bf16.gmra.mrb[4].mxu1 %vm730_vm3, %v6551_v46  ;;  %v8157_v62 = vpop.f32.mrb[7].mxu0  ;;  %v2206_v46 = vor.u32 %v2205_v3, %v2202_v23  ;;  %v4433_v23 = vrot.slane %v8766_v19, 5  ;;  %v5305_v3 = vld [vmem:[%s6806_s17 + $0x60] sm:$0xf]  ;;  %v4440_v45 = vrot.slane %v8767_v7, 5  ;;  %v2257_v56 = vshll.u32 %v6595_v55, 16 }
 0x119   : > { %5939 = vmatprep.mubr.msk.bf16.mxu1 %vm730_vm3, %v6552_v49  ;;  %v2216_v28 = vor.u32 %v2215_v36, %v8154_v16  ;;  %v2221_v49 = vrot.slane %v2219_v27, 5  ;;  %v5596_v36 = vrot.slane %v5580_v15, 9  ;;  %v2245_v27 = vrot.slane %v2243_v63, 5  ;;  %v8768_v58 = vld [vmem:[#allocation9_spill] sm:$0xff] }
 0x11a   : > { %v2207_v1 = vrot.slane %v2206_v46, 4  ;;  %v4436_v21 = vrot.slane %v8768_v58, 5  ;;  %v2275_v19 = vshll.u32 %v5305_v3, 16  ;;  %v2231_v46 = vrot.slane %v2230_v53, 4 }
 0x11b   : > { %v2217_v25 = vrot.slane %v2216_v28, 4  ;;  %v4435_v8 = vrot.slane %v4433_v23, 4  ;;  %v5597_v28 = vrot.slane %v5581_v33, 9  ;;  %v2250_v59 = vrot.slane %v2248_v41, 4  ;;  %v6556_v41 = vld [vmem:[%s6806_s17 + $0xb4] sm:$0xff]  }
 0x11c   : > { %6076 = vmatmul.mubr.msk.bf16.gmra.mrb[32].mxu0 %vm730_vm3, %v8014_v32  ;;  %v2240_v32 = vor.u32 %v2239_v51, %v8171_v37  ;;  %v2272_v51 = vshrl.u32 %v5305_v3, 16  ;;  %v2253_v7 = vrot.slane %v2251_v12, 5  ;;  %v2281_v60 = vshll.u32 %v6596_v39, 16 }
 0x11d   : > { %6079 = vmatprep.mubr.msk.bf16.mxu0 %vm730_vm3, %v8047_v34  ;;  %v2261_v34 = vshrl.u32 %v6595_v55, 16  ;;  %v2285_v55 = vshrl.u32 %v6596_v39, 16  ;;  %v4442_v61 = vrot.slane %v4440_v45, 4  ;;  %v8231_v58 = vrot.slane %v2257_v56, 5 }
 0x11e   : > { %v2241_v15 = vrot.slane %v2240_v32, 4  ;;  %v2212_v53 = vsel %vm6830_vm4, %v2207_v1, %v8154_v16  ;;  %v8240_v32 = vsel %vm7117_vm7, %v5596_v36, %v4433_v23  ;;  %v2274_v33 = vrot.slane %v2272_v51, 4  ;;  %v5308_v1 = vld [vmem:[%s6806_s17 + $0x6c] sm:$0xf] }
 0x11f   : > { %v2263_v3 = vrot.slane %v2261_v34, 4  ;;  %v2277_v39 = vrot.slane %v2275_v19, 5  ;;  %v2222_v12 = vsel %vm6830_vm4, %v2217_v25, %v2221_v49  ;;  %v8251_v16 = vsel %vm7117_vm7, %v4435_v8, %v4436_v21  ;;  %v6597_v21 = vld [vmem:[%s6806_s17 + $0x5c] sm:$0x1]  ;;  %v6598_v19 = vld [vmem:[%s6806_s17 + $0x68] sm:$0x1] }
 0x120   : > { %5940 = vmatmul.mubr.msk.bf16.gmra.mrb[8].mxu1 %vm730_vm3, %v6553_v13  ;;  %v8769_v13 = vld [vmem:[#allocation11_spill] sm:$0xff]  ;;  %v8255_v23 = vsel %vm7117_vm7, %v5597_v28, %v4440_v45  ;;  %v2254_v49 = vor.u32 %v2253_v7, %v2250_v59  ;;  %v8262_v25 = vrot.slane %v2281_v60, 5  ;;  %v2287_v56 = vrot.slane %v2285_v55, 4 }
 0x121   : > { %5943 = vmatprep.mubr.msk.bf16.mxu1 %vm730_vm3, %v6554_v52  ;;  %v4443_v63 = vrot.slane %v8769_v13, 5  ;;  %v6555_v52 = vld [vmem:[%s6806_s17 + $0xa8] sm:$0xff]   ;;  %v2264_v45 = vor.u32 %v2263_v3, %v8231_v58  ;;  %v2267_v51 = vshll.u32 %v6597_v21, 16  ;;  %v8276_v60 = vcombine.low %v2212_v53, %v2222_v12  ;;  %v6599_v13 = vld [vmem:[%s6806_s17 + $0x70] sm:$0xf] }
 0x122   : > { %v2278_v59 = vor.u32 %v2277_v39, %v2274_v33  ;;  %v2296_v8 = vshrl.u32 %v5308_v1, 16  ;;  %v2309_v3 = vshrl.u32 %v6599_v13, 16  ;;  %v2255_v53 = vrot.slane %v2254_v49, 4  ;;  %v8772_v39 = vld [vmem:[#allocation8_spill] sm:$0xff] }
 0x123   : > { %v8268_v34 = vsel %vm7117_vm7, %v4442_v61, %v4443_v63  ;;  %v2299_v61 = vshll.u32 %v5308_v1, 16  ;;  %v2305_v63 = vshll.u32 %v6599_v13, 16  ;;  %v2288_v33 = vor.u32 %v2287_v56, %v8262_v25  ;;  %v6557_v1 = vld [vmem:[%s6806_s17 + $0xc0] sm:$0xff]   ;;  %v5583_v13 = vld [vmem:[%s6806_s17 + $0x6c] sm:$0xe] }
 0x124   : > { %6080 = vmatmul.mubr.msk.bf16.gmra.mrb[36].mxu0 %vm730_vm3, %v5557_v47  ;;  %v2236_v47 = vsel %vm6830_vm4, %v2231_v46, %v8171_v37  ;;  %v2291_v46 = vshll.u32 %v6598_v19, 16  ;;  %v4447_v12 = vrot.slane %v8772_v39, 5  ;;  %v2265_v21 = vrot.slane %v2264_v45, 4 }
 0x125   : > { %6083 = vmatprep.mubr.msk.bf16.mxu0 %vm730_vm3, %v5558_v2  ;;  %v2246_v2 = vsel %vm6830_vm4, %v2241_v15, %v2245_v27  ;;  %v5582_v15 = vld [vmem:[%s6806_s17 + $0x60] sm:$0xe]  ;;  %v2279_v55 = vrot.slane %v2278_v59, 4  ;;  %v2301_v49 = vrot.slane %v2299_v61, 5  ;;  %v8774_v56 = vcombine.low %v8099_v44, %v8107_v38  ;;  %v6600_v61 = vld [vmem:[%s6806_s17 + $0x7c] sm:$0xf] }
 0x126   : > { %v8258_v36 = vpop.f32.mrb[8].mxu0  ;;  %v8282_v7 = vcombine.low %v2236_v47, %v2246_v2  ;;  %v2269_v47 = vrot.slane %v2267_v51, 5  ;;  %v2293_v2 = vrot.slane %v2291_v46, 5  ;;  %v5598_v19 = vrot.slane %v5582_v15, 9 }
 0x127   : > { %v8264_v37 = vpop.f32.mrb[9].mxu0  ;;  %v8301_v39 = vrot.slane %v2305_v63, 5  ;;  %v2311_v45 = vrot.slane %v2309_v3, 4  ;;  %v2289_v59 = vrot.slane %v2288_v33, 4  ;;  %v4449_v15 = vrot.slane %v4447_v12, 4 }
 0x128   : > { %5944 = vmatmul.mubr.msk.bf16.gmra.mrb[12].mxu1 %vm730_vm3, %v6555_v52  ;;  %v8274_v27 = vpop.f32.mrb[10].mxu0  ;;  %v2298_v52 = vrot.slane %v2296_v8, 4  ;;  %v4450_v8 = vrot.slane %v7758_v4, 5  ;;  %v2270_v38 = vsel %vm6830_vm4, %v2265_v21, %v2269_v47  ;;  %v5599_v44 = vrot.slane %v5583_v13, 9 }
 0x129   : > { %8770 = vst [vmem:[#allocation6_spill] sm:$0xff] %v8274_v27  ;;  %5947 = vmatprep.mubr.msk.bf16.mxu1 %vm730_vm3, %v6556_v41  ;;  %v8280_v28 = vpop.f32.mrb[11].mxu0  ;;  %v5311_v41 = vld [vmem:[%s6806_s17 + $0x78] sm:$0xf]  ;;  %v2333_v63 = vshrl.u32 %v6600_v61, 16  ;;  %v8313_v3 = vsel %vm7117_vm7, %v5598_v19, %v4447_v12  ;;  %v2284_v4 = vsel %vm6830_vm4, %v2279_v55, %v8262_v25  ;;  %v2312_v21 = vor.u32 %v2311_v45, %v8301_v39 }
 0x12a   : > { %8771 = vst [vmem:[#allocation7_spill] sm:$0xff] %v8280_v28  ;;  %v8773_v28 = vld [vmem:[#allocation10_spill] sm:$0xff]  ;;  %v2320_v51 = vshrl.u32 %v5311_v41, 16  ;;  %v2323_v46 = vshll.u32 %v5311_v41, 16  ;;  %v2294_v12 = vsel %vm6830_vm4, %v2289_v59, %v2293_v2  ;;  %v4457_v19 = vrot.slane %v7764_v35, 5 }
 0x12b   : > { %v4454_v27 = vrot.slane %v8773_v28, 5  ;;  %v2329_v28 = vshll.u32 %v6600_v61, 16  ;;  %v2335_v25 = vrot.slane %v2333_v63, 4  ;;  %v2313_v61 = vrot.slane %v2312_v21, 4 }
 0x12c   : > { %6084 = vmatmul.mubr.msk.bf16.gmra.mrb[40].mxu0 %vm730_vm3, %v8198_v57  ;;  %v2260_v57 = vsel %vm6830_vm4, %v2255_v53, %v8231_v58  ;;  %v2302_v58 = vor.u32 %v2301_v49, %v2298_v52  ;;  %v6601_v53 = vld [vmem:[%s6806_s17 + $0x74] sm:$0x1]  ;;  %v2322_v47 = vrot.slane %v2320_v51, 4  ;;  %v8327_v52 = vsel %vm7117_vm7, %v4449_v15, %v4450_v8  ;;  %v5584_v15 = vld [vmem:[%s6806_s17 + $0x78] sm:$0xe] }
 0x12d   : > { %6089 = vmatprep.mubr.msk.bf16.mxu0 %vm730_vm3, %v8774_v56  ;;  %v4456_v41 = vrot.slane %v4454_v27, 4  ;;  %v2315_v33 = vshll.u32 %v6601_v53, 16  ;;  %v5314_v56 = vld [vmem:[%s6806_s17 + $0x84] sm:$0xf]  ;;  %v8331_v49 = vrot.slane %v2329_v28, 5  ;;  %v8775_v51 = vcombine.low %v8119_v10, %v8139_v14 }
 0x12e   : > { %v2344_v55 = vshrl.u32 %v5314_v56, 16  ;;  %v2347_v45 = vshll.u32 %v5314_v56, 16  ;;  %v8337_v2 = vcombine.low %v2260_v57, %v2270_v38  ;;  %v2303_v35 = vrot.slane %v2302_v58, 4  ;;  %v5585_v10 = vld [vmem:[%s6806_s17 + $0x84] sm:$0xe] }
 0x12f   : > { %v2317_v59 = vrot.slane %v2315_v33, 5  ;;  %v8776_v8 = vcombine.low %v8143_v24, %v8152_v5  ;;  %v6603_v14 = vld [vmem:[%s6806_s17 + $0x88] sm:$0xf]  ;;  %v8350_v38 = vcombine.low %v2284_v4, %v2294_v12  ;;  %v4461_v24 = vrot.slane %v7774_v9, 5  ;;  %v5317_v56 = vld [vmem:[%s6806_s17 + $0x90] sm:$0xf] }
 0x130   : > { %5948 = vmatmul.mubr.msk.bf16.gmra.mrb[16].mxu1 %vm730_vm3, %v6557_v1  ;;  %v2325_v1 = vrot.slane %v2323_v46, 5  ;;  %v8341_v46 = vsel %vm7117_vm7, %v5599_v44, %v4454_v27  ;;  %v2353_v63 = vshll.u32 %v6603_v14, 16  ;;  %v2357_v57 = vshrl.u32 %v6603_v14, 16  ;;  %v5320_v14 = vld [vmem:[%s6806_s17 + $0x9c] sm:$0xf] }
 0x131   : > { %5957 = vmatprep.mubr.msk.bf16.mxu1 %vm730_vm3, %v8210_v18  ;;  %v6602_v18 = vld [vmem:[%s6806_s17 + $0x80] sm:$0x1]  ;;  %v5615_v27 = vcombine.low %v8313_v3, %v8327_v52  ;;  %v8356_v44 = vsel %vm7117_vm7, %v4456_v41, %v4457_v19  ;;  %v2336_v5 = vor.u32 %v2335_v25, %v8331_v49  ;;  %v2346_v53 = vrot.slane %v2344_v55, 4  ;;  %v6608_v3 = vld [vmem:[%s6806_s17 + $0xa4] sm:$0x1] }
 0x132   : > { %v2339_v13 = vshll.u32 %v6602_v18, 16  ;;  %v2326_v28 = vor.u32 %v2325_v1, %v2322_v47  ;;  %v2349_v33 = vrot.slane %v2347_v45, 5  ;;  %v2308_v4 = vsel %vm6830_vm4, %v2303_v35, %v8301_v39 }
 0x133   : > { %v5600_v21 = vrot.slane %v5584_v15, 9  ;;  %v5601_v47 = vrot.slane %v5585_v10, 9  ;;  %v4468_v41 = vrot.slane %v7807_v11, 5  ;;  %v2318_v9 = vsel %vm6830_vm4, %v2313_v61, %v2317_v59  ;;  %v6604_v11 = vld [vmem:[%s6806_s17 + $0x94] sm:$0xf] }
 0x134   : > { %6090 = vmatmul.mubr.msk.bf16.vlgmr.msra.gmra.mrb[12].mxu0 %vm730_vm3, %v8775_v51  ;;  %v2341_v58 = vrot.slane %v2339_v13, 5  ;;  %v2327_v1 = vrot.slane %v2326_v28, 4  ;;  %v8371_v12 = vrot.slane %v2353_v63, 5  ;;  %v2359_v19 = vrot.slane %v2357_v57, 4  ;;  %v6605_v28 = vld [vmem:[%s6806_s17 + $0x8c] sm:$0x1] }
 0x135   : > { %6093 = vmatprep.mubr.msk.bf16.mxu0 %vm730_vm3, %v8776_v8  ;;  %v4464_v18 = vrot.slane %v7810_v43, 5  ;;  %v2368_v13 = vshrl.u32 %v5317_v56, 16  ;;  %v2371_v39 = vshll.u32 %v5317_v56, 16  ;;  %v2337_v25 = vrot.slane %v2336_v5, 4 }
 0x136   : > { %v2350_v55 = vor.u32 %v2349_v33, %v2346_v53  ;;  %v2377_v45 = vshll.u32 %v6604_v11, 16  ;;  %v2381_v51 = vshrl.u32 %v6604_v11, 16  ;;  %v5616_v35 = vcombine.low %v8341_v46, %v8356_v44  ;;  %v5586_v33 = vld [vmem:[%s6806_s17 + $0x90] sm:$0xe] }
 0x137   : > { %v8381_v59 = vcombine.low %v2308_v4, %v2318_v9  ;;  %v8385_v43 = vsel %vm7117_vm7, %v5600_v21, %v4461_v24  ;;  %v8389_v15 = vsel %vm7117_vm7, %v5601_v47, %v4468_v41  ;;  %v8778_v8 = vcombine.low %v8240_v32, %v8251_v16  ;;  %v6606_v21 = vld [vmem:[%s6806_s17 + $0xa0] sm:$0xf] }
 0x138   : > { %5958 = vmatmul.mubr.msk.bf16.vlgmr.msra.gmra.mrb[24].mxu1 %vm730_vm3, %v7961_v22  ;;  %v4463_v22 = vrot.slane %v4461_v24, 4  ;;  %v2360_v61 = vor.u32 %v2359_v19, %v8371_v12  ;;  %v2363_v10 = vshll.u32 %v6605_v28, 16  ;;  %v4471_v32 = vrot.slane %v7858_v0, 5 }
 0x139   : > { %5961 = vmatprep.mubr.msk.bf16.mxu1 %vm730_vm3, %v8276_v60  ;;  %v8777_v60 = vcombine.low %v8163_v50, %v8167_v48  ;;  %v2332_v50 = vsel %vm6830_vm4, %v2327_v1, %v8331_v49  ;;  %v4470_v48 = vrot.slane %v4468_v41, 4  ;;  %v2370_v16 = vrot.slane %v2368_v13, 4 }
 0x13a   : > { %v8403_v63 = vsel %vm7117_vm7, %v4463_v22, %v4464_v18  ;;  %v2373_v57 = vrot.slane %v2371_v39, 5  ;;  %v2342_v24 = vsel %vm6830_vm4, %v2337_v25, %v2341_v58  ;;  %v2351_v5 = vrot.slane %v2350_v55, 4  ;;  %v6607_v22 = vld [vmem:[%s6806_s17 + $0x98] sm:$0x1]  ;;  %v5587_v39 = vld [vmem:[%s6806_s17 + $0x9c] sm:$0xe] }
 0x13b   : > { %v8408_v49 = vrot.slane %v2377_v45, 5  ;;  %v2383_v53 = vrot.slane %v2381_v51, 4  ;;  %v2392_v56 = vshrl.u32 %v5320_v14, 16  ;;  %v2395_v4 = vshll.u32 %v5320_v14, 16  ;;  %v6609_v14 = vld [vmem:[%s6806_s17 + $0xac] sm:$0xf] }
 0x13c   : > { %6094 = vmatmul.mubr.msk.bf16.gmra.mrb[16].mxu0 %vm730_vm3, %v8777_v60  ;;  %v2401_v47 = vshll.u32 %v6606_v21, 16  ;;  %v2405_v0 = vshrl.u32 %v6606_v21, 16  ;;  %v5617_v58 = vcombine.low %v8385_v43, %v8403_v63  ;;  %v2361_v41 = vrot.slane %v2360_v61, 4  ;;  %v6610_v21 = vld [vmem:[%s6806_s17 + $0xb8] sm:$0xf] }
 0x13d   : > { %6097 = vmatprep.mubr.msk.bf16.mxu0 %vm730_vm3, %v8778_v8  ;;  %v2365_v9 = vrot.slane %v2363_v10, 5  ;;  %v4475_v1 = vrot.slane %v7836_v54, 5  ;;  %v8419_v19 = vcombine.low %v2332_v50, %v2342_v24  ;;  %v2387_v18 = vshll.u32 %v6607_v22, 16  ;;  %v5323_v8 = vld [vmem:[%s6806_s17 + $0xa8] sm:$0xf] }
 0x13e   : > { %v5602_v13 = vrot.slane %v5586_v33, 9  ;;  %v8425_v25 = vsel %vm7117_vm7, %v4470_v48, %v4471_v32  ;;  %v2384_v55 = vor.u32 %v2383_v53, %v8408_v49  ;;  %v4478_v54 = vrot.slane %v7889_v26, 5  ;;  %v5326_v32 = vld [vmem:[%s6806_s17 + $0xb4] sm:$0xf] }
 0x13f   : > { %v8779_v11 = vcombine.low %v8255_v23, %v8268_v34  ;;  %v2394_v45 = vrot.slane %v2392_v56, 4  ;;  %v2397_v51 = vrot.slane %v2395_v4, 5  ;;  %v8436_v60 = vrot.slane %v2401_v47, 5 }
 0x140   : > { %5962 = vmatmul.mubr.msk.bf16.gmra.mrb[28].mxu1 %vm730_vm3, %v8282_v7  ;;  %v2374_v7 = vor.u32 %v2373_v57, %v2370_v16  ;;  %v2407_v43 = vrot.slane %v2405_v0, 4  ;;  %v2366_v26 = vsel %vm6830_vm4, %v2361_v41, %v2365_v9  ;;  %v4477_v23 = vrot.slane %v4475_v1, 4 }
 0x141   : > { %5965 = vmatprep.mubr.msk.bf16.mxu1 %vm730_vm3, %v8337_v2  ;;  %v2356_v2 = vsel %vm6830_vm4, %v2351_v5, %v8371_v12  ;;  %v5603_v34 = vrot.slane %v5587_v39, 9  ;;  %v4482_v12 = vrot.slane %v7853_v40, 5  ;;  %v5618_v50 = vcombine.low %v8389_v15, %v8425_v25 }
 0x142   : > { %v2375_v48 = vrot.slane %v2374_v7, 4  ;;  %v2389_v61 = vrot.slane %v2387_v18, 5  ;;  %v8450_v28 = vsel %vm7117_vm7, %v5602_v13, %v4475_v1  ;;  %v2411_v52 = vshll.u32 %v6608_v3, 16  ;;  %v5588_v13 = vld [vmem:[%s6806_s17 + $0xa8] sm:$0xe] }
 0x143   : > { %v2416_v10 = vshrl.u32 %v5323_v8, 16  ;;  %v2425_v63 = vshll.u32 %v6609_v14, 16  ;;  %v5343_v40 = vcombine.low %v2356_v2, %v2366_v26  ;;  %v2398_v16 = vor.u32 %v2397_v51, %v2394_v45 }
 0x144   : > { %6098 = vmatmul.mubr.msk.bf16.gmra.mrb[20].mxu0 %vm730_vm3, %v8779_v11  ;;  %v2408_v57 = vor.u32 %v2407_v43, %v8436_v60  ;;  %v2429_v24 = vshrl.u32 %v6609_v14, 16  ;;  %v2385_v5 = vrot.slane %v2384_v55, 4  ;;  %v4479_v53 = vsel %vm7117_vm7, %v4477_v23, %v4478_v54 }
 0x145   : > { %6101 = vmatprep.mubr.msk.bf16.mxu0 %vm730_vm3, %v5615_v27  ;;  %v2419_v27 = vshll.u32 %v5323_v8, 16  ;;  %v8464_v33 = vsel %vm7117_vm7, %v5603_v34, %v4482_v12  ;;  %v4484_v56 = vrot.slane %v4482_v12, 4  ;;  %v2440_v4 = vshrl.u32 %v5326_v32, 16 }
 0x146   : > { %v2449_v47 = vshll.u32 %v6610_v21, 16  ;;  %v2453_v0 = vshrl.u32 %v6610_v21, 16  ;;  %v2413_v41 = vrot.slane %v2411_v52, 5  ;;  %v2418_v9 = vrot.slane %v2416_v10, 4  ;;  %v6613_v10 = vld [vmem:[%s6806_s17 + $0xbc] sm:$0x1] }
 0x147   : > { %v2421_v1 = vrot.slane %v2419_v27, 5  ;;  %v8467_v7 = vrot.slane %v2425_v63, 5  ;;  %v2409_v22 = vrot.slane %v2408_v57, 4  ;;  %v2431_v18 = vrot.slane %v2429_v24, 4 }
 0x148   : > { %5966 = vmatmul.mubr.msk.bf16.gmra.mrb[0].mxu1 %vm730_vm3, %v8350_v38  ;;  %v2443_v38 = vshll.u32 %v5326_v32, 16  ;;  %v4489_v39 = vrot.slane %v7886_v17, 5  ;;  %v2380_v2 = vsel %vm6830_vm4, %v2375_v48, %v8408_v49  ;;  %v2390_v55 = vsel %vm6830_vm4, %v2385_v5, %v2389_v61  ;;  %v5329_v17 = vld [vmem:[%s6806_s17 + $0xc0] sm:$0xf]  ;;  %v6612_v61 = vld [vmem:[%s6806_s17 + $0xc4] sm:$0xf] }
 0x149   : > { %5969 = vmatprep.mubr.msk.bf16.mxu1 %vm730_vm3, %v8381_v59  ;;  %v2399_v59 = vrot.slane %v2398_v16, 4  ;;  %v5619_v46 = vcombine.low %v8450_v28, %v4479_v53  ;;  %v4485_v44 = vrot.slane %v7901_v6, 5  ;;  %v8483_v11 = vrot.slane %v2449_v47, 5  ;;  %v8780_v32 = vld [vmem:[#allocation12_spill] sm:$0xff] }
 0x14a   : > { %v2445_v54 = vrot.slane %v2443_v38, 5  ;;  %v2455_v45 = vrot.slane %v2453_v0, 4  ;;  %v2422_v51 = vor.u32 %v2421_v1, %v2418_v9  ;;  %v5604_v8 = vrot.slane %v5588_v13, 9  ;;  %v5589_v53 = vld [vmem:[%s6806_s17 + $0xb4] sm:$0xe]  ;;  %v8781_v0 = vld [vmem:[#allocation13_spill] sm:$0xff] }
 0x14b   : > { %v4492_v49 = vrot.slane %v7926_v20, 5  ;;  %v2404_v6 = vsel %vm6830_vm4, %v2399_v59, %v8436_v60  ;;  %v2414_v26 = vsel %vm6830_vm4, %v2409_v22, %v2413_v41  ;;  %v2432_v23 = vor.u32 %v2431_v18, %v8467_v7 }
 0x14c   : > { %6102 = vmatmul.mubr.msk.bf16.gmra.mrb[24].mxu0 %vm730_vm3, %v5616_v35  ;;  %v2442_v35 = vrot.slane %v2440_v4, 4  ;;  %v4491_v34 = vrot.slane %v4489_v39, 4  ;;  %v2464_v12 = vshrl.u32 %v5329_v17, 16  ;;  %v2467_v48 = vshll.u32 %v5329_v17, 16  ;;  %v8783_v17 = vld [vmem:[#allocation17_spill] sm:$0xff] }
 0x14d   : > { %6105 = vmatprep.mubr.msk.bf16.mxu0 %vm730_vm3, %v5617_v58  ;;  %v6611_v58 = vld [vmem:[%s6806_s17 + $0xb0] sm:$0x1]  ;;  %v2473_v28 = vshll.u32 %v6612_v61, 16  ;;  %v2477_v20 = vshrl.u32 %v6612_v61, 16  ;;  %v5344_v3 = vcombine.low %v2380_v2, %v2390_v55  ;;  %v2456_v52 = vor.u32 %v2455_v45, %v8483_v11 }
 0x14e   : > { %v2435_v43 = vshll.u32 %v6611_v58, 16  ;;  %v2459_v60 = vshll.u32 %v6613_v10, 16  ;;  %v4486_v27 = vsel %vm7117_vm7, %v4484_v56, %v4485_v44  ;;  %v2423_v14 = vrot.slane %v2422_v51, 4  ;;  %v6614_v44 = vld [vmem:[%s6806_s17 + $0xc8] sm:$0x1] }
 0x14f   : > { %v5345_v16 = vcombine.low %v2404_v6, %v2414_v26  ;;  %v2433_v57 = vrot.slane %v2432_v23, 4  ;;  %v4490_v24 = vsel %vm7117_vm7, %v5604_v8, %v4489_v39  ;;  %v4493_v5 = vsel %vm7117_vm7, %v4491_v34, %v4492_v49  ;;  %v8782_v39 = vld [vmem:[#allocation15_spill] sm:$0xff]  ;;  %v8784_v49 = vld [vmem:[#allocation14_spill] sm:$0xff] }
 0x150   : > { %5970 = vmatmul.mubr.msk.bf16.gmra.mrb[4].mxu1 %vm730_vm3, %v8419_v19  ;;  %v2446_v19 = vor.u32 %v2445_v54, %v2442_v35  ;;  %v2437_v63 = vrot.slane %v2435_v43, 5  ;;  %v2466_v56 = vrot.slane %v2464_v12, 4  ;;  %v2469_v4 = vrot.slane %v2467_v48, 5  ;;  %v5591_v12 = vld [vmem:[%s6806_s17 + $0xcc] sm:$0xe] }
 0x151   : > { %5973 = vmatprep.mubr.msk.bf16.mxu1 %vm730_vm3, %v5343_v40  ;;  %v4496_v40 = vrot.slane %v8780_v32, 5  ;;  %v2475_v38 = vrot.slane %v2473_v28, 5  ;;  %v2479_v21 = vrot.slane %v2477_v20, 4  ;;  %v2457_v15 = vrot.slane %v2456_v52, 4 }
 0x152   : > { %v2447_v47 = vrot.slane %v2446_v19, 4  ;;  %v2461_v25 = vrot.slane %v2459_v60, 5  ;;  %v4503_v41 = vrot.slane %v8781_v0, 5  ;;  %v5620_v9 = vcombine.low %v8464_v33, %v4486_v27  ;;  %v8785_v60 = vld [vmem:[#allocation20_spill] sm:$0xff] }
 0x153   : > { %v5605_v1 = vrot.slane %v5589_v53, 9  ;;  %v4498_v59 = vrot.slane %v4496_v40, 4  ;;  %v2428_v22 = vsel %vm6830_vm4, %v2423_v14, %v8467_v7  ;;  %v2438_v18 = vsel %vm6830_vm4, %v2433_v57, %v2437_v63 }
 0x154   : > { %6106 = vmatmul.mubr.msk.bf16.gmra.mrb[28].mxu0 %vm730_vm3, %v5618_v50  ;;  %v5590_v50 = vld [vmem:[%s6806_s17 + $0xc0] sm:$0xe]  ;;  %v5621_v13 = vcombine.low %v4490_v24, %v4493_v5  ;;  %v4499_v2 = vrot.slane %v8782_v39, 5  ;;  %v2470_v55 = vor.u32 %v2469_v4, %v2466_v56  ;;  %v2483_v33 = vshll.u32 %v6614_v44, 16  ;;  %v4928_v5 = vld [vmem:[%s8713_s3 + $0x18] sm:$0xff]  ;;  %v4930_v4 = vld [vmem:[%s8713_s3 + $0x28] sm:$0xff] }
 0x155   : > { %6109 = vmatprep.mubr.msk.bf16.mxu0 %vm730_vm3, %v5619_v46  ;;  %v2480_v46 = vor.u32 %v2479_v21, %v2475_v38  ;;  %v5606_v35 = vrot.slane %v5590_v50, 9  ;;  %v2452_v54 = vsel %vm6830_vm4, %v2447_v47, %v8483_v11  ;;  %v2462_v7 = vsel %vm6830_vm4, %v2457_v15, %v2461_v25  ;;  %v4929_v56 = vld [vmem:[%s8713_s3 + $0x20] sm:$0xff]  ;;  %v4931_v21 = vld [vmem:[%s8713_s3 + $0x30] sm:$0xff]  ;;  %v4932_v47 = vld [vmem:[%s8713_s3 + $0x38] sm:$0xff]  ;;  %s6619_s17 = sshll.u32 %s6698_s21, 4  ;;  %s6620_s17 = int_to_ptr.vmem [resolvable:$false] %s6619_s17 }
 0x156   : > { %v4505_v45 = vrot.slane %v4503_v41, 4  ;;  %v4506_v51 = vrot.slane %v8783_v17, 5  ;;  %v5346_v58 = vcombine.low %v2428_v22, %v2438_v18  ;;  %v4497_v43 = vsel %vm7117_vm7, %v5605_v1, %v4496_v40  ;;  %v4933_v25 = vld [vmem:[%s8713_s3 + $0x40] sm:$0xff]  ;;  %v4934_v50 = vld [vmem:[%s8713_s3 + $0x48] sm:$0xff]  ;;  %s6621_s24 = scalar_lea.vmem %s6620_s17, 32  ;;  %p6622_p1 = scmp.lt.s32.totalorder %s8665_s11, %s6620_s17 }
 0x157   : > { %v4500_v8 = vsel %vm7117_vm7, %v4498_v59, %v4499_v2  ;;  %v4510_v6 = vrot.slane %v8784_v49, 5  ;;  %v5347_v11 = vcombine.low %v2452_v54, %v2462_v7  ;;  %v2471_v26 = vrot.slane %v2470_v55, 4  ;;  %v8787_v22 = vld [vmem:[#allocation18_spill] sm:$0xff]  ;;  %v8788_v39 = vld [vmem:[#allocation19_spill] sm:$0xff]  ;;  %p6623_p2 = scmp.lt.s32.totalorder %s6621_s24, %s6615_s16 }
 0x158   : > { %5974 = vmatmul.mubr.msk.bf16.gmra.mrb[8].mxu1 %vm730_vm3, %v5344_v3  ;;  %v2481_v23 = vrot.slane %v2480_v46, 4  ;;  %v2485_v34 = vrot.slane %v2483_v33, 5  ;;  %v4504_v48 = vsel %vm7117_vm7, %v5606_v35, %v4503_v41  ;;  %v4507_v61 = vsel %vm7117_vm7, %v4505_v45, %v4506_v51  ;;  %v8789_v46 = vld [vmem:[#allocation21_spill] sm:$0xff]  ;;  %v4935_v33 = vld [vmem:[%s8713_s3 + $0x50] sm:$0xff]  ;;  %v4938_v45 = vld [vmem:[%s8713_s3 + $0x68] sm:$0xff] }
 0x159   : > { %5977 = vmatprep.mubr.msk.bf16.mxu1 %vm730_vm3, %v5345_v16  ;;  %v5622_v28 = vcombine.low %v4497_v43, %v4500_v8  ;;  %v5607_v20 = vrot.slane %v5591_v12, 9  ;;  %v4512_v3 = vrot.slane %v4510_v6, 4  ;;  %v2476_v19 = vsel %vm6830_vm4, %v2471_v26, %v2475_v38  ;;  %v4926_v16 = vld [vmem:[%s8713_s3 + $0x8] sm:$0xff]  ;;  %v4936_v35 = vld [vmem:[%s8713_s3 + $0x58] sm:$0xff]  ;;  %v4937_v7 = vld [vmem:[%s8713_s3 + $0x60] sm:$0xff]  ;;  %p6624_p3 = por %p6623_p2, %p6622_p1 }
 0x15a   : > { %v2486_v52 = vsel %vm6830_vm4, %v2481_v23, %v2485_v34  ;;  %v5623_v10 = vcombine.low %v4504_v48, %v4507_v61  ;;  %v4513_v27 = vrot.slane %v8785_v60, 5  ;;  %v6695_v57 = vmov 0.0|0.0   ;;  %v4939_v51 = vld [vmem:[%s8713_s3 + $0x70] sm:$0xff]  ;;  %v8790_v60 = vld [vmem:[#allocation22_spill] sm:$0xff] }
 0x15b   : > { %v5348_v14 = vcombine.low %v2476_v19, %v2486_v52  ;;  %v4511_v63 = vsel %vm7117_vm7, %v5607_v20, %v4510_v6  ;;  %6156 = vmatprep.subr.bf16.mxu1 %v6695_v57  ;;  %v6157_v24 = vpack.c.bf16 %v4926_v16, %v4925_v29  ;;  %v6160_v53 = vpack.c.bf16 %v4928_v5, %v4927_v30  ;;  %p6625_p5 = pnand %p6624_p3, %p6618_p0 }
 0x15c   : > { %6110 = vmatmul.mubr.msk.bf16.gmra.mrb[32].mxu0 %vm730_vm3, %v5620_v9  ;;  %v4514_v32 = vsel %vm7117_vm7, %v4512_v3, %v4513_v27  ;;  %v6163_v38 = vpack.c.bf16 %v4930_v4, %v4929_v56  ;;  %v6166_v15 = vpack.c.bf16 %v4932_v47, %v4931_v21  ;;  %v6169_v0 = vpack.c.bf16 %v4934_v50, %v4933_v25  ;;  %v8786_v9 = vld [vmem:[#allocation16_spill] sm:$0xff] }
 0x15d   : > { %6113 = vmatprep.mubr.msk.bf16.mxu0 %vm730_vm3, %v5621_v13  ;;  %v5624_v40 = vcombine.low %v4511_v63, %v4514_v32  ;;  %6158 = vmatpush3.bf16.msra.mxu1 %v6157_v24  ;;  %v6172_v54 = vpack.c.bf16 %v4936_v35, %v4935_v33  ;;  %v6175_v17 = vpack.c.bf16 %v4938_v45, %v4937_v7  ;;  %v6697_v8 = vmov 0.0   ;;  %v8792_v33 = vld [vmem:[#allocation7_spill] sm:$0xff] }
 0x15e   : > { %6159 = vmatprep.subr.bf16.mxu1 %v6695_v57 }
 0x160   : > { %5978 = vmatmul.mubr.msk.bf16.gmra.mrb[12].mxu1 %vm730_vm3, %v5346_v58  ;;  %v4940_v58 = vld [vmem:[%s8713_s3 + $0x78] sm:$0xff] }
 0x161   : > { %5981 = vmatprep.mubr.msk.bf16.mxu1 %vm730_vm3, %v5347_v11  ;;  %6161 = vmatpush3.bf16.msra.mxu1 %v6160_v53  ;;  %v6178_v43 = vpack.c.bf16 %v4940_v58, %v4939_v51  ;;  %v8613_v11 = vld [vmem:[%s8712_s2] ss:$0 sm:$0xff] }
 0x162   : > { %6162 = vmatprep.subr.bf16.mxu1 %v6695_v57 }
 0x164   : > { %6114 = vmatmul.mubr.msk.bf16.gmra.mrb[36].mxu0 %vm730_vm3, %v5622_v28 }
 0x165   : > { %6117 = vmatprep.mubr.msk.bf16.mxu0 %vm730_vm3, %v5623_v10  ;;  %6164 = vmatpush3.bf16.msra.mxu1 %v6163_v38 }
 0x166   : > { %6165 = vmatprep.subr.bf16.mxu1 %v6695_v57 }
 0x168   : > { %5982 = vmatmul.mubr.msk.bf16.gmra.mrb[16].mxu1 %vm730_vm3, %v5348_v14 }
 0x169   : > { %6167 = vmatpush3.bf16.msra.mxu1 %v6166_v15  ;;  %6153 = vmatprep.mubr.msk.f32.mxu1 %vm6696_vm8, %v6697_v8 }
 0x16a   : > { %6168 = vmatprep.subr.bf16.mxu1 %v6695_v57 }
 0x16c   : > { %6118 = vmatmul.mubr.msk.bf16.gmra.mrb[40].mxu0 %vm730_vm3, %v5624_v40 }
 0x16d   : > { %6170 = vmatpush3.bf16.msra.mxu1 %v6169_v0 }
 0x16e   : > { %6171 = vmatprep.subr.bf16.mxu1 %v6695_v57 }
 0x171   : > { %6173 = vmatpush3.bf16.msra.mxu1 %v6172_v54 }
 0x172   : > { %6174 = vmatprep.subr.bf16.mxu1 %v6695_v57 }
 0x175   : > { %6176 = vmatpush3.bf16.msra.mxu1 %v6175_v17 }
 0x176   : > { %6177 = vmatprep.subr.bf16.mxu1 %v6695_v57 }
 0x179   : > { %6179 = vmatpush3.bf16.msra.mxu1 %v6178_v43 }
 0x1cb   : > { %v5921_v41 = vpop.f32.mrb[20].mxu1 }
 0x1cc   : > { %v6184_v1 = vadd.f32 %v5921_v41, %v8786_v9  ;;  %v1896_v59 = vpop.f32.mrb[21].mxu1 }
 0x1cd   : > { %v6186_v18 = vadd.f32 %v1896_v59, %v8787_v22  ;;  %v5922_v13 = vpop.f32.mrb[22].mxu1 }
 0x1ce   : > { %v6188_v2 = vadd.f32 %v5922_v13, %v8788_v39  ;;  %v1899_v55 = vpop.f32.mrb[23].mxu1  ;;  %v8791_v13 = vld [vmem:[#allocation6_spill] sm:$0xff] }
 0x1cf   : > { %v6190_v44 = vadd.f32 %v1899_v55, %v8789_v46 }
 0x207   : > { %v6091_v49 = vpop.f32.mrb[12].mxu0 }
 0x208   : > { %v6185_v6 = vadd.f32 %v6184_v1, %v6091_v49  ;;  %v4650_v26 = vpop.f32.mrb[13].mxu0 }
 0x209   : > { %v6187_v23 = vadd.f32 %v6186_v18, %v4650_v26  ;;  %v6092_v34 = vpop.f32.mrb[14].mxu0 }
 0x20a   : > { %v6189_v12 = vadd.f32 %v6188_v2, %v6092_v34  ;;  %v4653_v48 = vpop.f32.mrb[15].mxu0  ;;  %v4818_v52 = vadd.f32 %v6185_v6, %v8613_v11 }
 0x20b   : > { %v4816_v61 = vadd.f32 %v6187_v23, %v8613_v11  ;;  %v6191_v28 = vadd.f32 %v6190_v44, %v4653_v48  ;;  %v5959_v20 = vpop.f32.mrb[24].mxu1 }
 0x20c   : > { %v6192_v3 = vadd.f32 %v5959_v20, %v8132_v31  ;;  %v2638_v19 = vpop.f32.mrb[25].mxu1  ;;  %v4819_v29 = vadd.f32 %v6189_v12, %v8613_v11  ;;  %v4850_v5 = vmax.f32 %v4818_v52, 0.0 }
 0x20d   : > { %v4817_v10 = vadd.f32 %v6191_v28, %v8613_v11  ;;  %v6194_v27 = vadd.f32 %v2638_v19, %v8790_v60  ;;  %v5960_v14 = vpop.f32.mrb[26].mxu1  ;;  %v4848_v40 = vmax.f32 %v4816_v61, 0.0 }
 0x20e   : > { %v6196_v63 = vadd.f32 %v5960_v14, %v8145_v42  ;;  %v2641_v32 = vpop.f32.mrb[27].mxu1  ;;  %v4851_v47 = vmax.f32 %v4819_v29, 0.0 }
 0x20f   : > { %v4849_v16 = vmax.f32 %v4817_v10, 0.0  ;;  %v6198_v57 = vadd.f32 %v2641_v32, %v8157_v62  ;;  %v6095_v24 = vpop.f32.mrb[16].mxu0 }
 0x210   : > { %v6193_v30 = vadd.f32 %v6192_v3, %v6095_v24  ;;  %v4666_v31 = vpop.f32.mrb[17].mxu0 }
 0x211   : > { %v4881_v53 = vadd.f32 %v4849_v16, %v4848_v40  ;;  %v6195_v56 = vadd.f32 %v6194_v27, %v4666_v31  ;;  %v6096_v4 = vpop.f32.mrb[18].mxu0 }
 0x212   : > { %v6197_v38 = vadd.f32 %v6196_v63, %v6096_v4  ;;  %v4669_v21 = vpop.f32.mrb[19].mxu0  ;;  %v4822_v0 = vadd.f32 %v6193_v30, %v8613_v11 }
 0x213   : > { %v4882_v15 = vadd.f32 %v4881_v53, %v4850_v5  ;;  %v4820_v42 = vadd.f32 %v6195_v56, %v8613_v11  ;;  %v6199_v25 = vadd.f32 %v6198_v57, %v4669_v21  ;;  %v5963_v50 = vpop.f32.mrb[28].mxu1 }
 0x214   : > { %v6200_v41 = vadd.f32 %v5963_v50, %v8258_v36  ;;  %v2654_v62 = vpop.f32.mrb[29].mxu1  ;;  %v4823_v46 = vadd.f32 %v6197_v38, %v8613_v11  ;;  %v4854_v45 = vmax.f32 %v4822_v0, 0.0 }
 0x215   : > { %v4852_v9 = vmax.f32 %v4820_v42, 0.0  ;;  %v4883_v1 = vadd.f32 %v4882_v15, %v4851_v47  ;;  %v4821_v59 = vadd.f32 %v6199_v25, %v8613_v11  ;;  %v6202_v22 = vadd.f32 %v2654_v62, %v8264_v37  ;;  %v5964_v18 = vpop.f32.mrb[30].mxu1 }
 0x216   : > { %v6204_v39 = vadd.f32 %v5964_v18, %v8791_v13  ;;  %v2657_v2 = vpop.f32.mrb[31].mxu1  ;;  %v4855_v37 = vmax.f32 %v4823_v46, 0.0 }
 0x217   : > { %v4884_v55 = vadd.f32 %v4883_v1, %v4852_v9  ;;  %v4853_v44 = vmax.f32 %v4821_v59, 0.0  ;;  %v6206_v35 = vadd.f32 %v2657_v2, %v8792_v33  ;;  %v6099_v54 = vpop.f32.mrb[20].mxu0 }
 0x218   : > { %v6201_v7 = vadd.f32 %v6200_v41, %v6099_v54  ;;  %v4682_v36 = vpop.f32.mrb[21].mxu0 }
 0x219   : > { %v4885_v17 = vadd.f32 %v4884_v55, %v4853_v44  ;;  %v6203_v51 = vadd.f32 %v6202_v22, %v4682_v36  ;;  %v6100_v58 = vpop.f32.mrb[22].mxu0 }
 0x21a   : > { %v6205_v43 = vadd.f32 %v6204_v39, %v6100_v58  ;;  %v4685_v8 = vpop.f32.mrb[23].mxu0  ;;  %v4826_v12 = vadd.f32 %v6201_v7, %v8613_v11 }
 0x21b   : > { %v4886_v49 = vadd.f32 %v4885_v17, %v4854_v45  ;;  %v4824_v6 = vadd.f32 %v6203_v51, %v8613_v11  ;;  %v6207_v26 = vadd.f32 %v6206_v35, %v4685_v8  ;;  %v5967_v23 = vpop.f32.mrb[0].mxu1 }
 0x21c   : > { %v2670_v34 = vpop.f32.mrb[1].mxu1  ;;  %v4827_v52 = vadd.f32 %v6205_v43, %v8613_v11  ;;  %v4858_v63 = vmax.f32 %v4826_v12, 0.0 }
 0x21d   : > { %v4856_v48 = vmax.f32 %v4824_v6, 0.0  ;;  %v4887_v61 = vadd.f32 %v4886_v49, %v4855_v37  ;;  %v4825_v28 = vadd.f32 %v6207_v26, %v8613_v11  ;;  %v5968_v20 = vpop.f32.mrb[2].mxu1 }
 0x21e   : > { %v2673_v3 = vpop.f32.mrb[3].mxu1  ;;  %v4859_v24 = vmax.f32 %v4827_v52, 0.0 }
 0x21f   : > { %v4888_v19 = vadd.f32 %v4887_v61, %v4856_v48  ;;  %v4857_v10 = vmax.f32 %v4825_v28, 0.0  ;;  %v6103_v60 = vpop.f32.mrb[24].mxu0 }
 0x220   : > { %v6208_v27 = vadd.f32 %v6103_v60, %v5967_v23  ;;  %v4698_v14 = vpop.f32.mrb[25].mxu0 }
 0x221   : > { %v4889_v32 = vadd.f32 %v4888_v19, %v4857_v10  ;;  %v6209_v40 = vadd.f32 %v4698_v14, %v2670_v34  ;;  %v6104_v29 = vpop.f32.mrb[26].mxu0 }
 0x222   : > { %v6210_v16 = vadd.f32 %v6104_v29, %v5968_v20  ;;  %v4701_v57 = vpop.f32.mrb[27].mxu0  ;;  %v4830_v4 = vadd.f32 %v6208_v27, %v8613_v11 }
 0x223   : > { %v4890_v30 = vadd.f32 %v4889_v32, %v4858_v63  ;;  %v4828_v31 = vadd.f32 %v6209_v40, %v8613_v11  ;;  %v6211_v5 = vadd.f32 %v4701_v57, %v2673_v3  ;;  %v5971_v53 = vpop.f32.mrb[4].mxu1 }
 0x224   : > { %v2686_v56 = vpop.f32.mrb[5].mxu1  ;;  %v4831_v50 = vadd.f32 %v6210_v16, %v8613_v11  ;;  %v4862_v1 = vmax.f32 %v4830_v4, 0.0 }
 0x225   : > { %v4860_v38 = vmax.f32 %v4828_v31, 0.0  ;;  %v4891_v21 = vadd.f32 %v4890_v30, %v4859_v24  ;;  %v4829_v47 = vadd.f32 %v6211_v5, %v8613_v11  ;;  %v5972_v15 = vpop.f32.mrb[6].mxu1 }
 0x226   : > { %v2689_v42 = vpop.f32.mrb[7].mxu1  ;;  %v4863_v2 = vmax.f32 %v4831_v50, 0.0 }
 0x227   : > { %v4892_v25 = vadd.f32 %v4891_v21, %v4860_v38  ;;  %v4861_v0 = vmax.f32 %v4829_v47, 0.0  ;;  %v6107_v41 = vpop.f32.mrb[28].mxu0 }
 0x228   : > { %v6212_v62 = vadd.f32 %v6107_v41, %v5971_v53  ;;  %v4714_v9 = vpop.f32.mrb[29].mxu0 }
 0x229   : > { %v4893_v59 = vadd.f32 %v4892_v25, %v4861_v0  ;;  %v6213_v22 = vadd.f32 %v4714_v9, %v2686_v56  ;;  %v6108_v18 = vpop.f32.mrb[30].mxu0 }
 0x22a   : > { %v6214_v13 = vadd.f32 %v6108_v18, %v5972_v15  ;;  %v4717_v39 = vpop.f32.mrb[31].mxu0  ;;  %v4834_v54 = vadd.f32 %v6212_v62, %v8613_v11 }
 0x22b   : > { %v4894_v55 = vadd.f32 %v4893_v59, %v4862_v1  ;;  %v4832_v46 = vadd.f32 %v6213_v22, %v8613_v11  ;;  %v6215_v44 = vadd.f32 %v4717_v39, %v2689_v42  ;;  %v5975_v33 = vpop.f32.mrb[8].mxu1 }
 0x22c   : > { %v2702_v35 = vpop.f32.mrb[9].mxu1  ;;  %v4835_v43 = vadd.f32 %v6214_v13, %v8613_v11  ;;  %v4866_v26 = vmax.f32 %v4834_v54, 0.0 }
 0x22d   : > { %v4864_v7 = vmax.f32 %v4832_v46, 0.0  ;;  %v4895_v36 = vadd.f32 %v4894_v55, %v4863_v2  ;;  %v4833_v45 = vadd.f32 %v6215_v44, %v8613_v11  ;;  %v5976_v17 = vpop.f32.mrb[10].mxu1 }
 0x22e   : > { %v2705_v51 = vpop.f32.mrb[11].mxu1  ;;  %v4867_v28 = vmax.f32 %v4835_v43, 0.0 }
 0x22f   : > { %v4896_v58 = vadd.f32 %v4895_v36, %v4864_v7  ;;  %v4865_v8 = vmax.f32 %v4833_v45, 0.0  ;;  %v6111_v37 = vpop.f32.mrb[32].mxu0 }
 0x230   : > { %v6216_v49 = vadd.f32 %v6111_v37, %v5975_v33  ;;  %v4730_v6 = vpop.f32.mrb[33].mxu0 }
 0x231   : > { %v4897_v23 = vadd.f32 %v4896_v58, %v4865_v8  ;;  %v6217_v34 = vadd.f32 %v4730_v6, %v2702_v35  ;;  %v6112_v12 = vpop.f32.mrb[34].mxu0 }
 0x232   : > { %v6218_v48 = vadd.f32 %v6112_v12, %v5976_v17  ;;  %v4733_v61 = vpop.f32.mrb[35].mxu0  ;;  %v4838_v60 = vadd.f32 %v6216_v49, %v8613_v11 }
 0x233   : > { %v4898_v20 = vadd.f32 %v4897_v23, %v4866_v26  ;;  %v4836_v3 = vadd.f32 %v6217_v34, %v8613_v11  ;;  %v6219_v19 = vadd.f32 %v4733_v61, %v2705_v51  ;;  %v5979_v52 = vpop.f32.mrb[12].mxu1 }
 0x234   : > { %v2718_v10 = vpop.f32.mrb[13].mxu1  ;;  %v4839_v16 = vadd.f32 %v6218_v48, %v8613_v11  ;;  %v4870_v5 = vmax.f32 %v4838_v60, 0.0 }
 0x235   : > { %v4868_v27 = vmax.f32 %v4836_v3, 0.0  ;;  %v4899_v14 = vadd.f32 %v4898_v20, %v4867_v28  ;;  %v4837_v63 = vadd.f32 %v6219_v19, %v8613_v11  ;;  %v5980_v32 = vpop.f32.mrb[14].mxu1 }
 0x236   : > { %v2721_v40 = vpop.f32.mrb[15].mxu1  ;;  %v4871_v47 = vmax.f32 %v4839_v16, 0.0 }
 0x237   : > { %v4900_v29 = vadd.f32 %v4899_v14, %v4868_v27  ;;  %v4869_v57 = vmax.f32 %v4837_v63, 0.0  ;;  %v6115_v24 = vpop.f32.mrb[36].mxu0 }
 0x238   : > { %v6220_v30 = vadd.f32 %v6115_v24, %v5979_v52  ;;  %v4746_v31 = vpop.f32.mrb[37].mxu0 }
 0x239   : > { %v4901_v53 = vadd.f32 %v4900_v29, %v4869_v57  ;;  %v6221_v56 = vadd.f32 %v4746_v31, %v2718_v10  ;;  %v6116_v4 = vpop.f32.mrb[38].mxu0 }
 0x23a   : > { %v6222_v38 = vadd.f32 %v6116_v4, %v5980_v32  ;;  %v4749_v21 = vpop.f32.mrb[39].mxu0  ;;  %v4842_v41 = vadd.f32 %v6220_v30, %v8613_v11 }
 0x23b   : > { %v4902_v15 = vadd.f32 %v4901_v53, %v4870_v5  ;;  %v4840_v42 = vadd.f32 %v6221_v56, %v8613_v11  ;;  %v6223_v25 = vadd.f32 %v4749_v21, %v2721_v40  ;;  %v5983_v50 = vpop.f32.mrb[16].mxu1 }
 0x23c   : > { %v2734_v0 = vpop.f32.mrb[17].mxu1  ;;  %v4843_v13 = vadd.f32 %v6222_v38, %v8613_v11  ;;  %v4874_v44 = vmax.f32 %v4842_v41, 0.0 }
 0x23d   : > { %v4872_v62 = vmax.f32 %v4840_v42, 0.0  ;;  %v4903_v9 = vadd.f32 %v4902_v15, %v4871_v47  ;;  %v4841_v1 = vadd.f32 %v6223_v25, %v8613_v11  ;;  %v5984_v59 = vpop.f32.mrb[18].mxu1 }
 0x23e   : > { %v2737_v22 = vpop.f32.mrb[19].mxu1  ;;  %v4875_v45 = vmax.f32 %v4843_v13, 0.0 }
 0x23f   : > { %v4904_v18 = vadd.f32 %v4903_v9, %v4872_v62  ;;  %v4873_v39 = vmax.f32 %v4841_v1, 0.0  ;;  %v6119_v2 = vpop.f32.mrb[40].mxu0 }
 0x240   : > { %v6224_v55 = vadd.f32 %v6119_v2, %v5983_v50  ;;  %v4762_v46 = vpop.f32.mrb[41].mxu0 }
 0x241   : > { %v4905_v33 = vadd.f32 %v4904_v18, %v4873_v39  ;;  %v6225_v35 = vadd.f32 %v4762_v46, %v2734_v0  ;;  %v6120_v54 = vpop.f32.mrb[42].mxu0 }
 0x242   : > { %v6226_v7 = vadd.f32 %v6120_v54, %v5984_v59  ;;  %v4765_v36 = vpop.f32.mrb[43].mxu0  ;;  %v4846_v43 = vadd.f32 %v6224_v55, %v8613_v11 }
 0x243   : > { %v4906_v17 = vadd.f32 %v4905_v33, %v4874_v44  ;;  %v4844_v51 = vadd.f32 %v6225_v35, %v8613_v11  ;;  %v6227_v58 = vadd.f32 %v4765_v36, %v2737_v22 }
 0x244   : > { %v4847_v26 = vadd.f32 %v6226_v7, %v8613_v11  ;;  %v4878_v34 = vmax.f32 %v4846_v43, 0.0 }
 0x245   : > { %v4876_v8 = vmax.f32 %v4844_v51, 0.0  ;;  %v4907_v37 = vadd.f32 %v4906_v17, %v4875_v45  ;;  %v4845_v49 = vadd.f32 %v6227_v58, %v8613_v11  ;;  %v4941_v11 = vld [vmem:[%s8714_s4] sm:$0x1] }
 0x246   : > { %v4879_v48 = vmax.f32 %v4847_v26, 0.0 }
 0x247   : > { %v4908_v6 = vadd.f32 %v4907_v37, %v4876_v8  ;;  %v4877_v23 = vmax.f32 %v4845_v49, 0.0 }
 0x249   : > { %v4909_v12 = vadd.f32 %v4908_v6, %v4877_v23 }
 0x24b   : > { %v4910_v61 = vadd.f32 %v4909_v12, %v4878_v34 }
 0x24d   : > { %v4911_v28 = vadd.f32 %v4910_v61, %v4879_v48 }
 0x24f   : > { %v4918_v20 = vrot.slane %v4911_v28, 4 }
 0x251   : > { %v4919_v3 = vadd.f32 %v4918_v20, %v4911_v28 }
 0x253   : > { %v4920_v19 = vrot.slane %v4919_v3, 2 }
 0x255   : > { %v4921_v52 = vadd.f32 %v4920_v19, %v4919_v3 }
 0x257   : > { %v4922_v10 = vrot.slane %v4921_v52, 1 }
 0x259   : > { %v4923_v60 = vadd.f32 %v4922_v10, %v4921_v52 }
 0x25b   : > { %v4924_v27 = vmul.f32 0.00390625, %v4923_v60 }
 0x25d   : > { %6154 = vmatmul.mubr.f32.vlgmr.msra.gmra.mrb[32].mxu1 %v4924_v27 }
 0x330   : > { %v5008_v14 = vpop.f32.mrb[32].mxu1 }
 0x331   : > { %v5009_v63 = vadd.f32 %v5008_v14, %v4941_v11  ;;  %v6155_v32 = vpop.f32.mrb[33].mxu1 }
 0x333   : > { %5012 = vst [vmem:[%s228_s10] sm:$0x1] %v5009_v63 }
 0x334   : > { %6628 = shalt.err (!%p6625_p5)
}
 0x335   : > { %s6629_s25 = scalar_lea.hbm %s8663_s14, 16  ;;  %s6633_s7 = scalar_lea.hbm %s8715_s5, 32 }
 0x336   : > { %p6630_p6 = scmp.ne.s32.totalorder %s8663_s14, %s6629_s25  ;;  %p6634_p10 = scmp.lt.u32.totalorder %s8663_s14, %s8715_s5 }
 0x337   : > { %p6635_p11 = scmp.lt.u32.totalorder %s6633_s7, %s6629_s25  ;;  %p6637_p13 = scmp.lt.u32.totalorder %s6629_s25, %s8663_s14 }
 0x338   : > { %p6631_p7 = pnand %p6630_p6, %p6769_p4 }
 0x339   : > { %p6636_p12 = por %p6635_p11, %p6634_p10 }
 0x33a   : > { %p6632_p9 = pneg %p6631_p7 }
 0x33b   : > { %p6638_p0 = por %p6637_p13, %p6636_p12 }
 0x33d   : > { %p6639_p1 = pnand %p6638_p0, %p6632_p9 }
 0x33f   : > { %6642 = shalt.err (!%p6639_p1)
}
 0x340   : > { %6452 = dma.vmem_to_hbm [thread:$0]  (%p6769_p4), %s8665_s11, 16, %s8663_s14, %s5014_s15  }
 0x341 PF: > { %p6458_p2 = scmp.ge.s32.totalorder %s6693_s23, 2  ;;  %s5038_s10 = sand.u32 1, %s6673_s18  }
 0x342   : > { %s5039_s12 = scalar_lea.sflag [#allocation4], %s5038_s10 }
 0x343   : > { %p6455_p3 = pnand %p6458_p2, %p6776_p8 }
 0x345   : > { %6668 = dma.done.wait (!%p6455_p3), %s5039_s12, 16  }
 0x346   : > { %6670 = vsyncadd (!%p6455_p3), %s5039_s12, 4294967280  ;;  %s18_s23 = sadd.s32 1, %s6693_s23   ;;  %s8793_s18 = smov %s6677_s19 }
 0x347   : > { %p15_p5 = scmp.ge.s32.totalorder %s18_s23, 4   ;;  %s8794_s19 = smov %s6681_s20 }
 0x348   : > { %s8795_s20 = smov %s6782_s6  ;;  %s8796_s21 = smov %s6689_s22 }
 0x349   : > { %s8797_s22 = smov %s8799_s26  ;;  %17 = sbr.rel (!%p15_p5) target bundleno = 4 (0x4), region = 94 }
 0x350   :  { %5043 = vsyncpa [#allocation4], 1 }
 0x351   :  { %5045 = vsyncpa [#allocation4 + $0x1], 1 }

</bundles_post_ra>
